<compile_context>
chip_gen: v6e
topology: v6e:2x2x1
jax: 0.10.0
libtpu: 0.0.40
codegen_flags: <defaults>
</compile_context>

<pallas_src>
import functools

import jax
import jax.numpy as jnp
from jax.experimental import pallas as pl
from jax.experimental.pallas import tpu as pltpu

EPS = 1e-5
LANE = 128
# Set to jnp.bfloat16 on v6e/v7x for higher MXU throughput (re-check tolerance).
MATMUL_DTYPE = jnp.float32


def _round_up(x, m):
    return (x + m - 1) // m * m


# ---------------------------------------------------------------------------
# Kernels
# ---------------------------------------------------------------------------
def _shift_rows(v, d):
    """window[h] = v[h + d - 1], zero-filled outside (axis 0)."""
    if d == 0:
        return jnp.concatenate([jnp.zeros_like(v[:1]), v[:-1]], axis=0)
    if d == 2:
        return jnp.concatenate([v[1:], jnp.zeros_like(v[:1])], axis=0)
    return v


def _shift_cols(v, d):
    """window[:, w] = v[:, w + d - 1], zero-filled outside (axis 1)."""
    if d == 0:
        return jnp.concatenate([jnp.zeros_like(v[:, :1]), v[:, :-1]], axis=1)
    if d == 2:
        return jnp.concatenate([v[:, 1:], jnp.zeros_like(v[:, :1])], axis=1)
    return v


def _conv_core(x, w_ref, out_ref, stats_ref):
    """x: (H, W, Cp) f32. Writes pre-BN conv output + per-block (sum, sumsq)."""
    H, W, Cp = x.shape
    Coutp = out_ref.shape[-1]
    # im2col: 9 taps stacked into the contraction dim -> one big-K matmul.
    rows = [_shift_rows(x, dy) for dy in range(3)]
    windows = [_shift_cols(r, dx) for r in rows for dx in range(3)]  # dy*3+dx
    patches = jnp.concatenate(windows, axis=-1).reshape(H * W, 9 * Cp)
    acc = jnp.dot(patches.astype(MATMUL_DTYPE),
                  w_ref[...].astype(MATMUL_DTYPE),
                  preferred_element_type=jnp.float32)           # (H*W, Coutp)
    out_ref[0] = acc.reshape(H, W, Coutp)                       # lane-dense
    # Single-pass BN statistics (per-channel sum and sum of squares).
    s = jnp.sum(acc, axis=0, keepdims=True)
    ss = jnp.sum(acc * acc, axis=0, keepdims=True)
    stats_ref[0] = jnp.concatenate([s, ss], axis=0)


def conv_stats_kernel(x_ref, w_ref, out_ref, stats_ref):
    _conv_core(x_ref[0], w_ref, out_ref, stats_ref)


def bnrelu_conv_stats_kernel(x_ref, scale_ref, shift_ref, w_ref,
                             out_ref, stats_ref):
    # Normalize+ReLU of the previous conv's raw output, fused into this conv.
    x = jnp.maximum(x_ref[0] * scale_ref[...] + shift_ref[...], 0.0)
    _conv_core(x, w_ref, out_ref, stats_ref)


def bn_relu_kernel(x_ref, scale_ref, shift_ref, out_ref):
    out_ref[0] = jnp.maximum(x_ref[0] * scale_ref[...] + shift_ref[...], 0.0)


# ---------------------------------------------------------------------------
# pallas_call wrappers
# ---------------------------------------------------------------------------
def _compiler_params():
    return pltpu.CompilerParams(
        dimension_semantics=("parallel",),
        vmem_limit_bytes=32 * 1024 * 1024)


def _conv_block(x, w, scale=None, shift=None):
    """One 3x3 conv (pad=1, no bias) over channel-padded NHWC x, optionally
    with a fused input BN+ReLU.  Returns (conv_out_pre_bn, per_block_stats)."""
    N, H, W, Cp = x.shape
    Coutp = w.shape[-1]
    x_spec = pl.BlockSpec((1, H, W, Cp), lambda n: (n, 0, 0, 0))
    vec_spec = pl.BlockSpec((1, Cp), lambda n: (0, 0))
    w_spec = pl.BlockSpec((9 * Cp, Coutp), lambda n: (0, 0))
    out_specs = (pl.BlockSpec((1, H, W, Coutp), lambda n: (n, 0, 0, 0)),
                 pl.BlockSpec((1, 2, Coutp), lambda n: (n, 0, 0)))
    out_shape = (jax.ShapeDtypeStruct((N, H, W, Coutp), jnp.float32),
                 jax.ShapeDtypeStruct((N, 2, Coutp), jnp.float32))
    if scale is None:
        return pl.pallas_call(
            conv_stats_kernel, grid=(N,),
            in_specs=[x_spec, w_spec],
            out_specs=out_specs, out_shape=out_shape,
            compiler_params=_compiler_params(),
        )(x, w)
    return pl.pallas_call(
        bnrelu_conv_stats_kernel, grid=(N,),
        in_specs=[x_spec, vec_spec, vec_spec, w_spec],
        out_specs=out_specs, out_shape=out_shape,
        compiler_params=_compiler_params(),
    )(x, scale, shift, w)


def _bn_relu(x, scale, shift):
    N, H, W, Cp = x.shape
    return pl.pallas_call(
        bn_relu_kernel, grid=(N,),
        in_specs=[pl.BlockSpec((1, H, W, Cp), lambda n: (n, 0, 0, 0)),
                  pl.BlockSpec((1, Cp), lambda n: (0, 0)),
                  pl.BlockSpec((1, Cp), lambda n: (0, 0))],
        out_specs=pl.BlockSpec((1, H, W, Cp), lambda n: (n, 0, 0, 0)),
        out_shape=jax.ShapeDtypeStruct((N, H, W, Cp), jnp.float32),
        compiler_params=_compiler_params(),
    )(x, scale, shift)


# ---------------------------------------------------------------------------
# Parameter prep + full DoubleConv forward
# ---------------------------------------------------------------------------
def _prep_weight(w_oihw, cin_p, cout_p):
    """[Cout, Cin, 3, 3] (PyTorch OIHW) -> [9*cin_p, cout_p], tap = ky*3+kx."""
    cout, cin = w_oihw.shape[0], w_oihw.shape[1]
    w = jnp.transpose(w_oihw, (2, 3, 1, 0)).reshape(9, cin, cout)
    w = jnp.pad(w, ((0, 0), (0, cin_p - cin), (0, cout_p - cout)))
    return w.reshape(9 * cin_p, cout_p)


def _pad_channels(x_nhwc, cp):
    c = x_nhwc.shape[-1]
    if c == cp:
        return x_nhwc
    return jnp.pad(x_nhwc, ((0, 0), (0, 0), (0, 0), (0, cp - c)))


def _finalize_bn(per_block_stats, gamma, beta, count, cout_p):
    """Reduce per-block (sum, sumsq) -> per-channel affine scale/shift."""
    s = jnp.sum(per_block_stats, axis=0)               # (2, cout_p)
    mean = s[0] / count
    var = jnp.maximum(s[1] / count - mean * mean, 0.0)  # biased variance
    inv = jax.lax.rsqrt(var + EPS)
    g = jnp.pad(gamma, (0, cout_p - gamma.shape[0]))
    b = jnp.pad(beta, (0, cout_p - beta.shape[0]))
    scale = g * inv
    shift = b - mean * scale
    return scale.reshape(1, -1), shift.reshape(1, -1)


@jax.jit
def double_conv(x_nchw, w1_oihw, g1, b1, w2_oihw, g2, b2):
    """DoubleConv forward. Input/output NCHW float32 (PyTorch convention)."""
    N, cin, H, W = x_nchw.shape
    cout = w1_oihw.shape[0]
    cin_p = _round_up(cin, LANE)
    cout_p = _round_up(cout, LANE)
    count = N * H * W

    x = jnp.transpose(x_nchw, (0, 2, 3, 1))            # NCHW -> NHWC
    x = _pad_channels(x, cin_p)
    w1 = _prep_weight(w1_oihw, cin_p, cout_p)
    w2 = _prep_weight(w2_oihw, cout_p, cout_p)

    # conv1 + batch statistics
    raw1, st1 = _conv_block(x, w1)
    sc1, sh1 = _finalize_bn(st1, g1, b1, count, cout_p)
    # BN1+ReLU fused into conv2 (+ its batch statistics)
    raw2, st2 = _conv_block(raw1, w2, sc1, sh1)
    sc2, sh2 = _finalize_bn(st2, g2, b2, count, cout_p)
    # final BN2 + ReLU
    y = _bn_relu(raw2, sc2, sh2)

    y = y[..., :cout]                                   # drop channel padding
    return jnp.transpose(y, (0, 3, 1, 2))               # NHWC -> NCHW


def _reference_double_conv(x, w1, g1, b1, w2, g2, b2):
    """Pure-JAX/XLA reference (training-mode BN), for verification only."""
    def block(x, w, g, b):
        y = jax.lax.conv_general_dilated(
            x, w, window_strides=(1, 1), padding=((1, 1), (1, 1)),
            dimension_numbers=("NCHW", "OIHW", "NCHW"))
        mean = y.mean(axis=(0, 2, 3), keepdims=True)
        var = ((y - mean) ** 2).mean(axis=(0, 2, 3), keepdims=True)
        y = (y - mean) * jax.lax.rsqrt(var + EPS)
        y = y * g.reshape(1, -1, 1, 1) + b.reshape(1, -1, 1, 1)
        return jnp.maximum(y, 0.0)
    return block(block(x, w1, g1, b1), w2, g2, b2)


if __name__ == "__main__":
    key = jax.random.PRNGKey(0)
    k_x, k_w1, k_w2 = jax.random.split(key, 3)

    N, Cin, Cout, H, W = 2, 4, 8, 16, 16

    x = jax.random.normal(k_x, (N, Cin, H, W), dtype=jnp.float32)

    # Conv weights (kaiming-ish scale, deterministic); bias=False in the module.
    w1 = jax.random.normal(k_w1, (Cout, Cin, 3, 3), dtype=jnp.float32) * 0.1
    w2 = jax.random.normal(k_w2, (Cout, Cout, 3, 3), dtype=jnp.float32) * 0.1
    # BatchNorm2d defaults: weight(gamma)=1, bias(beta)=0.
    g1 = jnp.ones((Cout,), jnp.float32)
    b1 = jnp.zeros((Cout,), jnp.float32)
    g2 = jnp.ones((Cout,), jnp.float32)
    b2 = jnp.zeros((Cout,), jnp.float32)

    out = double_conv(x, w1, g1, b1, w2, g2, b2)
    out = jax.block_until_ready(out)

    ref = _reference_double_conv(x, w1, g1, b1, w2, g2, b2)
    ref = jax.block_until_ready(ref)

    assert out.shape == (N, Cout, H, W), out.shape
    assert jnp.allclose(out, ref, rtol=2e-4, atol=2e-4), float(
        jnp.max(jnp.abs(out - ref)))

    print("KERNEL_OK")
</pallas_src>

<mosaic_0001>
module attributes {stable_mosaic.version = 11 : i64} {
  func.func @conv_stats_kernel(%arg0: i32, %arg1: memref<1x16x16x128xf32, #tpu.memory_space<vmem>>, %arg2: memref<1152x128xf32, #tpu.memory_space<vmem>>, %arg3: memref<1x16x16x128xf32, #tpu.memory_space<vmem>>, %arg4: memref<1x2x128xf32, #tpu.memory_space<vmem>>) attributes {dimension_semantics = [#tpu.dimension_semantics<parallel>], iteration_bounds = array<i64: 2>, scalar_prefetch = 0 : i64, scratch_operands = 0 : i64, tpu.core_type = #tpu.core_type<tc>, window_params = [{transform_indices = @transform_0, window_bounds = array<i64: 1, 16, 16, 128>}, {pipeline_mode = #tpu.pipeline_mode<synchronous>, transform_indices = @transform_1, window_bounds = array<i64: 1152, 128>}, {transform_indices = @transform_2, window_bounds = array<i64: 1, 16, 16, 128>}, {transform_indices = @transform_3, window_bounds = array<i64: 1, 2, 128>}]} {
    %c0 = arith.constant 0 : index
    %c0_0 = arith.constant 0 : index
    %c0_1 = arith.constant 0 : index
    %c0_2 = arith.constant 0 : index
    %0 = vector.load %arg1[%c0, %c0_0, %c0_1, %c0_2] : memref<1x16x16x128xf32, #tpu.memory_space<vmem>>, vector<1x16x16x128xf32>
    %1 = vector.shape_cast %0 : vector<1x16x16x128xf32> to vector<16x16x128xf32>
    %cst = arith.constant 0.000000e+00 : f32
    %2 = vector.broadcast %cst : f32 to vector<1x16x128xf32>
    %3 = vector.extract_strided_slice %1 {offsets = [0, 0, 0], sizes = [15, 16, 128], strides = [1, 1, 1]} : vector<16x16x128xf32> to vector<15x16x128xf32>
    %4 = tpu.concatenate %2, %3 in 0 : vector<1x16x128xf32>, vector<15x16x128xf32> -> vector<16x16x128xf32>
    %5 = vector.extract_strided_slice %1 {offsets = [1, 0, 0], sizes = [15, 16, 128], strides = [1, 1, 1]} : vector<16x16x128xf32> to vector<15x16x128xf32>
    %cst_3 = arith.constant 0.000000e+00 : f32
    %6 = vector.broadcast %cst_3 : f32 to vector<1x16x128xf32>
    %7 = tpu.concatenate %5, %6 in 0 : vector<15x16x128xf32>, vector<1x16x128xf32> -> vector<16x16x128xf32>
    %cst_4 = arith.constant 0.000000e+00 : f32
    %8 = vector.broadcast %cst_4 : f32 to vector<16x1x128xf32>
    %9 = vector.extract_strided_slice %4 {offsets = [0, 0, 0], sizes = [16, 15, 128], strides = [1, 1, 1]} : vector<16x16x128xf32> to vector<16x15x128xf32>
    %10 = tpu.concatenate %8, %9 in 1 : vector<16x1x128xf32>, vector<16x15x128xf32> -> vector<16x16x128xf32>
    %11 = vector.extract_strided_slice %4 {offsets = [0, 1, 0], sizes = [16, 15, 128], strides = [1, 1, 1]} : vector<16x16x128xf32> to vector<16x15x128xf32>
    %cst_5 = arith.constant 0.000000e+00 : f32
    %12 = vector.broadcast %cst_5 : f32 to vector<16x1x128xf32>
    %13 = tpu.concatenate %11, %12 in 1 : vector<16x15x128xf32>, vector<16x1x128xf32> -> vector<16x16x128xf32>
    %cst_6 = arith.constant 0.000000e+00 : f32
    %14 = vector.broadcast %cst_6 : f32 to vector<16x1x128xf32>
    %15 = vector.extract_strided_slice %1 {offsets = [0, 0, 0], sizes = [16, 15, 128], strides = [1, 1, 1]} : vector<16x16x128xf32> to vector<16x15x128xf32>
    %16 = tpu.concatenate %14, %15 in 1 : vector<16x1x128xf32>, vector<16x15x128xf32> -> vector<16x16x128xf32>
    %17 = vector.extract_strided_slice %1 {offsets = [0, 1, 0], sizes = [16, 15, 128], strides = [1, 1, 1]} : vector<16x16x128xf32> to vector<16x15x128xf32>
    %cst_7 = arith.constant 0.000000e+00 : f32
    %18 = vector.broadcast %cst_7 : f32 to vector<16x1x128xf32>
    %19 = tpu.concatenate %17, %18 in 1 : vector<16x15x128xf32>, vector<16x1x128xf32> -> vector<16x16x128xf32>
    %cst_8 = arith.constant 0.000000e+00 : f32
    %20 = vector.broadcast %cst_8 : f32 to vector<16x1x128xf32>
    %21 = vector.extract_strided_slice %7 {offsets = [0, 0, 0], sizes = [16, 15, 128], strides = [1, 1, 1]} : vector<16x16x128xf32> to vector<16x15x128xf32>
    %22 = tpu.concatenate %20, %21 in 1 : vector<16x1x128xf32>, vector<16x15x128xf32> -> vector<16x16x128xf32>
    %23 = vector.extract_strided_slice %7 {offsets = [0, 1, 0], sizes = [16, 15, 128], strides = [1, 1, 1]} : vector<16x16x128xf32> to vector<16x15x128xf32>
    %cst_9 = arith.constant 0.000000e+00 : f32
    %24 = vector.broadcast %cst_9 : f32 to vector<16x1x128xf32>
    %25 = tpu.concatenate %23, %24 in 1 : vector<16x15x128xf32>, vector<16x1x128xf32> -> vector<16x16x128xf32>
    %26 = tpu.concatenate %10, %4, %13, %16, %1, %19, %22, %7, %25 in 2 : vector<16x16x128xf32>, vector<16x16x128xf32>, vector<16x16x128xf32>, vector<16x16x128xf32>, vector<16x16x128xf32>, vector<16x16x128xf32>, vector<16x16x128xf32>, vector<16x16x128xf32>, vector<16x16x128xf32> -> vector<16x16x1152xf32>
    %27 = vector.shape_cast %26 : vector<16x16x1152xf32> to vector<256x1152xf32>
    %c0_10 = arith.constant 0 : index
    %c0_11 = arith.constant 0 : index
    %28 = vector.load %arg2[%c0_10, %c0_11] : memref<1152x128xf32, #tpu.memory_space<vmem>>, vector<1152x128xf32>
    %cst_12 = arith.constant dense<0.000000e+00> : vector<256x128xf32>
    %29 = tpu.matmul %27, %28, %cst_12 {dimension_numbers = #tpu.dot_dimension_numbers<[1], [0], [0], [1], [0, 0, 1, 1], [], []>} : vector<256x1152xf32>, vector<1152x128xf32>, vector<256x128xf32> -> vector<256x128xf32>
    %30 = vector.shape_cast %29 : vector<256x128xf32> to vector<16x16x128xf32>
    %c0_13 = arith.constant 0 : index
    %c0_14 = arith.constant 0 : index
    %c0_15 = arith.constant 0 : index
    %c0_16 = arith.constant 0 : index
    %31 = vector.load %arg3[%c0_13, %c0_14, %c0_15, %c0_16] : memref<1x16x16x128xf32, #tpu.memory_space<vmem>>, vector<1x16x16x128xf32>
    %32 = vector.shape_cast %31 : vector<1x16x16x128xf32> to vector<16x16x128xf32>
    %33 = vector.shape_cast %30 : vector<16x16x128xf32> to vector<1x16x16x128xf32>
    tpu.vector_store %arg3[%c0_13, %c0_14, %c0_15, %c0_16], %33 {strides = array<i32>} : memref<1x16x16x128xf32, #tpu.memory_space<vmem>>, vector<1x16x16x128xf32>,
    %cst_17 = arith.constant dense<0.000000e+00> : vector<128xf32>
    %34 = vector.multi_reduction <add>, %29, %cst_17 [0] : vector<256x128xf32> to vector<128xf32>
    %35 = vector.shape_cast %34 : vector<128xf32> to vector<1x128xf32>
    %36 = arith.mulf %29, %29 : vector<256x128xf32>
    %cst_18 = arith.constant dense<0.000000e+00> : vector<128xf32>
    %37 = vector.multi_reduction <add>, %36, %cst_18 [0] : vector<256x128xf32> to vector<128xf32>
    %38 = vector.shape_cast %37 : vector<128xf32> to vector<1x128xf32>
    %39 = tpu.concatenate %35, %38 in 0 : vector<1x128xf32>, vector<1x128xf32> -> vector<2x128xf32>
    %c0_19 = arith.constant 0 : index
    %c0_20 = arith.constant 0 : index
    %c0_21 = arith.constant 0 : index
    %40 = vector.load %arg4[%c0_19, %c0_20, %c0_21] : memref<1x2x128xf32, #tpu.memory_space<vmem>>, vector<1x2x128xf32>
    %41 = vector.shape_cast %40 : vector<1x2x128xf32> to vector<2x128xf32>
    %42 = vector.shape_cast %39 : vector<2x128xf32> to vector<1x2x128xf32>
    tpu.vector_store %arg4[%c0_19, %c0_20, %c0_21], %42 {strides = array<i32>} : memref<1x2x128xf32, #tpu.memory_space<vmem>>, vector<1x2x128xf32>,
    return
  }
  func.func @transform_0(%arg0: i32) -> (i32, i32, i32, i32) {
    %c0_i32 = arith.constant 0 : i32
    %c0_i32_0 = arith.constant 0 : i32
    %c0_i32_1 = arith.constant 0 : i32
    %c0_i32_2 = arith.constant 0 : i32
    return %arg0, %c0_i32, %c0_i32_0, %c0_i32_1 : i32, i32, i32, i32
  }
  func.func @transform_1(%arg0: i32) -> (i32, i32) {
    %c0_i32 = arith.constant 0 : i32
    %c0_i32_0 = arith.constant 0 : i32
    %c0_i32_1 = arith.constant 0 : i32
    return %c0_i32, %c0_i32_0 : i32, i32
  }
  func.func @transform_2(%arg0: i32) -> (i32, i32, i32, i32) {
    %c0_i32 = arith.constant 0 : i32
    %c0_i32_0 = arith.constant 0 : i32
    %c0_i32_1 = arith.constant 0 : i32
    %c0_i32_2 = arith.constant 0 : i32
    return %arg0, %c0_i32, %c0_i32_0, %c0_i32_1 : i32, i32, i32, i32
  }
  func.func @transform_3(%arg0: i32) -> (i32, i32, i32) {
    %c0_i32 = arith.constant 0 : i32
    %c0_i32_0 = arith.constant 0 : i32
    %c0_i32_1 = arith.constant 0 : i32
    return %arg0, %c0_i32, %c0_i32_0 : i32, i32, i32
  }
}

module attributes {stable_mosaic.version = 11 : i64} {
  func.func @bn_relu_kernel(%arg0: i32, %arg1: memref<1x16x16x128xf32, #tpu.memory_space<vmem>>, %arg2: memref<1x128xf32, #tpu.memory_space<vmem>>, %arg3: memref<1x128xf32, #tpu.memory_space<vmem>>, %arg4: memref<1x16x16x128xf32, #tpu.memory_space<vmem>>) attributes {dimension_semantics = [#tpu.dimension_semantics<parallel>], iteration_bounds = array<i64: 2>, scalar_prefetch = 0 : i64, scratch_operands = 0 : i64, tpu.core_type = #tpu.core_type<tc>, window_params = [{transform_indices = @transform_0, window_bounds = array<i64: 1, 16, 16, 128>}, {pipeline_mode = #tpu.pipeline_mode<synchronous>, transform_indices = @transform_1, window_bounds = array<i64: 1, 128>}, {pipeline_mode = #tpu.pipeline_mode<synchronous>, transform_indices = @transform_2, window_bounds = array<i64: 1, 128>}, {transform_indices = @transform_3, window_bounds = array<i64: 1, 16, 16, 128>}]} {
    %c0 = arith.constant 0 : index
    %c0_0 = arith.constant 0 : index
    %c0_1 = arith.constant 0 : index
    %c0_2 = arith.constant 0 : index
    %0 = vector.load %arg1[%c0, %c0_0, %c0_1, %c0_2] : memref<1x16x16x128xf32, #tpu.memory_space<vmem>>, vector<1x16x16x128xf32>
    %1 = vector.shape_cast %0 : vector<1x16x16x128xf32> to vector<16x16x128xf32>
    %c0_3 = arith.constant 0 : index
    %c0_4 = arith.constant 0 : index
    %2 = vector.load %arg2[%c0_3, %c0_4] : memref<1x128xf32, #tpu.memory_space<vmem>>, vector<1x128xf32>
    %3 = vector.shape_cast %2 : vector<1x128xf32> to vector<1x1x128xf32>
    %4 = vector.broadcast %3 : vector<1x1x128xf32> to vector<16x16x128xf32>
    %5 = arith.mulf %1, %4 : vector<16x16x128xf32>
    %c0_5 = arith.constant 0 : index
    %c0_6 = arith.constant 0 : index
    %6 = vector.load %arg3[%c0_5, %c0_6] : memref<1x128xf32, #tpu.memory_space<vmem>>, vector<1x128xf32>
    %7 = vector.shape_cast %6 : vector<1x128xf32> to vector<1x1x128xf32>
    %8 = vector.broadcast %7 : vector<1x1x128xf32> to vector<16x16x128xf32>
    %9 = arith.addf %5, %8 : vector<16x16x128xf32>
    %cst = arith.constant 0.000000e+00 : f32
    %10 = vector.broadcast %cst : f32 to vector<16x16x128xf32>
    %11 = arith.maximumf %9, %10 : vector<16x16x128xf32>
    %c0_7 = arith.constant 0 : index
    %c0_8 = arith.constant 0 : index
    %c0_9 = arith.constant 0 : index
    %c0_10 = arith.constant 0 : index
    %12 = vector.load %arg4[%c0_7, %c0_8, %c0_9, %c0_10] : memref<1x16x16x128xf32, #tpu.memory_space<vmem>>, vector<1x16x16x128xf32>
    %13 = vector.shape_cast %12 : vector<1x16x16x128xf32> to vector<16x16x128xf32>
    %14 = vector.shape_cast %11 : vector<16x16x128xf32> to vector<1x16x16x128xf32>
    tpu.vector_store %arg4[%c0_7, %c0_8, %c0_9, %c0_10], %14 {strides = array<i32>} : memref<1x16x16x128xf32, #tpu.memory_space<vmem>>, vector<1x16x16x128xf32>,
    return
  }
  func.func @transform_0(%arg0: i32) -> (i32, i32, i32, i32) {
    %c0_i32 = arith.constant 0 : i32
    %c0_i32_0 = arith.constant 0 : i32
    %c0_i32_1 = arith.constant 0 : i32
    %c0_i32_2 = arith.constant 0 : i32
    return %arg0, %c0_i32, %c0_i32_0, %c0_i32_1 : i32, i32, i32, i32
  }
  func.func @transform_1(%arg0: i32) -> (i32, i32) {
    %c0_i32 = arith.constant 0 : i32
    %c0_i32_0 = arith.constant 0 : i32
    %c0_i32_1 = arith.constant 0 : i32
    return %c0_i32, %c0_i32_0 : i32, i32
  }
  func.func @transform_2(%arg0: i32) -> (i32, i32) {
    %c0_i32 = arith.constant 0 : i32
    %c0_i32_0 = arith.constant 0 : i32
    %c0_i32_1 = arith.constant 0 : i32
    return %c0_i32, %c0_i32_0 : i32, i32
  }
  func.func @transform_3(%arg0: i32) -> (i32, i32, i32, i32) {
    %c0_i32 = arith.constant 0 : i32
    %c0_i32_0 = arith.constant 0 : i32
    %c0_i32_1 = arith.constant 0 : i32
    %c0_i32_2 = arith.constant 0 : i32
    return %arg0, %c0_i32, %c0_i32_0, %c0_i32_1 : i32, i32, i32, i32
  }
}

module attributes {stable_mosaic.version = 11 : i64} {
  func.func @bnrelu_conv_stats_kernel(%arg0: i32, %arg1: memref<1x16x16x128xf32, #tpu.memory_space<vmem>>, %arg2: memref<1x128xf32, #tpu.memory_space<vmem>>, %arg3: memref<1x128xf32, #tpu.memory_space<vmem>>, %arg4: memref<1152x128xf32, #tpu.memory_space<vmem>>, %arg5: memref<1x16x16x128xf32, #tpu.memory_space<vmem>>, %arg6: memref<1x2x128xf32, #tpu.memory_space<vmem>>) attributes {dimension_semantics = [#tpu.dimension_semantics<parallel>], iteration_bounds = array<i64: 2>, scalar_prefetch = 0 : i64, scratch_operands = 0 : i64, tpu.core_type = #tpu.core_type<tc>, window_params = [{transform_indices = @transform_0, window_bounds = array<i64: 1, 16, 16, 128>}, {pipeline_mode = #tpu.pipeline_mode<synchronous>, transform_indices = @transform_1, window_bounds = array<i64: 1, 128>}, {pipeline_mode = #tpu.pipeline_mode<synchronous>, transform_indices = @transform_2, window_bounds = array<i64: 1, 128>}, {pipeline_mode = #tpu.pipeline_mode<synchronous>, transform_indices = @transform_3, window_bounds = array<i64: 1152, 128>}, {transform_indices = @transform_4, window_bounds = array<i64: 1, 16, 16, 128>}, {transform_indices = @transform_5, window_bounds = array<i64: 1, 2, 128>}]} {
    %c0 = arith.constant 0 : index
    %c0_0 = arith.constant 0 : index
    %c0_1 = arith.constant 0 : index
    %c0_2 = arith.constant 0 : index
    %0 = vector.load %arg1[%c0, %c0_0, %c0_1, %c0_2] : memref<1x16x16x128xf32, #tpu.memory_space<vmem>>, vector<1x16x16x128xf32>
    %1 = vector.shape_cast %0 : vector<1x16x16x128xf32> to vector<16x16x128xf32>
    %c0_3 = arith.constant 0 : index
    %c0_4 = arith.constant 0 : index
    %2 = vector.load %arg2[%c0_3, %c0_4] : memref<1x128xf32, #tpu.memory_space<vmem>>, vector<1x128xf32>
    %3 = vector.shape_cast %2 : vector<1x128xf32> to vector<1x1x128xf32>
    %4 = vector.broadcast %3 : vector<1x1x128xf32> to vector<16x16x128xf32>
    %5 = arith.mulf %1, %4 : vector<16x16x128xf32>
    %c0_5 = arith.constant 0 : index
    %c0_6 = arith.constant 0 : index
    %6 = vector.load %arg3[%c0_5, %c0_6] : memref<1x128xf32, #tpu.memory_space<vmem>>, vector<1x128xf32>
    %7 = vector.shape_cast %6 : vector<1x128xf32> to vector<1x1x128xf32>
    %8 = vector.broadcast %7 : vector<1x1x128xf32> to vector<16x16x128xf32>
    %9 = arith.addf %5, %8 : vector<16x16x128xf32>
    %cst = arith.constant 0.000000e+00 : f32
    %10 = vector.broadcast %cst : f32 to vector<16x16x128xf32>
    %11 = arith.maximumf %9, %10 : vector<16x16x128xf32>
    %cst_7 = arith.constant 0.000000e+00 : f32
    %12 = vector.broadcast %cst_7 : f32 to vector<1x16x128xf32>
    %13 = vector.extract_strided_slice %11 {offsets = [0, 0, 0], sizes = [15, 16, 128], strides = [1, 1, 1]} : vector<16x16x128xf32> to vector<15x16x128xf32>
    %14 = tpu.concatenate %12, %13 in 0 : vector<1x16x128xf32>, vector<15x16x128xf32> -> vector<16x16x128xf32>
    %15 = vector.extract_strided_slice %11 {offsets = [1, 0, 0], sizes = [15, 16, 128], strides = [1, 1, 1]} : vector<16x16x128xf32> to vector<15x16x128xf32>
    %cst_8 = arith.constant 0.000000e+00 : f32
    %16 = vector.broadcast %cst_8 : f32 to vector<1x16x128xf32>
    %17 = tpu.concatenate %15, %16 in 0 : vector<15x16x128xf32>, vector<1x16x128xf32> -> vector<16x16x128xf32>
    %cst_9 = arith.constant 0.000000e+00 : f32
    %18 = vector.broadcast %cst_9 : f32 to vector<16x1x128xf32>
    %19 = vector.extract_strided_slice %14 {offsets = [0, 0, 0], sizes = [16, 15, 128], strides = [1, 1, 1]} : vector<16x16x128xf32> to vector<16x15x128xf32>
    %20 = tpu.concatenate %18, %19 in 1 : vector<16x1x128xf32>, vector<16x15x128xf32> -> vector<16x16x128xf32>
    %21 = vector.extract_strided_slice %14 {offsets = [0, 1, 0], sizes = [16, 15, 128], strides = [1, 1, 1]} : vector<16x16x128xf32> to vector<16x15x128xf32>
    %cst_10 = arith.constant 0.000000e+00 : f32
    %22 = vector.broadcast %cst_10 : f32 to vector<16x1x128xf32>
    %23 = tpu.concatenate %21, %22 in 1 : vector<16x15x128xf32>, vector<16x1x128xf32> -> vector<16x16x128xf32>
    %cst_11 = arith.constant 0.000000e+00 : f32
    %24 = vector.broadcast %cst_11 : f32 to vector<16x1x128xf32>
    %25 = vector.extract_strided_slice %11 {offsets = [0, 0, 0], sizes = [16, 15, 128], strides = [1, 1, 1]} : vector<16x16x128xf32> to vector<16x15x128xf32>
    %26 = tpu.concatenate %24, %25 in 1 : vector<16x1x128xf32>, vector<16x15x128xf32> -> vector<16x16x128xf32>
    %27 = vector.extract_strided_slice %11 {offsets = [0, 1, 0], sizes = [16, 15, 128], strides = [1, 1, 1]} : vector<16x16x128xf32> to vector<16x15x128xf32>
    %cst_12 = arith.constant 0.000000e+00 : f32
    %28 = vector.broadcast %cst_12 : f32 to vector<16x1x128xf32>
    %29 = tpu.concatenate %27, %28 in 1 : vector<16x15x128xf32>, vector<16x1x128xf32> -> vector<16x16x128xf32>
    %cst_13 = arith.constant 0.000000e+00 : f32
    %30 = vector.broadcast %cst_13 : f32 to vector<16x1x128xf32>
    %31 = vector.extract_strided_slice %17 {offsets = [0, 0, 0], sizes = [16, 15, 128], strides = [1, 1, 1]} : vector<16x16x128xf32> to vector<16x15x128xf32>
    %32 = tpu.concatenate %30, %31 in 1 : vector<16x1x128xf32>, vector<16x15x128xf32> -> vector<16x16x128xf32>
    %33 = vector.extract_strided_slice %17 {offsets = [0, 1, 0], sizes = [16, 15, 128], strides = [1, 1, 1]} : vector<16x16x128xf32> to vector<16x15x128xf32>
    %cst_14 = arith.constant 0.000000e+00 : f32
    %34 = vector.broadcast %cst_14 : f32 to vector<16x1x128xf32>
    %35 = tpu.concatenate %33, %34 in 1 : vector<16x15x128xf32>, vector<16x1x128xf32> -> vector<16x16x128xf32>
    %36 = tpu.concatenate %20, %14, %23, %26, %11, %29, %32, %17, %35 in 2 : vector<16x16x128xf32>, vector<16x16x128xf32>, vector<16x16x128xf32>, vector<16x16x128xf32>, vector<16x16x128xf32>, vector<16x16x128xf32>, vector<16x16x128xf32>, vector<16x16x128xf32>, vector<16x16x128xf32> -> vector<16x16x1152xf32>
    %37 = vector.shape_cast %36 : vector<16x16x1152xf32> to vector<256x1152xf32>
    %c0_15 = arith.constant 0 : index
    %c0_16 = arith.constant 0 : index
    %38 = vector.load %arg4[%c0_15, %c0_16] : memref<1152x128xf32, #tpu.memory_space<vmem>>, vector<1152x128xf32>
    %cst_17 = arith.constant dense<0.000000e+00> : vector<256x128xf32>
    %39 = tpu.matmul %37, %38, %cst_17 {dimension_numbers = #tpu.dot_dimension_numbers<[1], [0], [0], [1], [0, 0, 1, 1], [], []>} : vector<256x1152xf32>, vector<1152x128xf32>, vector<256x128xf32> -> vector<256x128xf32>
    %40 = vector.shape_cast %39 : vector<256x128xf32> to vector<16x16x128xf32>
    %c0_18 = arith.constant 0 : index
    %c0_19 = arith.constant 0 : index
    %c0_20 = arith.constant 0 : index
    %c0_21 = arith.constant 0 : index
    %41 = vector.load %arg5[%c0_18, %c0_19, %c0_20, %c0_21] : memref<1x16x16x128xf32, #tpu.memory_space<vmem>>, vector<1x16x16x128xf32>
    %42 = vector.shape_cast %41 : vector<1x16x16x128xf32> to vector<16x16x128xf32>
    %43 = vector.shape_cast %40 : vector<16x16x128xf32> to vector<1x16x16x128xf32>
    tpu.vector_store %arg5[%c0_18, %c0_19, %c0_20, %c0_21], %43 {strides = array<i32>} : memref<1x16x16x128xf32, #tpu.memory_space<vmem>>, vector<1x16x16x128xf32>,
    %cst_22 = arith.constant dense<0.000000e+00> : vector<128xf32>
    %44 = vector.multi_reduction <add>, %39, %cst_22 [0] : vector<256x128xf32> to vector<128xf32>
    %45 = vector.shape_cast %44 : vector<128xf32> to vector<1x128xf32>
    %46 = arith.mulf %39, %39 : vector<256x128xf32>
    %cst_23 = arith.constant dense<0.000000e+00> : vector<128xf32>
    %47 = vector.multi_reduction <add>, %46, %cst_23 [0] : vector<256x128xf32> to vector<128xf32>
    %48 = vector.shape_cast %47 : vector<128xf32> to vector<1x128xf32>
    %49 = tpu.concatenate %45, %48 in 0 : vector<1x128xf32>, vector<1x128xf32> -> vector<2x128xf32>
    %c0_24 = arith.constant 0 : index
    %c0_25 = arith.constant 0 : index
    %c0_26 = arith.constant 0 : index
    %50 = vector.load %arg6[%c0_24, %c0_25, %c0_26] : memref<1x2x128xf32, #tpu.memory_space<vmem>>, vector<1x2x128xf32>
    %51 = vector.shape_cast %50 : vector<1x2x128xf32> to vector<2x128xf32>
    %52 = vector.shape_cast %49 : vector<2x128xf32> to vector<1x2x128xf32>
    tpu.vector_store %arg6[%c0_24, %c0_25, %c0_26], %52 {strides = array<i32>} : memref<1x2x128xf32, #tpu.memory_space<vmem>>, vector<1x2x128xf32>,
    return
  }
  func.func @transform_0(%arg0: i32) -> (i32, i32, i32, i32) {
    %c0_i32 = arith.constant 0 : i32
    %c0_i32_0 = arith.constant 0 : i32
    %c0_i32_1 = arith.constant 0 : i32
    %c0_i32_2 = arith.constant 0 : i32
    return %arg0, %c0_i32, %c0_i32_0, %c0_i32_1 : i32, i32, i32, i32
  }
  func.func @transform_1(%arg0: i32) -> (i32, i32) {
    %c0_i32 = arith.constant 0 : i32
    %c0_i32_0 = arith.constant 0 : i32
    %c0_i32_1 = arith.constant 0 : i32
    return %c0_i32, %c0_i32_0 : i32, i32
  }
  func.func @transform_2(%arg0: i32) -> (i32, i32) {
    %c0_i32 = arith.constant 0 : i32
    %c0_i32_0 = arith.constant 0 : i32
    %c0_i32_1 = arith.constant 0 : i32
    return %c0_i32, %c0_i32_0 : i32, i32
  }
  func.func @transform_3(%arg0: i32) -> (i32, i32) {
    %c0_i32 = arith.constant 0 : i32
    %c0_i32_0 = arith.constant 0 : i32
    %c0_i32_1 = arith.constant 0 : i32
    return %c0_i32, %c0_i32_0 : i32, i32
  }
  func.func @transform_4(%arg0: i32) -> (i32, i32, i32, i32) {
    %c0_i32 = arith.constant 0 : i32
    %c0_i32_0 = arith.constant 0 : i32
    %c0_i32_1 = arith.constant 0 : i32
    %c0_i32_2 = arith.constant 0 : i32
    return %arg0, %c0_i32, %c0_i32_0, %c0_i32_1 : i32, i32, i32, i32
  }
  func.func @transform_5(%arg0: i32) -> (i32, i32, i32) {
    %c0_i32 = arith.constant 0 : i32
    %c0_i32_0 = arith.constant 0 : i32
    %c0_i32_1 = arith.constant 0 : i32
    return %arg0, %c0_i32, %c0_i32_0 : i32, i32, i32
  }
}

</mosaic_0001>

<bundles_post_ra>
// kernel: double_conv.3
= control target key start
LH: loop header
LB: loop body
LE: loop exit
PB: predicated region body
PF: predicated region fallthrough
CT: control target
= control target key end

     0   :  { %s2302_s12 = smov 0   ;;  %s4029_s0 = inlined_call_operand.vmem [shape: f32[2,16,16,128], index: 0, kind: input, shape index: {}]   ;;  %s4030_s1 = inlined_call_operand.vmem [shape: f32[1152,128], index: 1, kind: input, shape index: {}]   ;;  %s4031_s2 = inlined_call_operand.vmem [shape: f32[2,16,16,128], index: 2, kind: output, shape index: {0}]   ;;  %s4032_s3 = inlined_call_operand.vmem [shape: f32[2,2,128], index: 3, kind: output, shape index: {1}]  }
   0x1 LB: > { %s1946_s13 = sadd.s32 4294967295, %s2279_s12   ;;  %p1950_p0 = scmp.ge.s32.totalorder %s2279_s12, 1  ;;  %s2279_s12 = sphi %s2302_s12, %s14_s12  }
   0x2   : > { %p140_p1 = scmp.lt.s32.totalorder %s2279_s12, 3 }
   0x4   : > { %p141_p2 = pnand %p1950_p0, %p140_p1 }
   0x6   : > { %144 = sbr.rel (%p141_p2) target bundleno = 610 (0x262), region = 28 }
   0xb   : > { %v466_v0 = vld [vmem:[%s4030_s1 + $0x78] sm:$0xff]  ;;  %v4037_v2 = vmov 0.0   ;;  %v465_v3 = vld [vmem:[%s4030_s1 + $0x70] sm:$0xff]  ;;  %v464_v5 = vld [vmem:[%s4030_s1 + $0x68] sm:$0xff]  ;;  %p168_p3 = scmp.lt.s32.totalorder %s1946_s13, 1  ;;  %vm245_vm0 = vcmask 1040384  }
   0xc   : > { %v498_v1 = vld [vmem:[%s4030_s1 + $0x178] sm:$0xff]  ;;  %595 = vmatprep.subr.mxu0 %v4037_v2  ;;  %820 = vmatprep.subr.mxu1 %v4037_v2  ;;  %v497_v4 = vld [vmem:[%s4030_s1 + $0x170] sm:$0xff]  ;;  %v496_v6 = vld [vmem:[%s4030_s1 + $0x168] sm:$0xff]  ;;  %vm341_vm2 = vcmask 1046528  }
   0xd   : > { %596 = vmatpush1.msra.mxu0 %v466_v0  ;;  %821 = vmatpush1.msra.mxu1 %v498_v1  ;;  %v463_v7 = vld [vmem:[%s4030_s1 + $0x60] sm:$0xff]  ;;  %v462_v9 = vld [vmem:[%s4030_s1 + $0x58] sm:$0xff]  ;;  %v461_v11 = vld [vmem:[%s4030_s1 + $0x50] sm:$0xff]  ;;  %s4191_s13 = smov (!%p168_p3, %s1946_s13), 1 }
   0xe   : > { %597 = vmatprep.subr.mxu0 %v4037_v2  ;;  %822 = vmatprep.subr.mxu1 %v4037_v2  ;;  %v495_v8 = vld [vmem:[%s4030_s1 + $0x160] sm:$0xff]  ;;  %v494_v10 = vld [vmem:[%s4030_s1 + $0x158] sm:$0xff]  ;;  %v493_v12 = vld [vmem:[%s4030_s1 + $0x150] sm:$0xff]  ;;  %s2102_s22 = sshll.u32 %s4191_s13, 8 }
   0xf   : > { %598 = vmatpush1.msra.mxu0 %v465_v3  ;;  %823 = vmatpush1.msra.mxu1 %v497_v4  ;;  %v460_v13 = vld [vmem:[%s4030_s1 + $0x48] sm:$0xff]  ;;  %v459_v15 = vld [vmem:[%s4030_s1 + $0x40] sm:$0xff]  ;;  %v458_v17 = vld [vmem:[%s4030_s1 + $0x38] sm:$0xff]  ;;  %s2552_s6 = scalar_lea.vmem %s4029_s0, %s2102_s22  ;;  %s3843_s20 = scalar_lea.vmem %s4031_s2, %s2102_s22 }
  0x10   : > { %599 = vmatprep.subr.mxu0 %v4037_v2  ;;  %824 = vmatprep.subr.mxu1 %v4037_v2  ;;  %v492_v14 = vld [vmem:[%s4030_s1 + $0x148] sm:$0xff]  ;;  %v491_v16 = vld [vmem:[%s4030_s1 + $0x140] sm:$0xff]  ;;  %v490_v18 = vld [vmem:[%s4030_s1 + $0x138] sm:$0xff]  ;;  %s1955_s22 = sshll.u32 %s4191_s13, 1 }
  0x11   : > { %600 = vmatpush1.msra.mxu0 %v464_v5  ;;  %825 = vmatpush1.msra.mxu1 %v496_v6  ;;  %v457_v19 = vld [vmem:[%s4030_s1 + $0x30] sm:$0xff]  ;;  %v456_v21 = vld [vmem:[%s4030_s1 + $0x28] sm:$0xff]  ;;  %v455_v23 = vld [vmem:[%s4030_s1 + $0x20] sm:$0xff]  ;;  %s181_s23 = scalar_lea.vmem %s4032_s3, %s1955_s22 }
  0x12   : > { %601 = vmatprep.subr.mxu0 %v4037_v2  ;;  %826 = vmatprep.subr.mxu1 %v4037_v2  ;;  %v489_v20 = vld [vmem:[%s4030_s1 + $0x130] sm:$0xff]  ;;  %v488_v22 = vld [vmem:[%s4030_s1 + $0x128] sm:$0xff]  ;;  %v487_v24 = vld [vmem:[%s4030_s1 + $0x120] sm:$0xff] }
  0x13   : > { %602 = vmatpush1.msra.mxu0 %v463_v7  ;;  %827 = vmatpush1.msra.mxu1 %v495_v8  ;;  %v454_v25 = vld [vmem:[%s4030_s1 + $0x18] sm:$0xff]  ;;  %v453_v27 = vld [vmem:[%s4030_s1 + $0x10] sm:$0xff]  ;;  %v452_v29 = vld [vmem:[%s4030_s1 + $0x8] sm:$0xff]  ;;  %v2592_v7 = vrot.slane %v4037_v2, 7  ;;  %v2595_v8 = vrot.slane %v4037_v2, 1 }
  0x14   : > { %603 = vmatprep.subr.mxu0 %v4037_v2  ;;  %828 = vmatprep.subr.mxu1 %v4037_v2  ;;  %v486_v26 = vld [vmem:[%s4030_s1 + $0x118] sm:$0xff]  ;;  %v485_v28 = vld [vmem:[%s4030_s1 + $0x110] sm:$0xff]  ;;  %v484_v30 = vld [vmem:[%s4030_s1 + $0x108] sm:$0xff] }
  0x15   : > { %604 = vmatpush1.msra.mxu0 %v462_v9  ;;  %829 = vmatpush1.msra.mxu1 %v494_v10  ;;  %v451_v31 = vld [vmem:[%s4030_s1] sm:$0xff]  ;;  %v482_v33 = vld [vmem:[%s4030_s1 + $0xf8] sm:$0xff]  ;;  %v481_v35 = vld [vmem:[%s4030_s1 + $0xf0] sm:$0xff]  ;;  %4101 = vst [vmem:[#allocation2_spill] sm:$0xff] %v2592_v7 }
  0x16   : > { %605 = vmatprep.subr.mxu0 %v4037_v2  ;;  %830 = vmatprep.subr.mxu1 %v4037_v2  ;;  %v483_v32 = vld [vmem:[%s4030_s1 + $0x100] sm:$0xff]  ;;  %v514_v34 = vld [vmem:[%s4030_s1 + $0x1f8] sm:$0xff]  ;;  %v513_v36 = vld [vmem:[%s4030_s1 + $0x1f0] sm:$0xff]  ;;  %4102 = vst [vmem:[#allocation3_spill] sm:$0xff] %v2595_v8 }
  0x17   : > { %606 = vmatpush1.msra.mxu0 %v461_v11  ;;  %831 = vmatpush1.msra.mxu1 %v493_v12  ;;  %v480_v37 = vld [vmem:[%s4030_s1 + $0xe8] sm:$0xff]  ;;  %v479_v39 = vld [vmem:[%s4030_s1 + $0xe0] sm:$0xff]  ;;  %v478_v41 = vld [vmem:[%s4030_s1 + $0xd8] sm:$0xff] }
  0x18   : > { %607 = vmatprep.subr.mxu0 %v4037_v2  ;;  %832 = vmatprep.subr.mxu1 %v4037_v2  ;;  %v512_v38 = vld [vmem:[%s4030_s1 + $0x1e8] sm:$0xff]  ;;  %v511_v40 = vld [vmem:[%s4030_s1 + $0x1e0] sm:$0xff]  ;;  %v510_v42 = vld [vmem:[%s4030_s1 + $0x1d8] sm:$0xff] }
  0x19   : > { %608 = vmatpush1.msra.mxu0 %v460_v13  ;;  %833 = vmatpush1.msra.mxu1 %v492_v14  ;;  %v477_v43 = vld [vmem:[%s4030_s1 + $0xd0] sm:$0xff]  ;;  %v476_v45 = vld [vmem:[%s4030_s1 + $0xc8] sm:$0xff]  ;;  %v475_v47 = vld [vmem:[%s4030_s1 + $0xc0] sm:$0xff] }
  0x1a   : > { %609 = vmatprep.subr.mxu0 %v4037_v2  ;;  %834 = vmatprep.subr.mxu1 %v4037_v2  ;;  %v509_v44 = vld [vmem:[%s4030_s1 + $0x1d0] sm:$0xff]  ;;  %v508_v46 = vld [vmem:[%s4030_s1 + $0x1c8] sm:$0xff]  ;;  %v507_v48 = vld [vmem:[%s4030_s1 + $0x1c0] sm:$0xff] }
  0x1b   : > { %610 = vmatpush1.msra.mxu0 %v459_v15  ;;  %835 = vmatpush1.msra.mxu1 %v491_v16  ;;  %v474_v49 = vld [vmem:[%s4030_s1 + $0xb8] sm:$0xff]  ;;  %v473_v51 = vld [vmem:[%s4030_s1 + $0xb0] sm:$0xff]  ;;  %v472_v53 = vld [vmem:[%s4030_s1 + $0xa8] sm:$0xff] }
  0x1c   : > { %611 = vmatprep.subr.mxu0 %v4037_v2  ;;  %836 = vmatprep.subr.mxu1 %v4037_v2  ;;  %v506_v50 = vld [vmem:[%s4030_s1 + $0x1b8] sm:$0xff]  ;;  %v505_v52 = vld [vmem:[%s4030_s1 + $0x1b0] sm:$0xff]  ;;  %v504_v54 = vld [vmem:[%s4030_s1 + $0x1a8] sm:$0xff] }
  0x1d   : > { %612 = vmatpush1.msra.mxu0 %v458_v17  ;;  %837 = vmatpush1.msra.mxu1 %v490_v18  ;;  %v471_v55 = vld [vmem:[%s4030_s1 + $0xa0] sm:$0xff]  ;;  %v470_v57 = vld [vmem:[%s4030_s1 + $0x98] sm:$0xff]  ;;  %v469_v59 = vld [vmem:[%s4030_s1 + $0x90] sm:$0xff] }
  0x1e   : > { %613 = vmatprep.subr.mxu0 %v4037_v2  ;;  %838 = vmatprep.subr.mxu1 %v4037_v2  ;;  %v503_v56 = vld [vmem:[%s4030_s1 + $0x1a0] sm:$0xff]  ;;  %v502_v58 = vld [vmem:[%s4030_s1 + $0x198] sm:$0xff]  ;;  %v501_v60 = vld [vmem:[%s4030_s1 + $0x190] sm:$0xff] }
  0x1f   : > { %614 = vmatpush1.msra.mxu0 %v457_v19  ;;  %839 = vmatpush1.msra.mxu1 %v489_v20  ;;  %v2563_v61 = vld [vmem:[%s2552_s6] sm:$0xff]  ;;  %v2566_v62 = vld [vmem:[%s2552_s6 + $0x8] sm:$0xff]  ;;  %vm2587_vm1 = vmneg %vm245_vm0 }
  0x20   : > { %615 = vmatprep.subr.mxu0 %v4037_v2  ;;  %840 = vmatprep.subr.mxu1 %v4037_v2  ;;  %v468_v63 = vld [vmem:[%s4030_s1 + $0x88] sm:$0xff]  ;;  %v467_v1 = vld [vmem:[%s4030_s1 + $0x80] sm:$0xff]  ;;  %v248_v3 = vrot.slane %v2563_v61, 7  ;;  %v249_v4 = vrot.slane %v2566_v62, 7  ;;  %v530_v9 = vld [vmem:[%s4030_s1 + $0x278] sm:$0xff]  ;;  %v344_v13 = vrot.slane %v2563_v61, 1 }
  0x21   : > { %616 = vmatpush1.msra.mxu0 %v456_v21  ;;  %841 = vmatpush1.msra.mxu1 %v488_v22  ;;  %v500_v0 = vld [vmem:[%s4030_s1 + $0x188] sm:$0xff]  ;;  %v499_v5 = vld [vmem:[%s4030_s1 + $0x180] sm:$0xff]  ;;  %v2607_v11 = vld [vmem:[%s2552_s6 + $0x10] sm:$0xff]  ;;  %v2620_v14 = vrot.slane %v2566_v62, 1 }
  0x22   : > { %617 = vmatprep.subr.mxu0 %v4037_v2  ;;  %842 = vmatprep.subr.mxu1 %v4037_v2  ;;  %v250_v10 = vsel %vm245_vm0, %v248_v3, %v249_v4  ;;  %v2610_v12 = vld [vmem:[%s2552_s6 + $0x18] sm:$0xff]  ;;  %v529_v15 = vld [vmem:[%s4030_s1 + $0x270] sm:$0xff]  ;;  %v2626_v16 = vrot.slane %v2607_v11, 7  ;;  %v528_v18 = vld [vmem:[%s4030_s1 + $0x268] sm:$0xff] }
  0x23   : > { %618 = vmatpush1.msra.mxu0 %v455_v23  ;;  %843 = vmatpush1.msra.mxu1 %v487_v24  ;;  %v252_v17 = vrot.slane %v2610_v12, 7  ;;  %v562_v19 = vld [vmem:[%s4030_s1 + $0x378] sm:$0xff]  ;;  %v2643_v20 = vsel %vm341_vm2, %v344_v13, %v2620_v14  ;;  %v2654_v22 = vld [vmem:[%s2552_s6 + $0x20] sm:$0xff]  ;;  %v2657_v23 = vld [vmem:[%s2552_s6 + $0x28] sm:$0xff] }
  0x24   : > { %619 = vmatprep.subr.mxu0 %v4037_v2  ;;  %844 = vmatprep.subr.mxu1 %v4037_v2  ;;  %v527_v24 = vld [vmem:[%s4030_s1 + $0x260] sm:$0xff] }
  0x25   : > { %620 = vmatpush1.msra.mxu0 %v454_v25  ;;  %845 = vmatpush1.msra.mxu1 %v486_v26  ;;  %v2651_v21 = vsel %vm245_vm0, %v2626_v16, %v252_v17  ;;  %v561_v25 = vld [vmem:[%s4030_s1 + $0x370] sm:$0xff]  ;;  %v2671_v26 = vrot.slane %v2654_v22, 7  ;;  %v2859_v17 = vld [vmem:[%s2552_s6 + $0x68] sm:$0xff] }
  0x26   : > { %621 = vmatprep.subr.mxu0 %v4037_v2  ;;  %846 = vmatprep.subr.mxu1 %v4037_v2 }
  0x27   : > { %622 = vmatpush1.msra.mxu0 %v453_v27  ;;  %847 = vmatpush1.msra.mxu1 %v485_v28  ;;  %v347_v27 = vrot.slane %v2607_v11, 1  ;;  %v2675_v28 = vrot.slane %v2610_v12, 1 }
  0x28   : > { %623 = vmatprep.subr.mxu0 %v4037_v2  ;;  %848 = vmatprep.subr.mxu1 %v4037_v2 }
  0x29   : > { %624 = vmatpush1.msra.mxu0 %v452_v29  ;;  %849 = vmatpush1.msra.mxu1 %v484_v30  ;;  %v255_v29 = vrot.slane %v2657_v23, 7  ;;  %v526_v30 = vld [vmem:[%s4030_s1 + $0x258] sm:$0xff] }
  0x2a   : > { %625 = vmatprep.subr.mxu0 %v4037_v2  ;;  %850 = vmatprep.subr.mxu1 %v4037_v2 }
  0x2b   : > { %626 = vmatpush1.msra.mxu0 %v451_v31  ;;  %851 = vmatpush1.msra.mxu1 %v483_v32  ;;  %v560_v31 = vld [vmem:[%s4030_s1 + $0x368] sm:$0xff]  ;;  %v2694_v32 = vsel %vm341_vm2, %v347_v27, %v2675_v28 }
  0x2c   : > { %627 = vmatprep.subr.mxu0 %v4037_v2  ;;  %852 = vmatprep.subr.mxu1 %v4037_v2 }
  0x2d   : > { %628 = vmatpush2.msra.mxu0 %v482_v33  ;;  %853 = vmatpush2.msra.mxu1 %v514_v34  ;;  %v2699_v33 = vsel %vm245_vm0, %v2671_v26, %v255_v29  ;;  %v2702_v34 = vld [vmem:[%s2552_s6 + $0x30] sm:$0xff]  ;;  %v267_v29 = vrot.slane %v2859_v17, 7 }
  0x2e   : > { %629 = vmatprep.subr.mxu0 %v4037_v2  ;;  %854 = vmatprep.subr.mxu1 %v4037_v2 }
  0x2f   : > { %630 = vmatpush2.msra.mxu0 %v481_v35  ;;  %855 = vmatpush2.msra.mxu1 %v513_v36  ;;  %v2706_v35 = vld [vmem:[%s2552_s6 + $0x38] sm:$0xff]  ;;  %v525_v36 = vld [vmem:[%s4030_s1 + $0x250] sm:$0xff] }
  0x30   : > { %631 = vmatprep.subr.mxu0 %v4037_v2  ;;  %856 = vmatprep.subr.mxu1 %v4037_v2 }
  0x31   : > { %632 = vmatpush2.msra.mxu0 %v480_v37  ;;  %857 = vmatpush2.msra.mxu1 %v512_v38  ;;  %v559_v37 = vld [vmem:[%s4030_s1 + $0x360] sm:$0xff]  ;;  %v2721_v38 = vrot.slane %v2702_v34, 7 }
  0x32   : > { %633 = vmatprep.subr.mxu0 %v4037_v2  ;;  %858 = vmatprep.subr.mxu1 %v4037_v2 }
  0x33   : > { %634 = vmatpush2.msra.mxu0 %v479_v39  ;;  %859 = vmatpush2.msra.mxu1 %v511_v40  ;;  %v350_v39 = vrot.slane %v2654_v22, 1  ;;  %v2725_v40 = vrot.slane %v2657_v23, 1 }
  0x34   : > { %635 = vmatprep.subr.mxu0 %v4037_v2  ;;  %860 = vmatprep.subr.mxu1 %v4037_v2 }
  0x35   : > { %636 = vmatpush2.msra.mxu0 %v478_v41  ;;  %861 = vmatpush2.msra.mxu1 %v510_v42  ;;  %v258_v41 = vrot.slane %v2706_v35, 7  ;;  %v524_v42 = vld [vmem:[%s4030_s1 + $0x248] sm:$0xff] }
  0x36   : > { %637 = vmatprep.subr.mxu0 %v4037_v2  ;;  %862 = vmatprep.subr.mxu1 %v4037_v2 }
  0x37   : > { %638 = vmatpush2.msra.mxu0 %v477_v43  ;;  %863 = vmatpush2.msra.mxu1 %v509_v44  ;;  %v558_v43 = vld [vmem:[%s4030_s1 + $0x358] sm:$0xff]  ;;  %v2745_v44 = vsel %vm341_vm2, %v350_v39, %v2725_v40  ;;  %v2906_v39 = vld [vmem:[%s2552_s6 + $0x70] sm:$0xff] }
  0x38   : > { %639 = vmatprep.subr.mxu0 %v4037_v2  ;;  %864 = vmatprep.subr.mxu1 %v4037_v2 }
  0x39   : > { %640 = vmatpush2.msra.mxu0 %v476_v45  ;;  %865 = vmatpush2.msra.mxu1 %v508_v46  ;;  %v2750_v45 = vsel %vm245_vm0, %v2721_v38, %v258_v41  ;;  %v2753_v46 = vld [vmem:[%s2552_s6 + $0x40] sm:$0xff]  ;;  %v2910_v41 = vld [vmem:[%s2552_s6 + $0x78] sm:$0xff] }
  0x3a   : > { %641 = vmatprep.subr.mxu0 %v4037_v2  ;;  %866 = vmatprep.subr.mxu1 %v4037_v2 }
  0x3b   : > { %642 = vmatpush2.msra.mxu0 %v475_v47  ;;  %867 = vmatpush2.msra.mxu1 %v507_v48  ;;  %v2757_v47 = vld [vmem:[%s2552_s6 + $0x48] sm:$0xff]  ;;  %v523_v48 = vld [vmem:[%s4030_s1 + $0x240] sm:$0xff] }
  0x3c   : > { %643 = vmatprep.subr.mxu0 %v4037_v2  ;;  %868 = vmatprep.subr.mxu1 %v4037_v2 }
  0x3d   : > { %644 = vmatpush2.msra.mxu0 %v474_v49  ;;  %869 = vmatpush2.msra.mxu1 %v506_v50  ;;  %v557_v49 = vld [vmem:[%s4030_s1 + $0x350] sm:$0xff]  ;;  %v2772_v50 = vrot.slane %v2753_v46, 7 }
  0x3e   : > { %645 = vmatprep.subr.mxu0 %v4037_v2  ;;  %870 = vmatprep.subr.mxu1 %v4037_v2 }
  0x3f   : > { %646 = vmatpush2.msra.mxu0 %v473_v51  ;;  %871 = vmatpush2.msra.mxu1 %v505_v52  ;;  %v353_v51 = vrot.slane %v2702_v34, 1  ;;  %v2776_v52 = vrot.slane %v2706_v35, 1 }
  0x40   : > { %647 = vmatprep.subr.mxu0 %v4037_v2  ;;  %872 = vmatprep.subr.mxu1 %v4037_v2 }
  0x41   : > { %648 = vmatpush2.msra.mxu0 %v472_v53  ;;  %873 = vmatpush2.msra.mxu1 %v504_v54  ;;  %v261_v53 = vrot.slane %v2757_v47, 7  ;;  %v522_v54 = vld [vmem:[%s4030_s1 + $0x238] sm:$0xff] }
  0x42   : > { %649 = vmatprep.subr.mxu0 %v4037_v2  ;;  %874 = vmatprep.subr.mxu1 %v4037_v2 }
  0x43   : > { %650 = vmatpush2.msra.mxu0 %v471_v55  ;;  %875 = vmatpush2.msra.mxu1 %v503_v56  ;;  %v556_v55 = vld [vmem:[%s4030_s1 + $0x348] sm:$0xff]  ;;  %v2796_v56 = vsel %vm341_vm2, %v353_v51, %v2776_v52  ;;  %v2929_v51 = vrot.slane %v2859_v17, 1 }
  0x44   : > { %651 = vmatprep.subr.mxu0 %v4037_v2  ;;  %876 = vmatprep.subr.mxu1 %v4037_v2 }
  0x45   : > { %652 = vmatpush2.msra.mxu0 %v470_v57  ;;  %877 = vmatpush2.msra.mxu1 %v502_v58  ;;  %v2801_v57 = vsel %vm245_vm0, %v2772_v50, %v261_v53  ;;  %v2804_v58 = vld [vmem:[%s2552_s6 + $0x50] sm:$0xff]  ;;  %v270_v53 = vrot.slane %v2910_v41, 7 }
  0x46   : > { %653 = vmatprep.subr.mxu0 %v4037_v2  ;;  %878 = vmatprep.subr.mxu1 %v4037_v2 }
  0x47   : > { %654 = vmatpush2.msra.mxu0 %v469_v59  ;;  %879 = vmatpush2.msra.mxu1 %v501_v60  ;;  %v2808_v59 = vld [vmem:[%s2552_s6 + $0x58] sm:$0xff]  ;;  %v521_v60 = vld [vmem:[%s4030_s1 + $0x230] sm:$0xff] }
  0x48   : > { %655 = vmatprep.subr.mxu0 %v4037_v2  ;;  %880 = vmatprep.subr.mxu1 %v4037_v2  ;;  %v264_v4 = vrot.slane %v2808_v59, 7  ;;  %v2878_v27 = vrot.slane %v2808_v59, 1 }
  0x49   : > { %656 = vmatpush2.msra.mxu0 %v468_v63  ;;  %881 = vmatpush2.msra.mxu1 %v500_v0  ;;  %v555_v63 = vld [vmem:[%s4030_s1 + $0x340] sm:$0xff]  ;;  %v2823_v0 = vrot.slane %v2804_v58, 7 }
  0x4a   : > { %657 = vmatprep.subr.mxu0 %v4037_v2  ;;  %882 = vmatprep.subr.mxu1 %v4037_v2 }
  0x4b   : > { %658 = vmatpush2.msra.mxu0 %v467_v1  ;;  %659 = vmatprep.mubr.f32.mxu0 %v4037_v2  ;;  %v356_v1 = vrot.slane %v2753_v46, 1  ;;  %v2852_v13 = vsel %vm245_vm0, %v2823_v0, %v264_v4  ;;  %v2961_v4 = vld [vmem:[%s2552_s6 + $0x88] sm:$0xff] }
  0x4c   : > { %883 = vmatpush2.msra.mxu1 %v499_v5  ;;  %1989 = vmatprep.mubr.msk.f32.mxu1 %vm2587_vm1, %v248_v3  ;;  %v520_v5 = vld [vmem:[%s4030_s1 + $0x228] sm:$0xff]  ;;  %4103 = vst [vmem:[#allocation4_spill] sm:$0xff] %v2961_v4 }
  0x4d   : > { %1957 = vmatmul.mubr.msk.f32.vlgmr.msra.gmra.mxu0 %vm2587_vm1, %v2592_v7  ;;  %885 = vmatmul.mubr.f32.vlgmr.msra.gmra.mxu1 %v2595_v8 }
  0x4e   : > { %1045 = vmatprep.subr.mxu0 %v4037_v2  ;;  %664 = vmatprep.mubr.f32.mxu0 %v4037_v2 }
  0x4f   : > { %1046 = vmatpush1.msra.mxu0 %v530_v9  ;;  %889 = vmatprep.mubr.f32.mxu1 %v250_v10  ;;  %v554_v9 = vld [vmem:[%s4030_s1 + $0x338] sm:$0xff] }
  0x50   : > { %1047 = vmatprep.subr.mxu0 %v4037_v2  ;;  %1270 = vmatprep.subr.mxu1 %v4037_v2 }
  0x51   : > { %665 = vmatmul.mubr.f32.gmra.mxu0 %v2592_v7  ;;  %1990 = vmatmul.mubr.msk.f32.gmra.mxu1 %vm341_vm2, %v2595_v8  ;;  %v3059_v8 = vld [vmem:[%s2552_s6 + $0xa0] sm:$0xff]  ;;  %v3063_v7 = vld [vmem:[%s2552_s6 + $0xa8] sm:$0xff] }
  0x52   : > { %1048 = vmatpush1.msra.mxu0 %v529_v15  ;;  %669 = vmatprep.mubr.f32.mxu0 %v2563_v61  ;;  %v2855_v15 = vld [vmem:[%s2552_s6 + $0x60] sm:$0xff]  ;;  %4113 = vst [vmem:[#allocation14_spill] sm:$0xff] %v3059_v8  ;;  %4114 = vst [vmem:[#allocation15_spill] sm:$0xff] %v3063_v7 }
  0x53   : > { %1992 = vmatprep.mubr.msk.f32.mxu1 %vm2587_vm1, %v2626_v16  ;;  %1049 = vmatprep.subr.mxu0 %v4037_v2 }
  0x54   : > { %1050 = vmatpush1.msra.mxu0 %v528_v18  ;;  %1271 = vmatpush1.msra.mxu1 %v562_v19  ;;  %v519_v18 = vld [vmem:[%s4030_s1 + $0x220] sm:$0xff]  ;;  %v553_v19 = vld [vmem:[%s4030_s1 + $0x330] sm:$0xff] }
  0x55   : > { %1959 = vmatmul.mubr.msk.f32.gmra.mxu0 %vm2587_vm1, %v248_v3  ;;  %895 = vmatmul.mubr.f32.gmra.mxu1 %v2643_v20  ;;  %v2827_v3 = vrot.slane %v2757_v47, 1 }
  0x56   : > { %674 = vmatprep.mubr.f32.mxu0 %v2566_v62  ;;  %899 = vmatprep.mubr.f32.mxu1 %v2651_v21 }
  0x57   : > { %1051 = vmatprep.subr.mxu0 %v4037_v2  ;;  %1272 = vmatprep.subr.mxu1 %v4037_v2 }
  0x58   : > { %1052 = vmatpush1.msra.mxu0 %v527_v24  ;;  %1273 = vmatpush1.msra.mxu1 %v561_v25  ;;  %v2874_v24 = vrot.slane %v2855_v15, 7  ;;  %v359_v25 = vrot.slane %v2804_v58, 1 }
  0x59   : > { %675 = vmatmul.mubr.f32.gmra.mxu0 %v250_v10  ;;  %1993 = vmatmul.mubr.msk.f32.gmra.mxu1 %vm341_vm2, %v2620_v14  ;;  %v2847_v10 = vsel %vm341_vm2, %v356_v1, %v2827_v3  ;;  %v2957_v1 = vld [vmem:[%s2552_s6 + $0x80] sm:$0xff] }
  0x5a   : > { %679 = vmatprep.mubr.f32.mxu0 %v2607_v11  ;;  %1995 = vmatprep.mubr.msk.f32.mxu1 %vm2587_vm1, %v2671_v26 }
  0x5b   : > { %1053 = vmatprep.subr.mxu0 %v4037_v2  ;;  %1274 = vmatprep.subr.mxu1 %v4037_v2 }
  0x5c   : > { %1054 = vmatpush1.msra.mxu0 %v526_v30  ;;  %1275 = vmatpush1.msra.mxu1 %v560_v31  ;;  %v518_v30 = vld [vmem:[%s4030_s1 + $0x218] sm:$0xff]  ;;  %v552_v31 = vld [vmem:[%s4030_s1 + $0x328] sm:$0xff] }
  0x5d   : > { %1961 = vmatmul.mubr.msk.f32.gmra.mxu0 %vm2587_vm1, %v2626_v16  ;;  %905 = vmatmul.mubr.f32.gmra.mxu1 %v2694_v32 }
  0x5e   : > { %684 = vmatprep.mubr.f32.mxu0 %v2610_v12  ;;  %909 = vmatprep.mubr.f32.mxu1 %v2699_v33 }
  0x5f   : > { %1055 = vmatprep.subr.mxu0 %v4037_v2  ;;  %1276 = vmatprep.subr.mxu1 %v4037_v2 }
  0x60   : > { %1056 = vmatpush1.msra.mxu0 %v525_v36  ;;  %1277 = vmatpush1.msra.mxu1 %v559_v37  ;;  %v2898_v36 = vsel %vm341_vm2, %v359_v25, %v2878_v27  ;;  %v2903_v37 = vsel %vm245_vm0, %v2874_v24, %v267_v29  ;;  %v2980_v25 = vrot.slane %v2910_v41, 1  ;;  %v273_v29 = vrot.slane %v2961_v4, 7 }
  0x61   : > { %685 = vmatmul.mubr.f32.gmra.mxu0 %v2651_v21  ;;  %1996 = vmatmul.mubr.msk.f32.gmra.mxu1 %vm341_vm2, %v2675_v28 }
  0x62   : > { %689 = vmatprep.mubr.f32.mxu0 %v2654_v22  ;;  %1998 = vmatprep.mubr.msk.f32.mxu1 %vm2587_vm1, %v2721_v38  ;;  %4105 = vst [vmem:[#allocation6_spill] sm:$0xff] %v2980_v25 }
  0x63   : > { %1057 = vmatprep.subr.mxu0 %v4037_v2  ;;  %1278 = vmatprep.subr.mxu1 %v4037_v2 }
  0x64   : > { %1058 = vmatpush1.msra.mxu0 %v524_v42  ;;  %1279 = vmatpush1.msra.mxu1 %v558_v43  ;;  %v517_v42 = vld [vmem:[%s4030_s1 + $0x210] sm:$0xff]  ;;  %v551_v43 = vld [vmem:[%s4030_s1 + $0x320] sm:$0xff] }
  0x65   : > { %1963 = vmatmul.mubr.msk.f32.gmra.mxu0 %vm2587_vm1, %v2671_v26  ;;  %915 = vmatmul.mubr.f32.gmra.mxu1 %v2745_v44 }
  0x66   : > { %694 = vmatprep.mubr.f32.mxu0 %v2657_v23  ;;  %919 = vmatprep.mubr.f32.mxu1 %v2750_v45 }
  0x67   : > { %1059 = vmatprep.subr.mxu0 %v4037_v2  ;;  %1280 = vmatprep.subr.mxu1 %v4037_v2 }
  0x68   : > { %1060 = vmatpush1.msra.mxu0 %v523_v48  ;;  %1281 = vmatpush1.msra.mxu1 %v557_v49  ;;  %v2925_v48 = vrot.slane %v2906_v39, 7  ;;  %v362_v49 = vrot.slane %v2855_v15, 1 }
  0x69   : > { %695 = vmatmul.mubr.f32.gmra.mxu0 %v2699_v33  ;;  %1999 = vmatmul.mubr.msk.f32.gmra.mxu1 %vm341_vm2, %v2725_v40 }
  0x6a   : > { %699 = vmatprep.mubr.f32.mxu0 %v2702_v34  ;;  %2001 = vmatprep.mubr.msk.f32.mxu1 %vm2587_vm1, %v2772_v50 }
  0x6b   : > { %1061 = vmatprep.subr.mxu0 %v4037_v2  ;;  %1282 = vmatprep.subr.mxu1 %v4037_v2 }
  0x6c   : > { %1062 = vmatpush1.msra.mxu0 %v522_v54  ;;  %1283 = vmatpush1.msra.mxu1 %v556_v55  ;;  %v516_v54 = vld [vmem:[%s4030_s1 + $0x208] sm:$0xff]  ;;  %v550_v55 = vld [vmem:[%s4030_s1 + $0x318] sm:$0xff] }
  0x6d   : > { %1965 = vmatmul.mubr.msk.f32.gmra.mxu0 %vm2587_vm1, %v2721_v38  ;;  %925 = vmatmul.mubr.f32.gmra.mxu1 %v2796_v56 }
  0x6e   : > { %704 = vmatprep.mubr.f32.mxu0 %v2706_v35  ;;  %929 = vmatprep.mubr.f32.mxu1 %v2801_v57 }
  0x6f   : > { %1063 = vmatprep.subr.mxu0 %v4037_v2  ;;  %1284 = vmatprep.subr.mxu1 %v4037_v2 }
  0x70   : > { %1064 = vmatpush1.msra.mxu0 %v521_v60  ;;  %1285 = vmatpush1.msra.mxu1 %v555_v63  ;;  %v2949_v60 = vsel %vm341_vm2, %v362_v49, %v2929_v51  ;;  %v2954_v63 = vsel %vm245_vm0, %v2925_v48, %v270_v53  ;;  %v3008_v49 = vld [vmem:[%s2552_s6 + $0x90] sm:$0xff]  ;;  %v3012_v53 = vld [vmem:[%s2552_s6 + $0x98] sm:$0xff] }
  0x71   : > { %705 = vmatmul.mubr.f32.gmra.mxu0 %v2750_v45  ;;  %2002 = vmatmul.mubr.msk.f32.gmra.mxu1 %vm341_vm2, %v2776_v52  ;;  %4107 = vst [vmem:[#allocation8_spill] sm:$0xff] %v3008_v49  ;;  %4108 = vst [vmem:[#allocation9_spill] sm:$0xff] %v3012_v53 }
  0x72   : > { %709 = vmatprep.mubr.f32.mxu0 %v2753_v46  ;;  %2004 = vmatprep.mubr.msk.f32.mxu1 %vm2587_vm1, %v2823_v0 }
  0x73   : > { %1065 = vmatprep.subr.mxu0 %v4037_v2  ;;  %1286 = vmatprep.subr.mxu1 %v4037_v2 }
  0x74   : > { %1066 = vmatpush1.msra.mxu0 %v520_v5  ;;  %1287 = vmatpush1.msra.mxu1 %v554_v9  ;;  %v515_v5 = vld [vmem:[%s4030_s1 + $0x200] sm:$0xff]  ;;  %v549_v9 = vld [vmem:[%s4030_s1 + $0x310] sm:$0xff] }
  0x75   : > { %1967 = vmatmul.mubr.msk.f32.gmra.mxu0 %vm2587_vm1, %v2772_v50  ;;  %935 = vmatmul.mubr.f32.gmra.mxu1 %v2847_v10 }
  0x76   : > { %714 = vmatprep.mubr.f32.mxu0 %v2757_v47  ;;  %939 = vmatprep.mubr.f32.mxu1 %v2852_v13 }
  0x77   : > { %1067 = vmatprep.subr.mxu0 %v4037_v2  ;;  %1288 = vmatprep.subr.mxu1 %v4037_v2 }
  0x78   : > { %1068 = vmatpush1.msra.mxu0 %v519_v18  ;;  %1289 = vmatpush1.msra.mxu1 %v553_v19  ;;  %v2976_v18 = vrot.slane %v2957_v1, 7  ;;  %v365_v19 = vrot.slane %v2906_v39, 1 }
  0x79   : > { %715 = vmatmul.mubr.f32.gmra.mxu0 %v2801_v57  ;;  %2005 = vmatmul.mubr.msk.f32.gmra.mxu1 %vm341_vm2, %v2827_v3 }
  0x7a   : > { %719 = vmatprep.mubr.f32.mxu0 %v2804_v58  ;;  %2007 = vmatprep.mubr.msk.f32.mxu1 %vm2587_vm1, %v2874_v24  ;;  %4104 = vst [vmem:[#allocation5_spill] sm:$0xff] %v2976_v18 }
  0x7b   : > { %1069 = vmatprep.subr.mxu0 %v4037_v2  ;;  %1290 = vmatprep.subr.mxu1 %v4037_v2 }
  0x7c   : > { %1070 = vmatpush1.msra.mxu0 %v518_v30  ;;  %1291 = vmatpush1.msra.mxu1 %v552_v31  ;;  %v546_v30 = vld [vmem:[%s4030_s1 + $0x2f8] sm:$0xff]  ;;  %v548_v31 = vld [vmem:[%s4030_s1 + $0x308] sm:$0xff] }
  0x7d   : > { %1969 = vmatmul.mubr.msk.f32.gmra.mxu0 %vm2587_vm1, %v2823_v0  ;;  %945 = vmatmul.mubr.f32.gmra.mxu1 %v2898_v36 }
  0x7e   : > { %724 = vmatprep.mubr.f32.mxu0 %v2808_v59  ;;  %949 = vmatprep.mubr.f32.mxu1 %v2903_v37 }
  0x7f   : > { %1071 = vmatprep.subr.mxu0 %v4037_v2  ;;  %1292 = vmatprep.subr.mxu1 %v4037_v2 }
  0x80   : > { %1072 = vmatpush1.msra.mxu0 %v517_v42  ;;  %1293 = vmatpush1.msra.mxu1 %v551_v43  ;;  %v3000_v42 = vsel %vm341_vm2, %v365_v19, %v2980_v25  ;;  %v3005_v43 = vsel %vm245_vm0, %v2976_v18, %v273_v29  ;;  %v3031_v19 = vrot.slane %v2961_v4, 1  ;;  %v276_v29 = vrot.slane %v3012_v53, 7 }
  0x81   : > { %725 = vmatmul.mubr.f32.gmra.mxu0 %v2852_v13  ;;  %2008 = vmatmul.mubr.msk.f32.gmra.mxu1 %vm341_vm2, %v2878_v27  ;;  %4106 = vst [vmem:[#allocation7_spill] sm:$0xff] %v3005_v43 }
  0x82   : > { %729 = vmatprep.mubr.f32.mxu0 %v2855_v15  ;;  %2010 = vmatprep.mubr.msk.f32.mxu1 %vm2587_vm1, %v2925_v48  ;;  %4110 = vst [vmem:[#allocation11_spill] sm:$0xff] %v3031_v19 }
  0x83   : > { %1073 = vmatprep.subr.mxu0 %v4037_v2  ;;  %1294 = vmatprep.subr.mxu1 %v4037_v2 }
  0x84   : > { %1074 = vmatpush1.msra.mxu0 %v516_v54  ;;  %1295 = vmatpush1.msra.mxu1 %v550_v55  ;;  %v545_v54 = vld [vmem:[%s4030_s1 + $0x2f0] sm:$0xff]  ;;  %v547_v55 = vld [vmem:[%s4030_s1 + $0x300] sm:$0xff] }
  0x85   : > { %1971 = vmatmul.mubr.msk.f32.gmra.mxu0 %vm2587_vm1, %v2874_v24  ;;  %955 = vmatmul.mubr.f32.gmra.mxu1 %v2949_v60 }
  0x86   : > { %734 = vmatprep.mubr.f32.mxu0 %v2859_v17  ;;  %959 = vmatprep.mubr.f32.mxu1 %v2954_v63 }
  0x87   : > { %1075 = vmatprep.subr.mxu0 %v4037_v2  ;;  %1296 = vmatprep.subr.mxu1 %v4037_v2 }
  0x88   : > { %1076 = vmatpush1.msra.mxu0 %v515_v5  ;;  %1297 = vmatpush1.msra.mxu1 %v549_v9  ;;  %v3027_v5 = vrot.slane %v3008_v49, 7  ;;  %v368_v9 = vrot.slane %v2957_v1, 1 }
  0x89   : > { %735 = vmatmul.mubr.f32.gmra.mxu0 %v2903_v37  ;;  %2011 = vmatmul.mubr.msk.f32.gmra.mxu1 %vm341_vm2, %v2929_v51 }
  0x8a   : > { %739 = vmatprep.mubr.f32.mxu0 %v2906_v39  ;;  %2013 = vmatprep.mubr.msk.f32.mxu1 %vm2587_vm1, %v2976_v18  ;;  %4109 = vst [vmem:[#allocation10_spill] sm:$0xff] %v3027_v5 }
  0x8b   : > { %1077 = vmatprep.subr.mxu0 %v4037_v2  ;;  %1298 = vmatprep.subr.mxu1 %v4037_v2 }
  0x8c   : > { %1078 = vmatpush2.msra.mxu0 %v546_v30  ;;  %1299 = vmatpush1.msra.mxu1 %v548_v31  ;;  %v544_v30 = vld [vmem:[%s4030_s1 + $0x2e8] sm:$0xff]  ;;  %v578_v31 = vld [vmem:[%s4030_s1 + $0x3f8] sm:$0xff] }
  0x8d   : > { %1973 = vmatmul.mubr.msk.f32.gmra.mxu0 %vm2587_vm1, %v2925_v48  ;;  %965 = vmatmul.mubr.f32.gmra.mxu1 %v3000_v42 }
  0x8e   : > { %744 = vmatprep.mubr.f32.mxu0 %v2910_v41  ;;  %969 = vmatprep.mubr.f32.mxu1 %v3005_v43 }
  0x8f   : > { %1079 = vmatprep.subr.mxu0 %v4037_v2  ;;  %1300 = vmatprep.subr.mxu1 %v4037_v2 }
  0x90   : > { %1080 = vmatpush2.msra.mxu0 %v545_v54  ;;  %1301 = vmatpush1.msra.mxu1 %v547_v55  ;;  %v3051_v54 = vsel %vm341_vm2, %v368_v9, %v3031_v19  ;;  %v3056_v55 = vsel %vm245_vm0, %v3027_v5, %v276_v29  ;;  %v543_v9 = vld [vmem:[%s4030_s1 + $0x2e0] sm:$0xff]  ;;  %v577_v29 = vld [vmem:[%s4030_s1 + $0x3f0] sm:$0xff] }
  0x91   : > { %745 = vmatmul.mubr.f32.gmra.mxu0 %v2954_v63  ;;  %2014 = vmatmul.mubr.msk.f32.gmra.mxu1 %vm341_vm2, %v2980_v25  ;;  %4111 = vst [vmem:[#allocation12_spill] sm:$0xff] %v3051_v54  ;;  %4112 = vst [vmem:[#allocation13_spill] sm:$0xff] %v3056_v55  ;;  %v279_v25 = vrot.slane %v3063_v7, 7 }
  0x92   : > { %749 = vmatprep.mubr.f32.mxu0 %v2957_v1  ;;  %2016 = vmatprep.mubr.msk.f32.mxu1 %vm2587_vm1, %v3027_v5 }
  0x93   : > { %1081 = vmatprep.subr.mxu0 %v4037_v2  ;;  %1302 = vmatprep.subr.mxu1 %v4037_v2  ;;  %v3082_v2 = vrot.slane %v3012_v53, 1 }
  0x94   : > { %1082 = vmatpush2.msra.mxu0 %v544_v30  ;;  %1303 = vmatpush2.msra.mxu1 %v578_v31  ;;  %v3078_v30 = vrot.slane %v3059_v8, 7  ;;  %v371_v31 = vrot.slane %v3008_v49, 1 }
  0x95   : > { %1975 = vmatmul.mubr.msk.f32.gmra.mxu0 %vm2587_vm1, %v2976_v18  ;;  %975 = vmatmul.mubr.f32.gmra.mxu1 %v3051_v54  ;;  %4116 = vst [vmem:[#allocation17_spill] sm:$0xff] %v3082_v2  ;;  %v4117_v54 = vmov 0.0   ;;  %v576_v18 = vld [vmem:[%s4030_s1 + $0x3e8] sm:$0xff] }
  0x96   : > { %754 = vmatprep.mubr.f32.mxu0 %v2961_v4  ;;  %979 = vmatprep.mubr.f32.mxu1 %v3056_v55  ;;  %4115 = vst [vmem:[#allocation16_spill] sm:$0xff] %v3078_v30  ;;  %v542_v4 = vld [vmem:[%s4030_s1 + $0x2d8] sm:$0xff] }
  0x97   : > { %1083 = vmatprep.subr.mxu0 %v4117_v54  ;;  %1304 = vmatprep.subr.mxu1 %v4117_v54 }
  0x98   : > { %1084 = vmatpush2.msra.mxu0 %v543_v9  ;;  %1305 = vmatpush2.msra.mxu1 %v577_v29  ;;  %v3102_v9 = vsel %vm341_vm2, %v371_v31, %v3082_v2  ;;  %v3107_v29 = vsel %vm245_vm0, %v3078_v30, %v279_v25  ;;  %v541_v31 = vld [vmem:[%s4030_s1 + $0x2d0] sm:$0xff]  ;;  %v575_v25 = vld [vmem:[%s4030_s1 + $0x3e0] sm:$0xff] }
  0x99   : > { %755 = vmatmul.mubr.f32.gmra.mxu0 %v3005_v43  ;;  %2017 = vmatmul.mubr.msk.f32.gmra.mxu1 %vm341_vm2, %v3031_v19  ;;  %4118 = vst [vmem:[#allocation18_spill] sm:$0xff] %v3102_v9  ;;  %4119 = vst [vmem:[#allocation19_spill] sm:$0xff] %v3107_v29  ;;  %v3110_v19 = vld [vmem:[%s2552_s6 + $0xb0] sm:$0xff]  ;;  %v574_v43 = vld [vmem:[%s4030_s1 + $0x3d8] sm:$0xff] }
  0x9a   : > { %759 = vmatprep.mubr.f32.mxu0 %v3008_v49  ;;  %2019 = vmatprep.mubr.msk.f32.mxu1 %vm2587_vm1, %v3078_v30  ;;  %4120 = vst [vmem:[#allocation20_spill] sm:$0xff] %v3110_v19  ;;  %v3114_v49 = vld [vmem:[%s2552_s6 + $0xb8] sm:$0xff] }
  0x9b   : > { %1085 = vmatprep.subr.mxu0 %v4117_v54  ;;  %1306 = vmatprep.subr.mxu1 %v4117_v54  ;;  %4121 = vst [vmem:[#allocation21_spill] sm:$0xff] %v3114_v49 }
  0x9c   : > { %1086 = vmatpush2.msra.mxu0 %v542_v4  ;;  %1307 = vmatpush2.msra.mxu1 %v576_v18  ;;  %v3129_v4 = vrot.slane %v3110_v19, 7  ;;  %v374_v18 = vrot.slane %v3059_v8, 1 }
  0x9d   : > { %1977 = vmatmul.mubr.msk.f32.gmra.mxu0 %vm2587_vm1, %v3027_v5  ;;  %985 = vmatmul.mubr.f32.gmra.mxu1 %v3102_v9  ;;  %v3133_v9 = vrot.slane %v3063_v7, 1  ;;  %v282_v5 = vrot.slane %v3114_v49, 7 }
  0x9e   : > { %764 = vmatprep.mubr.f32.mxu0 %v3012_v53  ;;  %989 = vmatprep.mubr.f32.mxu1 %v3107_v29  ;;  %4122 = vst [vmem:[#allocation22_spill] sm:$0xff] %v3129_v4  ;;  %v540_v53 = vld [vmem:[%s4030_s1 + $0x2c8] sm:$0xff] }
  0x9f   : > { %4123 = vst [vmem:[#allocation23_spill] sm:$0xff] %v3133_v9  ;;  %1087 = vmatprep.subr.mxu0 %v4117_v54  ;;  %1308 = vmatprep.subr.mxu1 %v4117_v54 }
  0xa0   : > { %1088 = vmatpush2.msra.mxu0 %v541_v31  ;;  %1309 = vmatpush2.msra.mxu1 %v575_v25  ;;  %v3153_v31 = vsel %vm341_vm2, %v374_v18, %v3133_v9  ;;  %v3158_v25 = vsel %vm245_vm0, %v3129_v4, %v282_v5  ;;  %v539_v18 = vld [vmem:[%s4030_s1 + $0x2c0] sm:$0xff]  ;;  %v573_v5 = vld [vmem:[%s4030_s1 + $0x3d0] sm:$0xff] }
  0xa1   : > { %765 = vmatmul.mubr.f32.gmra.mxu0 %v3056_v55  ;;  %2020 = vmatmul.mubr.msk.f32.gmra.mxu1 %vm341_vm2, %v3082_v2  ;;  %4124 = vst [vmem:[#allocation24_spill] sm:$0xff] %v3153_v31  ;;  %4125 = vst [vmem:[#allocation25_spill] sm:$0xff] %v3158_v25  ;;  %v3161_v2 = vld [vmem:[%s2552_s6 + $0xc0] sm:$0xff]  ;;  %v572_v55 = vld [vmem:[%s4030_s1 + $0x3c8] sm:$0xff] }
  0xa2   : > { %769 = vmatprep.mubr.f32.mxu0 %v3059_v8  ;;  %2022 = vmatprep.mubr.msk.f32.mxu1 %vm2587_vm1, %v3129_v4  ;;  %4126 = vst [vmem:[#allocation26_spill] sm:$0xff] %v3161_v2  ;;  %v3165_v8 = vld [vmem:[%s2552_s6 + $0xc8] sm:$0xff] }
  0xa3   : > { %1089 = vmatprep.subr.mxu0 %v4117_v54  ;;  %1310 = vmatprep.subr.mxu1 %v4117_v54  ;;  %4127 = vst [vmem:[#allocation27_spill] sm:$0xff] %v3165_v8 }
  0xa4   : > { %1090 = vmatpush2.msra.mxu0 %v540_v53  ;;  %1311 = vmatpush2.msra.mxu1 %v574_v43  ;;  %v3180_v43 = vrot.slane %v3161_v2, 7  ;;  %v377_v53 = vrot.slane %v3110_v19, 1 }
  0xa5   : > { %1979 = vmatmul.mubr.msk.f32.gmra.mxu0 %vm2587_vm1, %v3078_v30  ;;  %995 = vmatmul.mubr.f32.gmra.mxu1 %v3153_v31  ;;  %v3184_v31 = vrot.slane %v3114_v49, 1  ;;  %v285_v30 = vrot.slane %v3165_v8, 7 }
  0xa6   : > { %774 = vmatprep.mubr.f32.mxu0 %v3063_v7  ;;  %999 = vmatprep.mubr.f32.mxu1 %v3158_v25  ;;  %4128 = vst [vmem:[#allocation28_spill] sm:$0xff] %v3180_v43  ;;  %v538_v7 = vld [vmem:[%s4030_s1 + $0x2b8] sm:$0xff] }
  0xa7   : > { %4129 = vst [vmem:[#allocation29_spill] sm:$0xff] %v3184_v31  ;;  %1091 = vmatprep.subr.mxu0 %v4117_v54  ;;  %1312 = vmatprep.subr.mxu1 %v4117_v54 }
  0xa8   : > { %1092 = vmatpush2.msra.mxu0 %v539_v18  ;;  %1313 = vmatpush2.msra.mxu1 %v573_v5  ;;  %v3204_v18 = vsel %vm341_vm2, %v377_v53, %v3184_v31  ;;  %v3209_v5 = vsel %vm245_vm0, %v3180_v43, %v285_v30  ;;  %v537_v53 = vld [vmem:[%s4030_s1 + $0x2b0] sm:$0xff]  ;;  %v571_v30 = vld [vmem:[%s4030_s1 + $0x3c0] sm:$0xff] }
  0xa9   : > { %775 = vmatmul.mubr.f32.gmra.mxu0 %v3107_v29  ;;  %2023 = vmatmul.mubr.msk.f32.gmra.mxu1 %vm341_vm2, %v3133_v9  ;;  %4130 = vst [vmem:[#allocation30_spill] sm:$0xff] %v3204_v18  ;;  %v3212_v9 = vld [vmem:[%s2552_s6 + $0xd0] sm:$0xff]  ;;  %v570_v29 = vld [vmem:[%s4030_s1 + $0x3b8] sm:$0xff] }
  0xaa   : > { %779 = vmatprep.mubr.f32.mxu0 %v3110_v19  ;;  %2025 = vmatprep.mubr.msk.f32.mxu1 %vm2587_vm1, %v3180_v43  ;;  %4131 = vst [vmem:[#allocation31_spill] sm:$0xff] %v3212_v9  ;;  %v3216_v19 = vld [vmem:[%s2552_s6 + $0xd8] sm:$0xff] }
  0xab   : > { %1093 = vmatprep.subr.mxu0 %v4117_v54  ;;  %1314 = vmatprep.subr.mxu1 %v4117_v54  ;;  %4132 = vst [vmem:[#allocation32_spill] sm:$0xff] %v3216_v19 }
  0xac   : > { %1094 = vmatpush2.msra.mxu0 %v538_v7  ;;  %1315 = vmatpush2.msra.mxu1 %v572_v55  ;;  %v3231_v7 = vrot.slane %v3212_v9, 7  ;;  %v380_v55 = vrot.slane %v3161_v2, 1 }
  0xad   : > { %1981 = vmatmul.mubr.msk.f32.gmra.mxu0 %vm2587_vm1, %v3129_v4  ;;  %1005 = vmatmul.mubr.f32.gmra.mxu1 %v3204_v18  ;;  %v3235_v18 = vrot.slane %v3165_v8, 1  ;;  %v288_v4 = vrot.slane %v3216_v19, 7 }
  0xae   : > { %784 = vmatprep.mubr.f32.mxu0 %v3114_v49  ;;  %1009 = vmatprep.mubr.f32.mxu1 %v3209_v5  ;;  %4133 = vst [vmem:[#allocation33_spill] sm:$0xff] %v3231_v7  ;;  %v536_v49 = vld [vmem:[%s4030_s1 + $0x2a8] sm:$0xff] }
  0xaf   : > { %4134 = vst [vmem:[#allocation34_spill] sm:$0xff] %v3235_v18  ;;  %1095 = vmatprep.subr.mxu0 %v4117_v54  ;;  %1316 = vmatprep.subr.mxu1 %v4117_v54 }
  0xb0   : > { %1096 = vmatpush2.msra.mxu0 %v537_v53  ;;  %1317 = vmatpush2.msra.mxu1 %v571_v30  ;;  %v3255_v53 = vsel %vm341_vm2, %v380_v55, %v3235_v18  ;;  %v3260_v30 = vsel %vm245_vm0, %v3231_v7, %v288_v4  ;;  %v535_v55 = vld [vmem:[%s4030_s1 + $0x2a0] sm:$0xff]  ;;  %v569_v4 = vld [vmem:[%s4030_s1 + $0x3b0] sm:$0xff] }
  0xb1   : > { %785 = vmatmul.mubr.f32.gmra.mxu0 %v3158_v25  ;;  %2026 = vmatmul.mubr.msk.f32.gmra.mxu1 %vm341_vm2, %v3184_v31  ;;  %4135 = vst [vmem:[#allocation35_spill] sm:$0xff] %v3255_v53  ;;  %v3263_v31 = vld [vmem:[%s2552_s6 + $0xe0] sm:$0xff]  ;;  %v568_v25 = vld [vmem:[%s4030_s1 + $0x3a8] sm:$0xff] }
  0xb2   : > { %789 = vmatprep.mubr.f32.mxu0 %v3161_v2  ;;  %2028 = vmatprep.mubr.msk.f32.mxu1 %vm2587_vm1, %v3231_v7  ;;  %v3267_v2 = vld [vmem:[%s2552_s6 + $0xe8] sm:$0xff] }
  0xb3   : > { %1097 = vmatprep.subr.mxu0 %v4117_v54  ;;  %1318 = vmatprep.subr.mxu1 %v4117_v54 }
  0xb4   : > { %1098 = vmatpush2.msra.mxu0 %v536_v49  ;;  %1319 = vmatpush2.msra.mxu1 %v570_v29  ;;  %v3282_v49 = vrot.slane %v3263_v31, 7  ;;  %v383_v29 = vrot.slane %v3212_v9, 1 }
  0xb5   : > { %1983 = vmatmul.mubr.msk.f32.gmra.mxu0 %vm2587_vm1, %v3180_v43  ;;  %1015 = vmatmul.mubr.f32.gmra.mxu1 %v3255_v53  ;;  %v3286_v43 = vrot.slane %v3216_v19, 1  ;;  %v291_v53 = vrot.slane %v3267_v2, 7 }
  0xb6   : > { %794 = vmatprep.mubr.f32.mxu0 %v3165_v8  ;;  %1019 = vmatprep.mubr.f32.mxu1 %v3260_v30  ;;  %v534_v8 = vld [vmem:[%s4030_s1 + $0x298] sm:$0xff] }
  0xb7   : > { %1099 = vmatprep.subr.mxu0 %v4117_v54  ;;  %1320 = vmatprep.subr.mxu1 %v4117_v54 }
  0xb8   : > { %1100 = vmatpush2.msra.mxu0 %v535_v55  ;;  %1321 = vmatpush2.msra.mxu1 %v569_v4  ;;  %v3306_v55 = vsel %vm341_vm2, %v383_v29, %v3286_v43  ;;  %v3311_v4 = vsel %vm245_vm0, %v3282_v49, %v291_v53  ;;  %v533_v29 = vld [vmem:[%s4030_s1 + $0x290] sm:$0xff]  ;;  %v567_v53 = vld [vmem:[%s4030_s1 + $0x3a0] sm:$0xff] }
  0xb9   : > { %795 = vmatmul.mubr.f32.gmra.mxu0 %v3209_v5  ;;  %2029 = vmatmul.mubr.msk.f32.gmra.mxu1 %vm341_vm2, %v3235_v18  ;;  %4136 = vst [vmem:[#allocation36_spill] sm:$0xff] %v3306_v55  ;;  %v3315_v18 = vld [vmem:[%s2552_s6 + $0xf0] sm:$0xff] }
  0xba   : > { %799 = vmatprep.mubr.f32.mxu0 %v3212_v9  ;;  %2031 = vmatprep.mubr.msk.f32.mxu1 %vm2587_vm1, %v3282_v49  ;;  %4137 = vst [vmem:[#allocation37_spill] sm:$0xff] %v3315_v18  ;;  %v3328_v9 = vld [vmem:[%s2552_s6 + $0xf8] sm:$0xff] }
  0xbb   : > { %1101 = vmatprep.subr.mxu0 %v4117_v54  ;;  %1322 = vmatprep.subr.mxu1 %v4117_v54  ;;  %4138 = vst [vmem:[#allocation38_spill] sm:$0xff] %v3328_v9 }
  0xbc   : > { %1102 = vmatpush2.msra.mxu0 %v534_v8  ;;  %1323 = vmatpush2.msra.mxu1 %v568_v25  ;;  %v3333_v8 = vrot.slane %v3315_v18, 7  ;;  %v386_v25 = vrot.slane %v3263_v31, 1  ;;  %v532_v18 = vld [vmem:[%s4030_s1 + $0x288] sm:$0xff] }
  0xbd   : > { %1985 = vmatmul.mubr.msk.f32.gmra.mxu0 %vm2587_vm1, %v3231_v7  ;;  %1025 = vmatmul.mubr.f32.gmra.mxu1 %v3306_v55  ;;  %v3337_v55 = vrot.slane %v3267_v2, 1  ;;  %v440_v7 = vrot.slane %v3328_v9, 7  ;;  %v565_v9 = vld [vmem:[%s4030_s1 + $0x390] sm:$0xff] }
  0xbe   : > { %804 = vmatprep.mubr.f32.mxu0 %v3216_v19  ;;  %1029 = vmatprep.mubr.f32.mxu1 %v3311_v4  ;;  %v566_v19 = vld [vmem:[%s4030_s1 + $0x398] sm:$0xff] }
  0xbf   : > { %1103 = vmatprep.subr.mxu0 %v4117_v54  ;;  %1324 = vmatprep.subr.mxu1 %v4117_v54 }
  0xc0   : > { %1104 = vmatpush2.msra.mxu0 %v533_v29  ;;  %1325 = vmatpush2.msra.mxu1 %v567_v53  ;;  %v3357_v29 = vsel %vm341_vm2, %v386_v25, %v3337_v55  ;;  %v3363_v53 = vsel %vm245_vm0, %v3333_v8, %v440_v7  ;;  %v594_v7 = vld [vmem:[%s4030_s1 + $0x478] sm:$0xff]  ;;  %v593_v25 = vld [vmem:[%s4030_s1 + $0x470] sm:$0xff] }
  0xc1   : > { %805 = vmatmul.mubr.f32.gmra.mxu0 %v3260_v30  ;;  %2032 = vmatmul.mubr.msk.f32.gmra.mxu1 %vm341_vm2, %v3286_v43 }
  0xc2   : > { %809 = vmatprep.mubr.f32.mxu0 %v3263_v31  ;;  %2034 = vmatprep.mubr.msk.f32.mxu1 %vm2587_vm1, %v3333_v8 }
  0xc3   : > { %1105 = vmatprep.subr.mxu0 %v4117_v54  ;;  %1326 = vmatprep.subr.mxu1 %v4117_v54 }
  0xc4   : > { %1106 = vmatpush2.msra.mxu0 %v532_v18  ;;  %1327 = vmatpush2.msra.mxu1 %v566_v19  ;;  %v531_v19 = vld [vmem:[%s4030_s1 + $0x280] sm:$0xff]  ;;  %v564_v18 = vld [vmem:[%s4030_s1 + $0x388] sm:$0xff] }
  0xc5   : > { %1987 = vmatmul.mubr.msk.f32.gmra.mxu0 %vm2587_vm1, %v3282_v49  ;;  %1035 = vmatmul.mubr.f32.gmra.mxu1 %v3357_v29 }
  0xc6   : > { %1328 = vmatprep.subr.mxu1 %v4117_v54  ;;  %814 = vmatprep.mubr.f32.mxu0 %v3267_v2 }
  0xc7   : > { %1039 = vmatprep.mubr.f32.mxu1 %v3363_v53  ;;  %1329 = vmatpush2.msra.mxu1 %v565_v9  ;;  %v563_v9 = vld [vmem:[%s4030_s1 + $0x380] sm:$0xff] }
  0xc8   : > { %1107 = vmatprep.subr.mxu0 %v4117_v54  ;;  %1330 = vmatprep.subr.mxu1 %v4117_v54 }
  0xc9   : > { %815 = vmatmul.mubr.f32.gmra.mxu0 %v3311_v4  ;;  %2035 = vmatmul.mubr.msk.f32.gmra.mxu1 %vm341_vm2, %v3337_v55 }
  0xca   : > { %1108 = vmatpush2.msra.mxu0 %v531_v19  ;;  %1331 = vmatpush2.msra.mxu1 %v564_v18  ;;  %v4150_v19 = vld [vmem:[#allocation14_spill] sm:$0xff] }
  0xcb   : > { %1332 = vmatprep.subr.mxu1 %v4117_v54  ;;  %1109 = vmatprep.mubr.f32.mxu0 %v2643_v20  ;;  %v586_v20 = vld [vmem:[%s4030_s1 + $0x438] sm:$0xff] }
  0xcc   : > { %1333 = vmatpush2.msra.mxu1 %v563_v9  ;;  %1334 = vmatprep.mubr.f32.mxu1 %v2607_v11 }
  0xcd   : > { %1110 = vmatmul.mubr.f32.vlgmr.msra.gmra.mxu0 %v2563_v61  ;;  %2053 = vmatmul.mubr.msk.f32.vlgmr.msra.gmra.mxu1 %vm2587_vm1, %v2626_v16  ;;  %v592_v61 = vld [vmem:[%s4030_s1 + $0x468] sm:$0xff]  ;;  %v587_v16 = vld [vmem:[%s4030_s1 + $0x440] sm:$0xff] }
  0xce   : > { %2152 = vmatprep.subr.mxu0 %v594_v7  ;;  %2036 = vmatprep.mubr.msk.f32.mxu0 %vm341_vm2, %v2620_v14  ;;  %v588_v14 = vld [vmem:[%s4030_s1 + $0x448] sm:$0xff] }
  0xcf   : > { %2153 = vmatpush3.msra.mxu0 %v594_v7  ;;  %1339 = vmatprep.mubr.f32.mxu1 %v2610_v12 }
  0xd0   : > { %2154 = vmatprep.subr.mxu0 %v593_v25  ;;  %2232 = vmatprep.subr.mxu1 %v594_v7 }
  0xd1   : > { %1115 = vmatmul.mubr.f32.gmra.mxu0 %v2566_v62  ;;  %1340 = vmatmul.mubr.f32.gmra.mxu1 %v2651_v21  ;;  %v591_v62 = vld [vmem:[%s4030_s1 + $0x460] sm:$0xff]  ;;  %v585_v21 = vld [vmem:[%s4030_s1 + $0x430] sm:$0xff] }
  0xd2   : > { %1119 = vmatprep.mubr.f32.mxu0 %v2694_v32  ;;  %1344 = vmatprep.mubr.f32.mxu1 %v2654_v22 }
  0xd3   : > { %2155 = vmatpush3.msra.mxu0 %v593_v25  ;;  %2248 = vmatpush3.msra.mxu1 %v594_v7 }
  0xd4   : > { %2156 = vmatprep.subr.mxu0 %v592_v61  ;;  %2233 = vmatprep.subr.mxu1 %v593_v25 }
  0xd5   : > { %1120 = vmatmul.mubr.f32.gmra.mxu0 %v2607_v11  ;;  %2055 = vmatmul.mubr.msk.f32.gmra.mxu1 %vm2587_vm1, %v2671_v26  ;;  %v590_v11 = vld [vmem:[%s4030_s1 + $0x458] sm:$0xff] }
  0xd6   : > { %2037 = vmatprep.mubr.msk.f32.mxu0 %vm341_vm2, %v2675_v28  ;;  %1349 = vmatprep.mubr.f32.mxu1 %v2657_v23  ;;  %v582_v26 = vld [vmem:[%s4030_s1 + $0x418] sm:$0xff] }
  0xd7   : > { %2157 = vmatpush3.msra.mxu0 %v592_v61  ;;  %2249 = vmatpush3.msra.mxu1 %v593_v25 }
  0xd8   : > { %2158 = vmatprep.subr.mxu0 %v591_v62  ;;  %2234 = vmatprep.subr.mxu1 %v592_v61 }
  0xd9   : > { %1125 = vmatmul.mubr.f32.gmra.mxu0 %v2610_v12  ;;  %1350 = vmatmul.mubr.f32.gmra.mxu1 %v2699_v33  ;;  %v589_v12 = vld [vmem:[%s4030_s1 + $0x450] sm:$0xff] }
  0xda   : > { %1129 = vmatprep.mubr.f32.mxu0 %v2745_v44  ;;  %1354 = vmatprep.mubr.f32.mxu1 %v2702_v34  ;;  %v581_v33 = vld [vmem:[%s4030_s1 + $0x410] sm:$0xff] }
  0xdb   : > { %2159 = vmatpush3.msra.mxu0 %v591_v62  ;;  %2250 = vmatpush3.msra.mxu1 %v592_v61  ;;  %v4151_v61 = vld [vmem:[#allocation16_spill] sm:$0xff] }
  0xdc   : > { %2160 = vmatprep.subr.mxu0 %v590_v11  ;;  %2235 = vmatprep.subr.mxu1 %v591_v62 }
  0xdd   : > { %1130 = vmatmul.mubr.f32.gmra.mxu0 %v2654_v22  ;;  %2057 = vmatmul.mubr.msk.f32.gmra.mxu1 %vm2587_vm1, %v2721_v38  ;;  %v584_v22 = vld [vmem:[%s4030_s1 + $0x428] sm:$0xff]  ;;  %v579_v38 = vld [vmem:[%s4030_s1 + $0x400] sm:$0xff] }
  0xde   : > { %2038 = vmatprep.mubr.msk.f32.mxu0 %vm341_vm2, %v2725_v40  ;;  %1359 = vmatprep.mubr.f32.mxu1 %v2706_v35 }
  0xdf   : > { %2161 = vmatpush3.msra.mxu0 %v590_v11  ;;  %2251 = vmatpush3.msra.mxu1 %v591_v62 }
  0xe0   : > { %2162 = vmatprep.subr.mxu0 %v589_v12  ;;  %2236 = vmatprep.subr.mxu1 %v590_v11 }
  0xe1   : > { %1135 = vmatmul.mubr.f32.gmra.mxu0 %v2657_v23  ;;  %1360 = vmatmul.mubr.f32.gmra.mxu1 %v2750_v45  ;;  %v583_v23 = vld [vmem:[%s4030_s1 + $0x420] sm:$0xff] }
  0xe2   : > { %1139 = vmatprep.mubr.f32.mxu0 %v2796_v56  ;;  %1364 = vmatprep.mubr.f32.mxu1 %v2753_v46  ;;  %v4140_v45 = vld [vmem:[#allocation6_spill] sm:$0xff] }
  0xe3   : > { %2163 = vmatpush3.msra.mxu0 %v589_v12  ;;  %2252 = vmatpush3.msra.mxu1 %v590_v11  ;;  %v4152_v11 = vld [vmem:[#allocation17_spill] sm:$0xff] }
  0xe4   : > { %2164 = vmatprep.subr.mxu0 %v588_v14  ;;  %2237 = vmatprep.subr.mxu1 %v589_v12 }
  0xe5   : > { %1140 = vmatmul.mubr.f32.gmra.mxu0 %v2702_v34  ;;  %2059 = vmatmul.mubr.msk.f32.gmra.mxu1 %vm2587_vm1, %v2772_v50  ;;  %v580_v34 = vld [vmem:[%s4030_s1 + $0x408] sm:$0xff]  ;;  %v4143_v50 = vld [vmem:[#allocation12_spill] sm:$0xff] }
  0xe6   : > { %2039 = vmatprep.mubr.msk.f32.mxu0 %vm341_vm2, %v2776_v52  ;;  %1369 = vmatprep.mubr.f32.mxu1 %v2757_v47 }
  0xe7   : > { %2165 = vmatpush3.msra.mxu0 %v588_v14  ;;  %2253 = vmatpush3.msra.mxu1 %v589_v12  ;;  %v4153_v12 = vld [vmem:[#allocation15_spill] sm:$0xff] }
  0xe8   : > { %2166 = vmatprep.subr.mxu0 %v587_v16  ;;  %2238 = vmatprep.subr.mxu1 %v588_v14 }
  0xe9   : > { %1145 = vmatmul.mubr.f32.gmra.mxu0 %v2706_v35  ;;  %1370 = vmatmul.mubr.f32.gmra.mxu1 %v2801_v57  ;;  %v4139_v35 = vld [vmem:[#allocation5_spill] sm:$0xff]  ;;  %v4144_v57 = vld [vmem:[#allocation8_spill] sm:$0xff] }
  0xea   : > { %1149 = vmatprep.mubr.f32.mxu0 %v2847_v10  ;;  %1374 = vmatprep.mubr.f32.mxu1 %v2804_v58 }
  0xeb   : > { %2167 = vmatpush3.msra.mxu0 %v587_v16  ;;  %2254 = vmatpush3.msra.mxu1 %v588_v14 }
  0xec   : > { %2168 = vmatprep.subr.mxu0 %v586_v20  ;;  %2239 = vmatprep.subr.mxu1 %v587_v16 }
  0xed   : > { %1150 = vmatmul.mubr.f32.gmra.mxu0 %v2753_v46  ;;  %2061 = vmatmul.mubr.msk.f32.gmra.mxu1 %vm2587_vm1, %v2823_v0  ;;  %v4141_v46 = vld [vmem:[#allocation4_spill] sm:$0xff]  ;;  %v4145_v0 = vld [vmem:[#allocation10_spill] sm:$0xff] }
  0xee   : > { %2040 = vmatprep.mubr.msk.f32.mxu0 %vm341_vm2, %v2827_v3  ;;  %1379 = vmatprep.mubr.f32.mxu1 %v2808_v59 }
  0xef   : > { %2169 = vmatpush3.msra.mxu0 %v586_v20  ;;  %2255 = vmatpush3.msra.mxu1 %v587_v16 }
  0xf0   : > { %2170 = vmatprep.subr.mxu0 %v585_v21  ;;  %2240 = vmatprep.subr.mxu1 %v586_v20 }
  0xf1   : > { %1155 = vmatmul.mubr.f32.gmra.mxu0 %v2757_v47  ;;  %1380 = vmatmul.mubr.f32.gmra.mxu1 %v2852_v13  ;;  %v4142_v47 = vld [vmem:[#allocation7_spill] sm:$0xff] }
  0xf2   : > { %1159 = vmatprep.mubr.f32.mxu0 %v2898_v36  ;;  %1384 = vmatprep.mubr.f32.mxu1 %v2855_v15 }
  0xf3   : > { %2171 = vmatpush3.msra.mxu0 %v585_v21  ;;  %2256 = vmatpush3.msra.mxu1 %v586_v20 }
  0xf4   : > { %2172 = vmatprep.subr.mxu0 %v584_v22  ;;  %2241 = vmatprep.subr.mxu1 %v585_v21 }
  0xf5   : > { %1160 = vmatmul.mubr.f32.gmra.mxu0 %v2804_v58  ;;  %2063 = vmatmul.mubr.msk.f32.gmra.mxu1 %vm2587_vm1, %v2874_v24 }
  0xf6   : > { %2041 = vmatprep.mubr.msk.f32.mxu0 %vm341_vm2, %v2878_v27  ;;  %1389 = vmatprep.mubr.f32.mxu1 %v2859_v17 }
  0xf7   : > { %2173 = vmatpush3.msra.mxu0 %v584_v22  ;;  %2257 = vmatpush3.msra.mxu1 %v585_v21 }
  0xf8   : > { %2174 = vmatprep.subr.mxu0 %v583_v23  ;;  %2242 = vmatprep.subr.mxu1 %v584_v22 }
  0xf9   : > { %1165 = vmatmul.mubr.f32.gmra.mxu0 %v2808_v59  ;;  %1390 = vmatmul.mubr.f32.gmra.mxu1 %v2903_v37 }
  0xfa   : > { %1169 = vmatprep.mubr.f32.mxu0 %v2949_v60  ;;  %1394 = vmatprep.mubr.f32.mxu1 %v2906_v39 }
  0xfb   : > { %2175 = vmatpush3.msra.mxu0 %v583_v23  ;;  %2258 = vmatpush3.msra.mxu1 %v584_v22  ;;  %v4154_v22 = vld [vmem:[#allocation19_spill] sm:$0xff] }
  0xfc   : > { %2176 = vmatprep.subr.mxu0 %v582_v26  ;;  %2243 = vmatprep.subr.mxu1 %v583_v23 }
  0xfd   : > { %1170 = vmatmul.mubr.f32.gmra.mxu0 %v2855_v15  ;;  %2065 = vmatmul.mubr.msk.f32.gmra.mxu1 %vm2587_vm1, %v2925_v48  ;;  %v4146_v15 = vld [vmem:[#allocation11_spill] sm:$0xff]  ;;  %v4148_v48 = vld [vmem:[#allocation13_spill] sm:$0xff] }
  0xfe   : > { %2042 = vmatprep.mubr.msk.f32.mxu0 %vm341_vm2, %v2929_v51  ;;  %1399 = vmatprep.mubr.f32.mxu1 %v2910_v41 }
  0xff   : > { %2177 = vmatpush3.msra.mxu0 %v582_v26  ;;  %2259 = vmatpush3.msra.mxu1 %v583_v23 }
 0x100   : > { %2178 = vmatprep.subr.mxu0 %v581_v33  ;;  %2244 = vmatprep.subr.mxu1 %v582_v26 }
 0x101   : > { %1175 = vmatmul.mubr.f32.gmra.mxu0 %v2859_v17  ;;  %1400 = vmatmul.mubr.f32.gmra.mxu1 %v2954_v63  ;;  %v4147_v17 = vld [vmem:[#allocation9_spill] sm:$0xff] }
 0x102   : > { %1179 = vmatprep.mubr.f32.mxu0 %v3000_v42  ;;  %1404 = vmatprep.mubr.f32.mxu1 %v2957_v1 }
 0x103   : > { %2179 = vmatpush3.msra.mxu0 %v581_v33  ;;  %2260 = vmatpush3.msra.mxu1 %v582_v26  ;;  %v4155_v26 = vld [vmem:[#allocation24_spill] sm:$0xff] }
 0x104   : > { %2180 = vmatprep.subr.mxu0 %v580_v34  ;;  %2245 = vmatprep.subr.mxu1 %v581_v33 }
 0x105   : > { %1180 = vmatmul.mubr.f32.gmra.mxu0 %v2906_v39  ;;  %2067 = vmatmul.mubr.msk.f32.gmra.mxu1 %vm2587_vm1, %v4139_v35 }
 0x106   : > { %2043 = vmatprep.mubr.msk.f32.mxu0 %vm341_vm2, %v4140_v45  ;;  %1409 = vmatprep.mubr.f32.mxu1 %v4141_v46 }
 0x107   : > { %2181 = vmatpush3.msra.mxu0 %v580_v34  ;;  %2261 = vmatpush3.msra.mxu1 %v581_v33  ;;  %v4156_v33 = vld [vmem:[#allocation20_spill] sm:$0xff] }
 0x108   : > { %2182 = vmatprep.subr.mxu0 %v579_v38  ;;  %2246 = vmatprep.subr.mxu1 %v580_v34 }
 0x109   : > { %1185 = vmatmul.mubr.f32.gmra.mxu0 %v2910_v41  ;;  %1410 = vmatmul.mubr.f32.gmra.mxu1 %v4142_v47  ;;  %v4157_v47 = vld [vmem:[#allocation22_spill] sm:$0xff] }
 0x10a   : > { %1189 = vmatprep.mubr.f32.mxu0 %v4143_v50  ;;  %1414 = vmatprep.mubr.f32.mxu1 %v4144_v57 }
 0x10b   : > { %2183 = vmatpush3.msra.mxu0 %v579_v38  ;;  %2262 = vmatpush3.msra.mxu1 %v580_v34 }
 0x10c   : > { %2247 = vmatprep.subr.mxu1 %v579_v38 }
 0x10d   : > { %v661_v58 = vpop.f32.mrf.mxu0  ;;  %v886_v59 = vpop.f32.mrf.mxu1  ;;  %1190 = vmatmul.mubr.f32.gmra.mxu0 %v2957_v1  ;;  %2069 = vmatmul.mubr.msk.f32.gmra.mxu1 %vm2587_vm1, %v4145_v0  ;;  %v4149_v1 = vld [vmem:[#allocation18_spill] sm:$0xff] }
 0x10e   : > { %v3532_v13 = vadd.f32 %v886_v59, %v661_v58  ;;  %2044 = vmatprep.mubr.msk.f32.mxu0 %vm341_vm2, %v4146_v15  ;;  %1419 = vmatprep.mubr.f32.mxu1 %v4147_v17  ;;  %v4158_v58 = vld [vmem:[#allocation23_spill] sm:$0xff]  ;;  %v4159_v59 = vld [vmem:[#allocation21_spill] sm:$0xff] }
 0x10f   : > { %v663_v24 = vpop.f32.mrf.mxu0  ;;  %v888_v37 = vpop.f32.mrf.mxu1  ;;  %2263 = vmatpush3.msra.mxu1 %v579_v38 }
 0x111   : > { %v666_v39 = vpop.f32.mrf.mxu0  ;;  %v891_v41 = vpop.f32.mrf.mxu1  ;;  %1195 = vmatmul.mubr.f32.gmra.mxu0 %v4141_v46  ;;  %1420 = vmatmul.mubr.f32.gmra.mxu1 %v4148_v48  ;;  %v4161_v48 = vld [vmem:[#allocation30_spill] sm:$0xff] }
 0x112   : > { %v3539_v63 = vadd.f32 %v891_v41, %v666_v39  ;;  %1199 = vmatprep.mubr.f32.mxu0 %v4149_v1  ;;  %1424 = vmatprep.mubr.f32.mxu1 %v4150_v19  ;;  %v4160_v39 = vld [vmem:[#allocation25_spill] sm:$0xff] }
 0x113   : > { %v668_v18 = vpop.f32.mrf.mxu0  ;;  %v893_v9 = vpop.f32.mrf.mxu1 }
 0x115   : > { %v671_v7 = vpop.f32.mrf.mxu0  ;;  %v896_v25 = vpop.f32.mrf.mxu1  ;;  %1200 = vmatmul.mubr.f32.gmra.mxu0 %v4144_v57  ;;  %2071 = vmatmul.mubr.msk.f32.gmra.mxu1 %vm2587_vm1, %v4151_v61  ;;  %v4163_v61 = vld [vmem:[#allocation28_spill] sm:$0xff] }
 0x116   : > { %v3547_v62 = vadd.f32 %v896_v25, %v671_v7  ;;  %2045 = vmatprep.mubr.msk.f32.mxu0 %vm341_vm2, %v4152_v11  ;;  %1429 = vmatprep.mubr.f32.mxu1 %v4153_v12 }
 0x117   : > { %v673_v14 = vpop.f32.mrf.mxu0  ;;  %v898_v16 = vpop.f32.mrf.mxu1 }
 0x118   : > { %v4165_v16 = vld [vmem:[#allocation27_spill] sm:$0xff] }
 0x119   : > { %v676_v20 = vpop.f32.mrf.mxu0  ;;  %v901_v21 = vpop.f32.mrf.mxu1  ;;  %1205 = vmatmul.mubr.f32.gmra.mxu0 %v4147_v17  ;;  %1430 = vmatmul.mubr.f32.gmra.mxu1 %v4154_v22 }
 0x11a   : > { %v3554_v23 = vadd.f32 %v901_v21, %v676_v20  ;;  %1209 = vmatprep.mubr.f32.mxu0 %v4155_v26  ;;  %1434 = vmatprep.mubr.f32.mxu1 %v4156_v33 }
 0x11b   : > { %v678_v34 = vpop.f32.mrf.mxu0  ;;  %v903_v35 = vpop.f32.mrf.mxu1 }
 0x11c   : > { %v4166_v35 = vld [vmem:[#allocation35_spill] sm:$0xff] }
 0x11d   : > { %v681_v38 = vpop.f32.mrf.mxu0  ;;  %v906_v46 = vpop.f32.mrf.mxu1  ;;  %1210 = vmatmul.mubr.f32.gmra.mxu0 %v4150_v19  ;;  %2073 = vmatmul.mubr.msk.f32.gmra.mxu1 %vm2587_vm1, %v4157_v47  ;;  %v4162_v19 = vld [vmem:[#allocation26_spill] sm:$0xff] }
 0x11e   : > { %v3562_v57 = vadd.f32 %v906_v46, %v681_v38  ;;  %2046 = vmatprep.mubr.msk.f32.mxu0 %vm341_vm2, %v4158_v58  ;;  %1439 = vmatprep.mubr.f32.mxu1 %v4159_v59  ;;  %v4167_v38 = vld [vmem:[#allocation31_spill] sm:$0xff] }
 0x11f   : > { %v683_v0 = vpop.f32.mrf.mxu0  ;;  %v908_v17 = vpop.f32.mrf.mxu1 }
 0x121   : > { %v686_v24 = vpop.f32.mrf.mxu0  ;;  %v911_v37 = vpop.f32.mrf.mxu1  ;;  %1215 = vmatmul.mubr.f32.gmra.mxu0 %v4153_v12  ;;  %1440 = vmatmul.mubr.f32.gmra.mxu1 %v4160_v39  ;;  %v4164_v12 = vld [vmem:[#allocation29_spill] sm:$0xff] }
 0x122   : > { %v3569_v41 = vadd.f32 %v911_v37, %v686_v24  ;;  %1219 = vmatprep.mubr.f32.mxu0 %v4161_v48  ;;  %1444 = vmatprep.mubr.f32.mxu1 %v4162_v19  ;;  %v4168_v24 = vld [vmem:[#allocation33_spill] sm:$0xff] }
 0x123   : > { %v688_v18 = vpop.f32.mrf.mxu0  ;;  %v913_v9 = vpop.f32.mrf.mxu1 }
 0x125   : > { %v691_v7 = vpop.f32.mrf.mxu0  ;;  %v916_v25 = vpop.f32.mrf.mxu1  ;;  %1220 = vmatmul.mubr.f32.gmra.mxu0 %v4156_v33  ;;  %2075 = vmatmul.mubr.msk.f32.gmra.mxu1 %vm2587_vm1, %v4163_v61 }
 0x126   : > { %v3577_v14 = vadd.f32 %v916_v25, %v691_v7  ;;  %2047 = vmatprep.mubr.msk.f32.mxu0 %vm341_vm2, %v4164_v12  ;;  %1449 = vmatprep.mubr.f32.mxu1 %v4165_v16  ;;  %v4171_v25 = vld [vmem:[#allocation36_spill] sm:$0xff] }
 0x127   : > { %v693_v20 = vpop.f32.mrf.mxu0  ;;  %v918_v21 = vpop.f32.mrf.mxu1 }
 0x129   : > { %v696_v22 = vpop.f32.mrf.mxu0  ;;  %v921_v34 = vpop.f32.mrf.mxu1  ;;  %1225 = vmatmul.mubr.f32.gmra.mxu0 %v4159_v59  ;;  %1450 = vmatmul.mubr.f32.gmra.mxu1 %v3209_v5  ;;  %v4169_v59 = vld [vmem:[#allocation34_spill] sm:$0xff]  ;;  %v4170_v5 = vld [vmem:[#allocation32_spill] sm:$0xff] }
 0x12a   : > { %v3584_v33 = vadd.f32 %v921_v34, %v696_v22  ;;  %1229 = vmatprep.mubr.f32.mxu0 %v4166_v35  ;;  %1454 = vmatprep.mubr.f32.mxu1 %v4167_v38 }
 0x12b   : > { %v698_v46 = vpop.f32.mrf.mxu0  ;;  %v923_v47 = vpop.f32.mrf.mxu1 }
 0x12d   : > { %v701_v0 = vpop.f32.mrf.mxu0  ;;  %v926_v17 = vpop.f32.mrf.mxu1  ;;  %1230 = vmatmul.mubr.f32.gmra.mxu0 %v4162_v19  ;;  %2077 = vmatmul.mubr.msk.f32.gmra.mxu1 %vm2587_vm1, %v4168_v24 }
 0x12e   : > { %v3592_v37 = vadd.f32 %v926_v17, %v701_v0  ;;  %2048 = vmatprep.mubr.msk.f32.mxu0 %vm341_vm2, %v4169_v59  ;;  %1459 = vmatprep.mubr.f32.mxu1 %v4170_v5 }
 0x12f   : > { %v703_v39 = vpop.f32.mrf.mxu0  ;;  %v928_v18 = vpop.f32.mrf.mxu1 }
 0x130   : > { %v4173_v39 = vld [vmem:[#allocation38_spill] sm:$0xff] }
 0x131   : > { %v706_v9 = vpop.f32.mrf.mxu0  ;;  %v931_v7 = vpop.f32.mrf.mxu1  ;;  %1235 = vmatmul.mubr.f32.gmra.mxu0 %v4165_v16  ;;  %1460 = vmatmul.mubr.f32.gmra.mxu1 %v3260_v30  ;;  %v3620_v18 = vrot.slane %v4173_v39, 1 }
 0x132   : > { %v3599_v19 = vadd.f32 %v931_v7, %v706_v9  ;;  %1239 = vmatprep.mubr.f32.mxu0 %v4171_v25  ;;  %1464 = vmatprep.mubr.f32.mxu1 %v3263_v31 }
 0x133   : > { %v708_v61 = vpop.f32.mrf.mxu0  ;;  %v933_v20 = vpop.f32.mrf.mxu1 }
 0x135   : > { %v711_v21 = vpop.f32.mrf.mxu0  ;;  %v936_v22 = vpop.f32.mrf.mxu1  ;;  %1240 = vmatmul.mubr.f32.gmra.mxu0 %v4167_v38  ;;  %2079 = vmatmul.mubr.msk.f32.gmra.mxu1 %vm2587_vm1, %v3282_v49  ;;  %v4172_v49 = vld [vmem:[#allocation37_spill] sm:$0xff] }
 0x136   : > { %v3607_v34 = vadd.f32 %v936_v22, %v711_v21  ;;  %2049 = vmatprep.mubr.msk.f32.mxu0 %vm341_vm2, %v3286_v43  ;;  %1469 = vmatprep.mubr.f32.mxu1 %v3267_v2  ;;  %v445_v24 = vrot.slane %v4172_v49, 1 }
 0x137   : > { %v713_v30 = vpop.f32.mrf.mxu0  ;;  %v938_v16 = vpop.f32.mrf.mxu1 }
 0x138   : > { %v3633_v20 = vsel %vm341_vm2, %v445_v24, %v3620_v18 }
 0x139   : > { %v716_v46 = vpop.f32.mrf.mxu0  ;;  %v941_v47 = vpop.f32.mrf.mxu1  ;;  %1245 = vmatmul.mubr.f32.gmra.mxu0 %v4170_v5  ;;  %1470 = vmatmul.mubr.f32.gmra.mxu1 %v3311_v4 }
 0x13a   : > { %v3614_v38 = vadd.f32 %v941_v47, %v716_v46  ;;  %1249 = vmatprep.mubr.f32.mxu0 %v3357_v29  ;;  %1474 = vmatprep.mubr.f32.mxu1 %v4172_v49  ;;  %v4174_v47 = vld [vmem:[#allocation2_spill] sm:$0xff] }
 0x13b   : > { %v718_v0 = vpop.f32.mrf.mxu0  ;;  %v943_v17 = vpop.f32.mrf.mxu1 }
 0x13d   : > { %v721_v9 = vpop.f32.mrf.mxu0  ;;  %v946_v7 = vpop.f32.mrf.mxu1  ;;  %1250 = vmatmul.mubr.f32.gmra.mxu0 %v3263_v31  ;;  %2081 = vmatmul.mubr.msk.f32.gmra.mxu1 %vm2587_vm1, %v3333_v8 }
 0x13e   : > { %v3626_v4 = vadd.f32 %v946_v7, %v721_v9  ;;  %2050 = vmatprep.mubr.msk.f32.mxu0 %vm341_vm2, %v3337_v55  ;;  %1479 = vmatprep.mubr.f32.mxu1 %v4173_v39 }
 0x13f   : > { %v723_v5 = vpop.f32.mrf.mxu0  ;;  %v948_v61 = vpop.f32.mrf.mxu1 }
 0x141   : > { %v726_v21 = vpop.f32.mrf.mxu0  ;;  %v951_v22 = vpop.f32.mrf.mxu1  ;;  %1255 = vmatmul.mubr.f32.gmra.mxu0 %v3267_v2  ;;  %1480 = vmatmul.mubr.f32.gmra.mxu1 %v3363_v53 }
 0x142   : > { %v3637_v31 = vadd.f32 %v951_v22, %v726_v21  ;;  %1259 = vmatprep.mubr.f32.mxu0 %v3633_v20  ;;  %1484 = vmatprep.mubr.f32.mxu1 %v4117_v54 }
 0x143   : > { %v728_v8 = vpop.f32.mrf.mxu0  ;;  %v953_v30 = vpop.f32.mrf.mxu1 }
 0x145   : > { %v731_v16 = vpop.f32.mrf.mxu0  ;;  %v956_v46 = vpop.f32.mrf.mxu1  ;;  %1260 = vmatmul.mubr.f32.gmra.mxu0 %v4172_v49  ;;  %2083 = vmatmul.mubr.msk.f32.gmra.mxu1 %vm2587_vm1, %v4174_v47 }
 0x146   : > { %v3645_v0 = vadd.f32 %v956_v46, %v731_v16  ;;  %2051 = vmatprep.mubr.msk.f32.mxu0 %vm341_vm2, %v3620_v18  ;;  %1489 = vmatprep.mubr.f32.mxu1 %v4117_v54 }
 0x147   : > { %v733_v2 = vpop.f32.mrf.mxu0  ;;  %v958_v53 = vpop.f32.mrf.mxu1 }
 0x149   : > { %v736_v17 = vpop.f32.mrf.mxu0  ;;  %v961_v24 = vpop.f32.mrf.mxu1  ;;  %1265 = vmatmul.mubr.f32.gmra.mxu0 %v4173_v39  ;;  %1490 = vmatmul.mubr.f32.gmra.mxu1 %v4174_v47 }
 0x14a   : > { %v3652_v49 = vadd.f32 %v961_v24, %v736_v17  ;;  %2184 = vmatprep.mubr.f32.mxu0 %v2694_v32  ;;  %2208 = vmatprep.mubr.f32.mxu1 %v4149_v1 }
 0x14b   : > { %v738_v6 = vpop.f32.mrf.mxu0  ;;  %v963_v9 = vpop.f32.mrf.mxu1 }
 0x14d   : > { %v741_v7 = vpop.f32.mrf.mxu0  ;;  %v966_v5 = vpop.f32.mrf.mxu1  ;;  %2185 = vmatmul.mubr.msk.f32.vlgmr.msra.gmra.mxu0 %vm341_vm2, %v2675_v28  ;;  %2209 = vmatmul.mubr.msk.f32.vlgmr.msra.gmra.mxu1 %vm341_vm2, %v4152_v11 }
 0x14e   : > { %v3660_v54 = vadd.f32 %v966_v5, %v741_v7  ;;  %2187 = vmatprep.mubr.f32.mxu0 %v2745_v44  ;;  %2211 = vmatprep.mubr.f32.mxu1 %v4155_v26 }
 0x14f   : > { %v743_v39 = vpop.f32.mrf.mxu0  ;;  %v968_v32 = vpop.f32.mrf.mxu1 }
 0x151   : > { %v746_v61 = vpop.f32.mrf.mxu0  ;;  %v971_v1 = vpop.f32.mrf.mxu1  ;;  %2188 = vmatmul.mubr.msk.f32.gmra.mxu0 %vm341_vm2, %v2725_v40  ;;  %2212 = vmatmul.mubr.msk.f32.gmra.mxu1 %vm341_vm2, %v4158_v58 }
 0x152   : > { %v3668_v28 = vadd.f32 %v971_v1, %v746_v61  ;;  %2190 = vmatprep.mubr.f32.mxu0 %v2796_v56  ;;  %2214 = vmatprep.mubr.f32.mxu1 %v4161_v48 }
 0x153   : > { %v748_v11 = vpop.f32.mrf.mxu0  ;;  %v973_v44 = vpop.f32.mrf.mxu1 }
 0x155   : > { %v751_v21 = vpop.f32.mrf.mxu0  ;;  %v976_v26 = vpop.f32.mrf.mxu1  ;;  %2191 = vmatmul.mubr.msk.f32.gmra.mxu0 %vm341_vm2, %v2776_v52  ;;  %2215 = vmatmul.mubr.msk.f32.gmra.mxu1 %vm341_vm2, %v4164_v12 }
 0x156   : > { %v3676_v40 = vadd.f32 %v976_v26, %v751_v21  ;;  %2193 = vmatprep.mubr.f32.mxu0 %v2847_v10  ;;  %2217 = vmatprep.mubr.f32.mxu1 %v4166_v35 }
 0x157   : > { %v753_v58 = vpop.f32.mrf.mxu0  ;;  %v978_v56 = vpop.f32.mrf.mxu1 }
 0x159   : > { %v756_v22 = vpop.f32.mrf.mxu0  ;;  %v981_v48 = vpop.f32.mrf.mxu1  ;;  %2194 = vmatmul.mubr.msk.f32.gmra.mxu0 %vm341_vm2, %v2827_v3  ;;  %2218 = vmatmul.mubr.msk.f32.gmra.mxu1 %vm341_vm2, %v4169_v59 }
 0x15a   : > { %v3684_v52 = vadd.f32 %v981_v48, %v756_v22  ;;  %2196 = vmatprep.mubr.f32.mxu0 %v2898_v36  ;;  %2220 = vmatprep.mubr.f32.mxu1 %v4171_v25 }
 0x15b   : > { %v758_v12 = vpop.f32.mrf.mxu0  ;;  %v983_v10 = vpop.f32.mrf.mxu1 }
 0x15d   : > { %v761_v8 = vpop.f32.mrf.mxu0  ;;  %v986_v35 = vpop.f32.mrf.mxu1  ;;  %2197 = vmatmul.mubr.msk.f32.gmra.mxu0 %vm341_vm2, %v2878_v27  ;;  %2221 = vmatmul.mubr.msk.f32.gmra.mxu1 %vm341_vm2, %v3286_v43 }
 0x15e   : > { %v3692_v3 = vadd.f32 %v986_v35, %v761_v8  ;;  %2199 = vmatprep.mubr.f32.mxu0 %v2949_v60  ;;  %2223 = vmatprep.mubr.f32.mxu1 %v3357_v29 }
 0x15f   : > { %v763_v59 = vpop.f32.mrf.mxu0  ;;  %v988_v36 = vpop.f32.mrf.mxu1 }
 0x161   : > { %v766_v30 = vpop.f32.mrf.mxu0  ;;  %v991_v25 = vpop.f32.mrf.mxu1  ;;  %2200 = vmatmul.mubr.msk.f32.gmra.mxu0 %vm341_vm2, %v2929_v51  ;;  %2224 = vmatmul.mubr.msk.f32.gmra.mxu1 %vm341_vm2, %v3337_v55  ;;  %v4175_v55 = vld [vmem:[#allocation3_spill] sm:$0xff] }
 0x162   : > { %v3700_v27 = vadd.f32 %v991_v25, %v766_v30  ;;  %2202 = vmatprep.mubr.f32.mxu0 %v3000_v42  ;;  %2226 = vmatprep.mubr.f32.mxu1 %v3633_v20 }
 0x163   : > { %v768_v43 = vpop.f32.mrf.mxu0  ;;  %v993_v60 = vpop.f32.mrf.mxu1 }
 0x165   : > { %v771_v16 = vpop.f32.mrf.mxu0  ;;  %v996_v29 = vpop.f32.mrf.mxu1  ;;  %2203 = vmatmul.mubr.msk.f32.gmra.mxu0 %vm341_vm2, %v4140_v45  ;;  %2227 = vmatmul.mubr.msk.f32.gmra.mxu1 %vm341_vm2, %v3620_v18 }
 0x166   : > { %v3708_v51 = vadd.f32 %v996_v29, %v771_v16  ;;  %2205 = vmatprep.mubr.f32.mxu0 %v4143_v50  ;;  %2229 = vmatprep.mubr.f32.mxu1 %v4175_v55 }
 0x167   : > { %v773_v46 = vpop.f32.mrf.mxu0  ;;  %v998_v42 = vpop.f32.mrf.mxu1 }
 0x169   : > { %v776_v47 = vpop.f32.mrf.mxu0  ;;  %v1001_v20 = vpop.f32.mrf.mxu1  ;;  %2206 = vmatmul.mubr.msk.f32.gmra.mxu0 %vm341_vm2, %v4146_v15  ;;  %2230 = vmatmul.mubr.msk.f32.gmra.mxu1 %vm341_vm2, %v4175_v55 }
 0x16a   : > { %v3716_v45 = vadd.f32 %v1001_v20, %v776_v47 }
 0x16b   : > { %v778_v2 = vpop.f32.mrf.mxu0  ;;  %v1003_v18 = vpop.f32.mrf.mxu1 }
 0x16d   : > { %v781_v53 = vpop.f32.mrf.mxu0  ;;  %v1006_v17 = vpop.f32.mrf.mxu1 }
 0x16e   : > { %v3718_v24 = vadd.f32 %v1006_v17, %v781_v53 }
 0x16f   : > { %v783_v50 = vpop.f32.mrf.mxu0  ;;  %v1008_v6 = vpop.f32.mrf.mxu1 }
 0x171   : > { %v786_v9 = vpop.f32.mrf.mxu0  ;;  %v1011_v7 = vpop.f32.mrf.mxu1 }
 0x172   : > { %v3720_v5 = vadd.f32 %v1011_v7, %v786_v9 }
 0x173   : > { %v788_v39 = vpop.f32.mrf.mxu0  ;;  %v1013_v32 = vpop.f32.mrf.mxu1 }
 0x175   : > { %v791_v15 = vpop.f32.mrf.mxu0  ;;  %v1016_v61 = vpop.f32.mrf.mxu1 }
 0x176   : > { %v3722_v1 = vadd.f32 %v1016_v61, %v791_v15 }
 0x177   : > { %v793_v11 = vpop.f32.mrf.mxu0  ;;  %v1018_v44 = vpop.f32.mrf.mxu1 }
 0x179   : > { %v796_v21 = vpop.f32.mrf.mxu0  ;;  %v1021_v26 = vpop.f32.mrf.mxu1 }
 0x17a   : > { %v3724_v58 = vadd.f32 %v1021_v26, %v796_v21 }
 0x17b   : > { %v798_v56 = vpop.f32.mrf.mxu0  ;;  %v1023_v22 = vpop.f32.mrf.mxu1 }
 0x17d   : > { %v801_v48 = vpop.f32.mrf.mxu0  ;;  %v1026_v12 = vpop.f32.mrf.mxu1 }
 0x17e   : > { %v3726_v10 = vadd.f32 %v1026_v12, %v801_v48 }
 0x17f   : > { %v803_v8 = vpop.f32.mrf.mxu0  ;;  %v1028_v35 = vpop.f32.mrf.mxu1 }
 0x181   : > { %v806_v59 = vpop.f32.mrf.mxu0  ;;  %v1031_v36 = vpop.f32.mrf.mxu1 }
 0x182   : > { %v3728_v30 = vadd.f32 %v1031_v36, %v806_v59 }
 0x183   : > { %v808_v25 = vpop.f32.mrf.mxu0  ;;  %v1033_v43 = vpop.f32.mrf.mxu1 }
 0x185   : > { %v811_v60 = vpop.f32.mrf.mxu0  ;;  %v1036_v16 = vpop.f32.mrf.mxu1 }
 0x186   : > { %v3730_v29 = vadd.f32 %v1036_v16, %v811_v60 }
 0x187   : > { %v813_v55 = vpop.f32.mrf.mxu0  ;;  %v1038_v46 = vpop.f32.mrf.mxu1 }
 0x188   : > { %4176 = vst [vmem:[#allocation5_spill] sm:$0xff] %v3730_v29 }
 0x189   : > { %v816_v42 = vpop.f32.mrf.mxu0  ;;  %v1041_v47 = vpop.f32.mrf.mxu1 }
 0x18a   : > { %v3732_v20 = vadd.f32 %v1041_v47, %v816_v42 }
 0x18b   : > { %v818_v2 = vpop.f32.mrf.mxu0  ;;  %v1043_v18 = vpop.f32.mrf.mxu1 }
 0x18c   : > { %4177 = vst [vmem:[#allocation6_spill] sm:$0xff] %v3732_v20 }
 0x18d   : > { %v1111_v53 = vpop.f32.mrf.mxu0  ;;  %v1336_v17 = vpop.f32.mrf.mxu1 }
 0x18e   : > { %v1112_v50 = vadd.f32 %v1111_v53, %v3532_v13 }
 0x18f   : > { %v1113_v6 = vpop.f32.mrf.mxu0  ;;  %v1338_v9 = vpop.f32.mrf.mxu1 }
 0x190   : > { %v3735_v7 = vadd.f32 %v1336_v17, %v1112_v50 }
 0x191   : > { %v1116_v39 = vpop.f32.mrf.mxu0  ;;  %v1341_v32 = vpop.f32.mrf.mxu1 }
 0x192   : > { %v1117_v15 = vadd.f32 %v1116_v39, %v3539_v63 }
 0x193   : > { %v1118_v61 = vpop.f32.mrf.mxu0  ;;  %v1343_v11 = vpop.f32.mrf.mxu1 }
 0x194   : > { %v3738_v44 = vadd.f32 %v1341_v32, %v1117_v15 }
 0x195   : > { %v1121_v21 = vpop.f32.mrf.mxu0  ;;  %v1346_v26 = vpop.f32.mrf.mxu1 }
 0x196   : > { %v1122_v56 = vadd.f32 %v1121_v21, %v3547_v62 }
 0x197   : > { %v1123_v22 = vpop.f32.mrf.mxu0  ;;  %v1348_v48 = vpop.f32.mrf.mxu1 }
 0x198   : > { %v3741_v12 = vadd.f32 %v1346_v26, %v1122_v56 }
 0x199   : > { %v1126_v13 = vpop.f32.mrf.mxu0  ;;  %v1351_v8 = vpop.f32.mrf.mxu1 }
 0x19a   : > { %v1127_v35 = vadd.f32 %v1126_v13, %v3554_v23 }
 0x19b   : > { %v1128_v59 = vpop.f32.mrf.mxu0  ;;  %v1353_v36 = vpop.f32.mrf.mxu1 }
 0x19c   : > { %v3744_v25 = vadd.f32 %v1351_v8, %v1127_v35 }
 0x19d   : > { %v1131_v63 = vpop.f32.mrf.mxu0  ;;  %v1356_v43 = vpop.f32.mrf.mxu1 }
 0x19e   : > { %v1132_v60 = vadd.f32 %v1131_v63, %v3562_v57 }
 0x19f   : > { %v1133_v16 = vpop.f32.mrf.mxu0  ;;  %v1358_v55 = vpop.f32.mrf.mxu1 }
 0x1a0   : > { %v3747_v46 = vadd.f32 %v1356_v43, %v1132_v60 }
 0x1a1   : > { %v1136_v62 = vpop.f32.mrf.mxu0  ;;  %v1361_v42 = vpop.f32.mrf.mxu1 }
 0x1a2   : > { %v1137_v47 = vadd.f32 %v1136_v62, %v3569_v41 }
 0x1a3   : > { %v1138_v2 = vpop.f32.mrf.mxu0  ;;  %v1363_v18 = vpop.f32.mrf.mxu1 }
 0x1a4   : > { %v3750_v53 = vadd.f32 %v1361_v42, %v1137_v47 }
 0x1a5   : > { %v1141_v23 = vpop.f32.mrf.mxu0  ;;  %v1366_v17 = vpop.f32.mrf.mxu1 }
 0x1a6   : > { %v1142_v50 = vadd.f32 %v1141_v23, %v3577_v14 }
 0x1a7   : > { %v1143_v6 = vpop.f32.mrf.mxu0  ;;  %v1368_v9 = vpop.f32.mrf.mxu1 }
 0x1a8   : > { %v3753_v39 = vadd.f32 %v1366_v17, %v1142_v50 }
 0x1a9   : > { %v1146_v57 = vpop.f32.mrf.mxu0  ;;  %v1371_v32 = vpop.f32.mrf.mxu1 }
 0x1aa   : > { %v1147_v15 = vadd.f32 %v1146_v57, %v3584_v33 }
 0x1ab   : > { %v1148_v61 = vpop.f32.mrf.mxu0  ;;  %v1373_v11 = vpop.f32.mrf.mxu1 }
 0x1ac   : > { %v3756_v21 = vadd.f32 %v1371_v32, %v1147_v15 }
 0x1ad   : > { %v1151_v41 = vpop.f32.mrf.mxu0  ;;  %v1376_v26 = vpop.f32.mrf.mxu1 }
 0x1ae   : > { %v1152_v56 = vadd.f32 %v1151_v41, %v3592_v37 }
 0x1af   : > { %v1153_v22 = vpop.f32.mrf.mxu0  ;;  %v1378_v48 = vpop.f32.mrf.mxu1 }
 0x1b0   : > { %v3759_v13 = vadd.f32 %v1376_v26, %v1152_v56 }
 0x1b1   : > { %v1156_v14 = vpop.f32.mrf.mxu0  ;;  %v1381_v8 = vpop.f32.mrf.mxu1 }
 0x1b2   : > { %v1157_v35 = vadd.f32 %v1156_v14, %v3599_v19 }
 0x1b3   : > { %v1158_v59 = vpop.f32.mrf.mxu0  ;;  %v1383_v36 = vpop.f32.mrf.mxu1 }
 0x1b4   : > { %v3762_v63 = vadd.f32 %v1381_v8, %v1157_v35 }
 0x1b5   : > { %v1161_v33 = vpop.f32.mrf.mxu0  ;;  %v1386_v43 = vpop.f32.mrf.mxu1 }
 0x1b6   : > { %v1162_v60 = vadd.f32 %v1161_v33, %v3607_v34 }
 0x1b7   : > { %v1163_v16 = vpop.f32.mrf.mxu0  ;;  %v1388_v55 = vpop.f32.mrf.mxu1 }
 0x1b8   : > { %v3765_v62 = vadd.f32 %v1386_v43, %v1162_v60 }
 0x1b9   : > { %v1166_v37 = vpop.f32.mrf.mxu0  ;;  %v1391_v42 = vpop.f32.mrf.mxu1 }
 0x1ba   : > { %v1167_v47 = vadd.f32 %v1166_v37, %v3614_v38 }
 0x1bb   : > { %v1168_v2 = vpop.f32.mrf.mxu0  ;;  %v1393_v18 = vpop.f32.mrf.mxu1 }
 0x1bc   : > { %v3768_v23 = vadd.f32 %v1391_v42, %v1167_v47 }
 0x1bd   : > { %v1171_v19 = vpop.f32.mrf.mxu0  ;;  %v1396_v17 = vpop.f32.mrf.mxu1 }
 0x1be   : > { %v1172_v50 = vadd.f32 %v1171_v19, %v3626_v4 }
 0x1bf   : > { %v1173_v6 = vpop.f32.mrf.mxu0  ;;  %v1398_v9 = vpop.f32.mrf.mxu1 }
 0x1c0   : > { %v3771_v57 = vadd.f32 %v1396_v17, %v1172_v50 }
 0x1c1   : > { %v1176_v34 = vpop.f32.mrf.mxu0  ;;  %v1401_v32 = vpop.f32.mrf.mxu1 }
 0x1c2   : > { %4178 = vst [vmem:[#allocation4_spill] sm:$0xff] %v3771_v57  ;;  %v1177_v15 = vadd.f32 %v1176_v34, %v3637_v31 }
 0x1c3   : > { %v1178_v61 = vpop.f32.mrf.mxu0  ;;  %v1403_v11 = vpop.f32.mrf.mxu1 }
 0x1c4   : > { %v3774_v41 = vadd.f32 %v1401_v32, %v1177_v15 }
 0x1c5   : > { %v1181_v38 = vpop.f32.mrf.mxu0  ;;  %v1406_v26 = vpop.f32.mrf.mxu1 }
 0x1c6   : > { %4179 = vst [vmem:[#allocation7_spill] sm:$0xff] %v3774_v41  ;;  %v1182_v56 = vadd.f32 %v1181_v38, %v3645_v0 }
 0x1c7   : > { %v1183_v22 = vpop.f32.mrf.mxu0  ;;  %v1408_v48 = vpop.f32.mrf.mxu1 }
 0x1c8   : > { %v3777_v14 = vadd.f32 %v1406_v26, %v1182_v56 }
 0x1c9   : > { %v1186_v4 = vpop.f32.mrf.mxu0  ;;  %v1411_v8 = vpop.f32.mrf.mxu1 }
 0x1ca   : > { %4180 = vst [vmem:[#allocation12_spill] sm:$0xff] %v3777_v14  ;;  %v1187_v35 = vadd.f32 %v1186_v4, %v3652_v49 }
 0x1cb   : > { %v1188_v59 = vpop.f32.mrf.mxu0  ;;  %v1413_v36 = vpop.f32.mrf.mxu1 }
 0x1cc   : > { %v3780_v33 = vadd.f32 %v1411_v8, %v1187_v35 }
 0x1cd   : > { %v1191_v31 = vpop.f32.mrf.mxu0  ;;  %v1416_v43 = vpop.f32.mrf.mxu1 }
 0x1ce   : > { %4181 = vst [vmem:[#allocation8_spill] sm:$0xff] %v3780_v33  ;;  %v1192_v60 = vadd.f32 %v1191_v31, %v3660_v54 }
 0x1cf   : > { %v1193_v16 = vpop.f32.mrf.mxu0  ;;  %v1418_v55 = vpop.f32.mrf.mxu1 }
 0x1d0   : > { %v3783_v37 = vadd.f32 %v1416_v43, %v1192_v60 }
 0x1d1   : > { %v1196_v0 = vpop.f32.mrf.mxu0  ;;  %v1421_v42 = vpop.f32.mrf.mxu1 }
 0x1d3   : > { %v1198_v47 = vpop.f32.mrf.mxu0  ;;  %v1423_v2 = vpop.f32.mrf.mxu1 }
 0x1d5   : > { %v1201_v18 = vpop.f32.mrf.mxu0  ;;  %v3785_v19 = vpop.f32.mrf.mxu1 }
 0x1d6   : > { %v1202_v20 = vadd.f32 %v1201_v18, %v3676_v40 }
 0x1d7   : > { %v1203_v49 = vpop.f32.mrf.mxu0  ;;  %v1428_v17 = vpop.f32.mrf.mxu1 }
 0x1d9   : > { %v1206_v50 = vpop.f32.mrf.mxu0  ;;  %v3787_v6 = vpop.f32.mrf.mxu1 }
 0x1db   : > { %v1208_v9 = vpop.f32.mrf.mxu0  ;;  %v1433_v34 = vpop.f32.mrf.mxu1 }
 0x1dd   : > { %v3789_v32 = vpop.f32.mrf.mxu0  ;;  %v3791_v54 = vpop.f32.mrf.mxu1 }
 0x1df   : > { %v1213_v15 = vpop.f32.mrf.mxu0  ;;  %v1438_v61 = vpop.f32.mrf.mxu1 }
 0x1e1   : > { %v1216_v11 = vpop.f32.mrf.mxu0  ;;  %v3793_v38 = vpop.f32.mrf.mxu1 }
 0x1e3   : > { %v1218_v26 = vpop.f32.mrf.mxu0  ;;  %v1443_v56 = vpop.f32.mrf.mxu1 }
 0x1e5   : > { %v3795_v22 = vpop.f32.mrf.mxu0  ;;  %v3797_v48 = vpop.f32.mrf.mxu1 }
 0x1e7   : > { %v1223_v4 = vpop.f32.mrf.mxu0  ;;  %v1448_v8 = vpop.f32.mrf.mxu1 }
 0x1e9   : > { %v3799_v35 = vpop.f32.mrf.mxu0  ;;  %v3801_v59 = vpop.f32.mrf.mxu1 }
 0x1eb   : > { %v1228_v36 = vpop.f32.mrf.mxu0  ;;  %v1453_v31 = vpop.f32.mrf.mxu1 }
 0x1ed   : > { %v3803_v43 = vpop.f32.mrf.mxu0  ;;  %v3805_v60 = vpop.f32.mrf.mxu1 }
 0x1ef   : > { %v1233_v16 = vpop.f32.mrf.mxu0  ;;  %v1458_v55 = vpop.f32.mrf.mxu1 }
 0x1f1   : > { %v3807_v47 = vpop.f32.mrf.mxu0  ;;  %v3809_v2 = vpop.f32.mrf.mxu1 }
 0x1f3   : > { %v1238_v49 = vpop.f32.mrf.mxu0  ;;  %v1463_v17 = vpop.f32.mrf.mxu1 }
 0x1f5   : > { %v3811_v9 = vpop.f32.mrf.mxu0  ;;  %v3813_v34 = vpop.f32.mrf.mxu1 }
 0x1f7   : > { %v1243_v15 = vpop.f32.mrf.mxu0  ;;  %v1468_v61 = vpop.f32.mrf.mxu1 }
 0x1f9   : > { %v3815_v26 = vpop.f32.mrf.mxu0  ;;  %v3817_v56 = vpop.f32.mrf.mxu1 }
 0x1fb   : > { %v1248_v4 = vpop.f32.mrf.mxu0  ;;  %v1473_v8 = vpop.f32.mrf.mxu1 }
 0x1fc   : > { %v1197_v8 = vadd.f32 %v1196_v0, %v3668_v28 }
 0x1fd   : > { %v3819_v36 = vpop.f32.mrf.mxu0  ;;  %v3821_v31 = vpop.f32.mrf.mxu1 }
 0x1fe   : > { %4182 = vst [vmem:[#allocation10_spill] sm:$0xff] %v3821_v31  ;;  %v1422_v41 = vadd.f32 %v1421_v42, %v1197_v8 }
 0x1ff   : > { %v1253_v16 = vpop.f32.mrf.mxu0  ;;  %v1478_v55 = vpop.f32.mrf.mxu1 }
 0x201   : > { %v3823_v49 = vpop.f32.mrf.mxu0  ;;  %v3825_v17 = vpop.f32.mrf.mxu1 }
 0x203   : > { %v1258_v14 = vpop.f32.mrf.mxu0  ;;  %v1483_v15 = vpop.f32.mrf.mxu1 }
 0x204   : > { %v1207_v14 = vadd.f32 %v1206_v50, %v3684_v52  ;;  %v1427_v50 = vadd.f32 %v3785_v19, %v1202_v20  ;;  %v1212_v20 = vadd.f32 %v3789_v32, %v3692_v3 }
 0x205   : > { %v3827_v61 = vpop.f32.mrf.mxu0  ;;  %v3829_v33 = vpop.f32.mrf.mxu1 }
 0x207   : > { %v1263_v57 = vpop.f32.mrf.mxu0  ;;  %v1488_v4 = vpop.f32.mrf.mxu1 }
 0x208   : > { %v1432_v4 = vadd.f32 %v3787_v6, %v1207_v14 }
 0x209   : > { %v3832_v29 = vpop.f32.mrf.mxu0  ;;  %v3834_v31 = vpop.f32.mrf.mxu1 }
 0x20b   : > { %v1268_v16 = vpop.f32.mrf.mxu0  ;;  %v1493_v55 = vpop.f32.mrf.mxu1 }
 0x20d   : > { %v2186_v28 = vpop.f32.mrf.mxu0  ;;  %v2210_v57 = vpop.f32.mrf.mxu1 }
 0x20e   : > { %v1567_v0 = vadd.f32 %v2186_v28, %v3738_v44  ;;  %v3846_v15 = vadd.f32 %v2210_v57, %v1422_v41  ;;  %v1217_v44 = vadd.f32 %v1216_v11, %v3700_v27 }
 0x20f   : > { %v1561_v42 = vpop.f32.mrf.mxu0  ;;  %v1641_v40 = vpop.f32.mrf.mxu1 }
 0x210   : > { %1721 = vst [vmem:[%s3843_s20 + $0x8] sm:$0xff] %v1567_v0  ;;  %1737 = vst [vmem:[%s3843_s20 + $0x88] sm:$0xff] %v3846_v15  ;;  %v1562_v52 = vadd.f32 %v1561_v42, %v3735_v7  ;;  %v3853_v18 = vadd.f32 %v1641_v40, %v3783_v37  ;;  %v1790_v16 = vmul.f32 %v1567_v0, %v1567_v0 }
 0x211   : > { %v2189_v41 = vpop.f32.mrf.mxu0  ;;  %v2213_v8 = vpop.f32.mrf.mxu1  ;;  %v1442_v57 = vadd.f32 %v3793_v38, %v1217_v44  ;;  %v1437_v40 = vadd.f32 %v3791_v54, %v1212_v20  ;;  %v1222_v38 = vadd.f32 %v3795_v22, %v3708_v51 }
 0x212   : > { %1720 = vst [vmem:[%s3843_s20] sm:$0xff] %v1562_v52  ;;  %v1752_v55 = vadd.f32 %v1567_v0, %v1562_v52  ;;  %v1789_v28 = vmul.f32 %v1562_v52, %v1562_v52  ;;  %1736 = vst [vmem:[%s3843_s20 + $0x80] sm:$0xff] %v3853_v18  ;;  %v1577_v7 = vadd.f32 %v2189_v41, %v3744_v25 }
 0x213   : > { %v3864_v37 = vadd.f32 %v2213_v8, %v1432_v4  ;;  %v1571_v19 = vpop.f32.mrf.mxu0  ;;  %v1651_v27 = vpop.f32.mrf.mxu1  ;;  %v1227_v0 = vadd.f32 %v3799_v35, %v3716_v45 }
 0x214   : > { %v1821_v6 = vadd.f32 %v1790_v16, %v1789_v28  ;;  %1723 = vst [vmem:[%s3843_s20 + $0x18] sm:$0xff] %v1577_v7  ;;  %v1572_v11 = vadd.f32 %v1571_v19, %v3741_v12  ;;  %v3868_v14 = vadd.f32 %v1651_v27, %v1427_v50  ;;  %v1792_v50 = vmul.f32 %v1577_v7, %v1577_v7 }
 0x215   : > { %1739 = vst [vmem:[%s3843_s20 + $0x98] sm:$0xff] %v3864_v37  ;;  %v2192_v3 = vpop.f32.mrf.mxu0  ;;  %v2216_v25 = vpop.f32.mrf.mxu1  ;;  %v1452_v8 = vadd.f32 %v3801_v59, %v1227_v0  ;;  %v1232_v59 = vadd.f32 %v3803_v43, %v3718_v24 }
 0x216   : > { %1722 = vst [vmem:[%s3843_s20 + $0x10] sm:$0xff] %v1572_v11  ;;  %v1753_v32 = vadd.f32 %v1752_v55, %v1572_v11  ;;  %v1791_v42 = vmul.f32 %v1572_v11, %v1572_v11  ;;  %1738 = vst [vmem:[%s3843_s20 + $0x90] sm:$0xff] %v3868_v14  ;;  %v1587_v12 = vadd.f32 %v2192_v3, %v3750_v53 }
 0x217   : > { %v3882_v45 = vadd.f32 %v2216_v25, %v1442_v57  ;;  %v1581_v35 = vpop.f32.mrf.mxu0  ;;  %v1661_v52 = vpop.f32.mrf.mxu1  ;;  %v1237_v53 = vadd.f32 %v3807_v47, %v3720_v5 }
 0x218   : > { %v1822_v4 = vadd.f32 %v1821_v6, %v1791_v42  ;;  %1725 = vst [vmem:[%s3843_s20 + $0x28] sm:$0xff] %v1587_v12  ;;  %v1582_v44 = vadd.f32 %v1581_v35, %v3747_v46  ;;  %v1754_v41 = vadd.f32 %v1753_v32, %v1577_v7  ;;  %v3891_v54 = vadd.f32 %v1661_v52, %v1437_v40 }
 0x219   : > { %1741 = vst [vmem:[%s3843_s20 + $0xa8] sm:$0xff] %v3882_v45  ;;  %v2195_v51 = vpop.f32.mrf.mxu0  ;;  %v2219_v22 = vpop.f32.mrf.mxu1  ;;  %v1447_v7 = vadd.f32 %v3797_v48, %v1222_v38  ;;  %v1794_v19 = vmul.f32 %v1587_v12, %v1587_v12  ;;  %v1247_v48 = vadd.f32 %v3815_v26, %v3724_v58  ;;  %v1457_v32 = vadd.f32 %v3805_v60, %v1232_v59 }
 0x21a   : > { %1724 = vst [vmem:[%s3843_s20 + $0x20] sm:$0xff] %v1582_v44  ;;  %v1755_v16 = vadd.f32 %v1754_v41, %v1582_v44  ;;  %v1793_v55 = vmul.f32 %v1582_v44, %v1582_v44  ;;  %v1823_v28 = vadd.f32 %v1822_v4, %v1792_v50  ;;  %v1597_v46 = vadd.f32 %v2195_v51, %v3756_v21 }
 0x21b   : > { %1740 = vst [vmem:[%s3843_s20 + $0xa0] sm:$0xff] %v3891_v54  ;;  %v3900_v5 = vadd.f32 %v2219_v22, %v1452_v8  ;;  %v1591_v47 = vpop.f32.mrf.mxu0  ;;  %v1671_v20 = vpop.f32.mrf.mxu1  ;;  %v1462_v21 = vadd.f32 %v3809_v2, %v1237_v53  ;;  %v1242_v2 = vadd.f32 %v3811_v9, %v3722_v1  ;;  %v1257_v60 = vadd.f32 %v3823_v49, %v3728_v30 }
 0x21c   : > { %v1824_v27 = vadd.f32 %v1823_v28, %v1793_v55  ;;  %1727 = vst [vmem:[%s3843_s20 + $0x38] sm:$0xff] %v1597_v46  ;;  %v1592_v6 = vadd.f32 %v1591_v47, %v3753_v39  ;;  %v1756_v11 = vadd.f32 %v1755_v16, %v1587_v12  ;;  %v3909_v24 = vadd.f32 %v1671_v20, %v1447_v7  ;;  %v4184_v47 = vld [vmem:[#allocation7_spill] sm:$0xff]  ;;  %v4185_v20 = vld [vmem:[#allocation10_spill] sm:$0xff] }
 0x21d   : > { %1743 = vst [vmem:[%s3843_s20 + $0xb8] sm:$0xff] %v3900_v5  ;;  %v2198_v43 = vpop.f32.mrf.mxu0  ;;  %v2222_v57 = vpop.f32.mrf.mxu1  ;;  %v1796_v12 = vmul.f32 %v1597_v46, %v1597_v46  ;;  %v1467_v41 = vadd.f32 %v3813_v34, %v1242_v2  ;;  %v4183_v34 = vld [vmem:[#allocation6_spill] sm:$0xff] }
 0x21e   : > { %1726 = vst [vmem:[%s3843_s20 + $0x30] sm:$0xff] %v1592_v6  ;;  %v1757_v0 = vadd.f32 %v1756_v11, %v1592_v6  ;;  %v1795_v3 = vmul.f32 %v1592_v6, %v1592_v6  ;;  %v1825_v25 = vadd.f32 %v1824_v27, %v1794_v19  ;;  %v1607_v39 = vadd.f32 %v2198_v43, %v3762_v63  ;;  %v4187_v43 = vld [vmem:[#allocation4_spill] sm:$0xff] }
 0x21f   : > { %1742 = vst [vmem:[%s3843_s20 + $0xb0] sm:$0xff] %v3909_v24  ;;  %v3918_v58 = vadd.f32 %v2222_v57, %v1462_v21  ;;  %v1601_v26 = vpop.f32.mrf.mxu0  ;;  %v1681_v42 = vpop.f32.mrf.mxu1  ;;  %v1472_v63 = vadd.f32 %v3817_v56, %v1247_v48  ;;  %v1252_v56 = vadd.f32 %v3819_v36, %v3726_v10  ;;  %v1267_v55 = vadd.f32 %v3832_v29, %v4183_v34 }
 0x220   : > { %v1826_v40 = vadd.f32 %v1825_v25, %v1795_v3  ;;  %1729 = vst [vmem:[%s3843_s20 + $0x48] sm:$0xff] %v1607_v39  ;;  %v1602_v38 = vadd.f32 %v1601_v26, %v3759_v13  ;;  %v1758_v35 = vadd.f32 %v1757_v0, %v1597_v46  ;;  %v3927_v1 = vadd.f32 %v1681_v42, %v1457_v32  ;;  %v4188_v42 = vld [vmem:[#allocation8_spill] sm:$0xff] }
 0x221   : > { %1745 = vst [vmem:[%s3843_s20 + $0xc8] sm:$0xff] %v3918_v58  ;;  %v2201_v9 = vpop.f32.mrf.mxu0  ;;  %v2225_v52 = vpop.f32.mrf.mxu1  ;;  %v1798_v53 = vmul.f32 %v1607_v39, %v1607_v39  ;;  %v1477_v19 = vadd.f32 %v4185_v20, %v1252_v56  ;;  %v1492_v3 = vadd.f32 %v3834_v31, %v1267_v55  ;;  %v1807_v34 = vmul.f32 %v3868_v14, %v3868_v14 }
 0x222   : > { %1728 = vst [vmem:[%s3843_s20 + $0x40] sm:$0xff] %v1602_v38  ;;  %v1759_v50 = vadd.f32 %v1758_v35, %v1602_v38  ;;  %v1797_v4 = vmul.f32 %v1602_v38, %v1602_v38  ;;  %v1827_v44 = vadd.f32 %v1826_v40, %v1796_v12  ;;  %v1617_v13 = vadd.f32 %v2201_v9, %v3768_v23  ;;  %v4189_v9 = vld [vmem:[#allocation12_spill] sm:$0xff] }
 0x223   : > { %1744 = vst [vmem:[%s3843_s20 + $0xc0] sm:$0xff] %v3927_v1  ;;  %v3936_v30 = vadd.f32 %v2225_v52, %v1472_v63  ;;  %v1611_v49 = vpop.f32.mrf.mxu0  ;;  %v1691_v8 = vpop.f32.mrf.mxu1  ;;  %v1482_v23 = vadd.f32 %v3825_v17, %v1257_v60  ;;  %v4186_v17 = vld [vmem:[#allocation5_spill] sm:$0xff] }
 0x224   : > { %v1828_v51 = vadd.f32 %v1827_v44, %v1797_v4  ;;  %1731 = vst [vmem:[%s3843_s20 + $0x58] sm:$0xff] %v1617_v13  ;;  %v1612_v22 = vadd.f32 %v1611_v49, %v3765_v62  ;;  %v1760_v16 = vadd.f32 %v1759_v50, %v1607_v39  ;;  %v3945_v10 = vadd.f32 %v1691_v8, %v1467_v41 }
 0x225   : > { %1747 = vst [vmem:[%s3843_s20 + $0xd8] sm:$0xff] %v3936_v30  ;;  %v2204_v36 = vpop.f32.mrf.mxu0  ;;  %v2228_v28 = vpop.f32.mrf.mxu1  ;;  %v1262_v29 = vadd.f32 %v3827_v61, %v4186_v17  ;;  %v1800_v21 = vmul.f32 %v1617_v13, %v1617_v13  ;;  %v1805_v8 = vmul.f32 %v3853_v18, %v3853_v18 }
 0x226   : > { %1730 = vst [vmem:[%s3843_s20 + $0x50] sm:$0xff] %v1612_v22  ;;  %v1761_v46 = vadd.f32 %v1760_v16, %v1612_v22  ;;  %v1799_v7 = vmul.f32 %v1612_v22, %v1612_v22  ;;  %v1829_v59 = vadd.f32 %v1828_v51, %v1798_v53  ;;  %v1627_v62 = vadd.f32 %v2204_v36, %v4184_v47 }
 0x227   : > { %1746 = vst [vmem:[%s3843_s20 + $0xd0] sm:$0xff] %v3945_v10  ;;  %v3954_v27 = vadd.f32 %v2228_v28, %v1482_v23  ;;  %v1621_v6 = vpop.f32.mrf.mxu0  ;;  %v1701_v11 = vpop.f32.mrf.mxu1  ;;  %v1487_v40 = vadd.f32 %v3829_v33, %v1262_v29  ;;  %v1806_v22 = vmul.f32 %v3846_v15, %v3846_v15  ;;  %v1808_v28 = vmul.f32 %v3864_v37, %v3864_v37 }
 0x228   : > { %v1830_v48 = vadd.f32 %v1829_v59, %v1799_v7  ;;  %1733 = vst [vmem:[%s3843_s20 + $0x68] sm:$0xff] %v1627_v62  ;;  %v1622_v57 = vadd.f32 %v1621_v6, %v4187_v43  ;;  %v1762_v0 = vadd.f32 %v1761_v46, %v1617_v13  ;;  %v3961_v25 = vadd.f32 %v1701_v11, %v1477_v19 }
 0x229   : > { %1749 = vst [vmem:[%s3843_s20 + $0xe8] sm:$0xff] %v3954_v27  ;;  %v2207_v61 = vpop.f32.mrf.mxu0  ;;  %v2231_v39 = vpop.f32.mrf.mxu1  ;;  %v1802_v63 = vmul.f32 %v1627_v62, %v1627_v62 }
 0x22a   : > { %1732 = vst [vmem:[%s3843_s20 + $0x60] sm:$0xff] %v1622_v57  ;;  %v1763_v32 = vadd.f32 %v1762_v0, %v1622_v57  ;;  %v1801_v2 = vmul.f32 %v1622_v57, %v1622_v57  ;;  %v1831_v26 = vadd.f32 %v1830_v48, %v1800_v21  ;;  %v1637_v12 = vadd.f32 %v2207_v61, %v4188_v42 }
 0x22b   : > { %1748 = vst [vmem:[%s3843_s20 + $0xe0] sm:$0xff] %v3961_v25  ;;  %v3968_v31 = vadd.f32 %v2231_v39, %v1492_v3  ;;  %v1631_v38 = vpop.f32.mrf.mxu0  ;;  %v1711_v35 = vpop.f32.mrf.mxu1 }
 0x22c   : > { %v1832_v60 = vadd.f32 %v1831_v26, %v1801_v2  ;;  %1735 = vst [vmem:[%s3843_s20 + $0x78] sm:$0xff] %v1637_v12  ;;  %v1632_v52 = vadd.f32 %v1631_v38, %v4189_v9  ;;  %v1764_v50 = vadd.f32 %v1763_v32, %v1627_v62  ;;  %v1712_v4 = vadd.f32 %v1711_v35, %v1487_v40 }
 0x22d   : > { %1751 = vst [vmem:[%s3843_s20 + $0xf8] sm:$0xff] %v3968_v31  ;;  %v1804_v41 = vmul.f32 %v1637_v12, %v1637_v12 }
 0x22e   : > { %1734 = vst [vmem:[%s3843_s20 + $0x70] sm:$0xff] %v1632_v52  ;;  %v1765_v44 = vadd.f32 %v1764_v50, %v1632_v52  ;;  %v1803_v13 = vmul.f32 %v1632_v52, %v1632_v52  ;;  %v1833_v33 = vadd.f32 %v1832_v60, %v1802_v63  ;;  %1750 = vst [vmem:[%s3843_s20 + $0xf0] sm:$0xff] %v1712_v4 }
 0x22f   : > { %v1819_v42 = vmul.f32 %v1712_v4, %v1712_v4 }
 0x230   : > { %v1766_v56 = vadd.f32 %v1765_v44, %v1637_v12  ;;  %v1834_v49 = vadd.f32 %v1833_v33, %v1803_v13 }
 0x232   : > { %v1767_v53 = vadd.f32 %v1766_v56, %v3853_v18  ;;  %v1835_v51 = vadd.f32 %v1834_v49, %v1804_v41  ;;  %v1809_v18 = vmul.f32 %v3891_v54, %v3891_v54 }
 0x234   : > { %v1768_v16 = vadd.f32 %v1767_v53, %v3846_v15  ;;  %v1836_v23 = vadd.f32 %v1835_v51, %v1805_v8  ;;  %v1810_v15 = vmul.f32 %v3882_v45, %v3882_v45 }
 0x236   : > { %v1769_v55 = vadd.f32 %v1768_v16, %v3868_v14  ;;  %v1837_v36 = vadd.f32 %v1836_v23, %v1806_v22  ;;  %v1811_v14 = vmul.f32 %v3909_v24, %v3909_v24 }
 0x238   : > { %v1770_v46 = vadd.f32 %v1769_v55, %v3864_v37  ;;  %v1838_v7 = vadd.f32 %v1837_v36, %v1807_v34  ;;  %v1812_v37 = vmul.f32 %v3900_v5, %v3900_v5 }
 0x23a   : > { %v1771_v59 = vadd.f32 %v1770_v46, %v3891_v54  ;;  %v1839_v47 = vadd.f32 %v1838_v7, %v1808_v28  ;;  %v1813_v54 = vmul.f32 %v3927_v1, %v3927_v1 }
 0x23c   : > { %v1772_v62 = vadd.f32 %v1771_v59, %v3882_v45  ;;  %v1840_v20 = vadd.f32 %v1839_v47, %v1809_v18  ;;  %v1814_v45 = vmul.f32 %v3918_v58, %v3918_v58 }
 0x23e   : > { %v1841_v19 = vadd.f32 %v1840_v20, %v1810_v15  ;;  %v1773_v17 = vadd.f32 %v1772_v62, %v3909_v24  ;;  %v1815_v24 = vmul.f32 %v3945_v10, %v3945_v10 }
 0x240   : > { %v1774_v29 = vadd.f32 %v1773_v17, %v3900_v5  ;;  %v1842_v6 = vadd.f32 %v1841_v19, %v1811_v14  ;;  %v1816_v5 = vmul.f32 %v3936_v30, %v3936_v30 }
 0x242   : > { %v1775_v11 = vadd.f32 %v1774_v29, %v3927_v1  ;;  %v1843_v21 = vadd.f32 %v1842_v6, %v1812_v37  ;;  %v1817_v1 = vmul.f32 %v3961_v25, %v3961_v25 }
 0x244   : > { %v1776_v48 = vadd.f32 %v1775_v11, %v3918_v58  ;;  %v1844_v43 = vadd.f32 %v1843_v21, %v1813_v54  ;;  %v1818_v58 = vmul.f32 %v3954_v27, %v3954_v27 }
 0x246   : > { %v1777_v57 = vadd.f32 %v1776_v48, %v3945_v10  ;;  %v1845_v0 = vadd.f32 %v1844_v43, %v1814_v45 }
 0x248   : > { %v1778_v3 = vadd.f32 %v1777_v57, %v3936_v30  ;;  %v1846_v61 = vadd.f32 %v1845_v0, %v1815_v24  ;;  %v1820_v30 = vmul.f32 %v3968_v31, %v3968_v31 }
 0x24a   : > { %v1779_v39 = vadd.f32 %v1778_v3, %v3961_v25  ;;  %v1847_v32 = vadd.f32 %v1846_v61, %v1816_v5 }
 0x24c   : > { %v1780_v2 = vadd.f32 %v1779_v39, %v3954_v27  ;;  %v1848_v26 = vadd.f32 %v1847_v32, %v1817_v1 }
 0x24e   : > { %v1781_v10 = vadd.f32 %v1780_v2, %v1712_v4  ;;  %v1849_v12 = vadd.f32 %v1848_v26, %v1818_v58 }
 0x250   : > { %v1782_v40 = vadd.f32 %v1781_v10, %v3968_v31  ;;  %v1850_v38 = vadd.f32 %v1849_v12, %v1819_v42 }
 0x252   : > { %v1783_v35 = vrot.slane %v1782_v40, 4  ;;  %v1851_v63 = vadd.f32 %v1850_v38, %v1820_v30 }
 0x254   : > { %v1784_v25 = vadd.f32 %v1783_v35, %v1782_v40  ;;  %v1852_v60 = vrot.slane %v1851_v63, 4 }
 0x256   : > { %v1785_v9 = vrot.slane %v1784_v25, 2  ;;  %v1853_v52 = vadd.f32 %v1852_v60, %v1851_v63 }
 0x258   : > { %v1786_v50 = vadd.f32 %v1785_v9, %v1784_v25  ;;  %v1854_v44 = vrot.slane %v1853_v52, 2 }
 0x25a   : > { %v1787_v27 = vrot.slane %v1786_v50, 1  ;;  %v1855_v13 = vadd.f32 %v1854_v44, %v1853_v52 }
 0x25c   : > { %v1856_v33 = vrot.slane %v1855_v13, 1  ;;  %v1788_v4 = vadd.f32 %v1787_v27, %v1786_v50 }
 0x25e   : > { %v1857_v41 = vadd.f32 %v1856_v33, %v1855_v13 }
 0x260   : > { %v1858_v31 = vsel %vm245_vm0, %v1788_v4, %v1857_v41 }
 0x261   : > { %1859 = vst [vmem:[%s181_s23] sm:$0x3] %v1858_v31 }
 0x262 PF: > { %s14_s12 = sadd.s32 1, %s2279_s12  }
 0x263   : > { %p11_p4 = scmp.ge.s32.totalorder %s14_s12, 4  }
 0x265   :  { %13 = sbr.rel (!%p11_p4) target bundleno = 1 (0x1), region = 70 }

// kernel: double_conv.5
= control target key start
LH: loop header
LB: loop body
LE: loop exit
PB: predicated region body
PF: predicated region fallthrough
CT: control target
= control target key end

     0   :  { %s451_s12 = smov 0   ;;  %s610_s0 = inlined_call_operand.vmem [shape: f32[2,16,16,128], index: 0, kind: input, shape index: {}]   ;;  %s611_s1 = inlined_call_operand.vmem [shape: f32[1,128], index: 1, kind: input, shape index: {}]   ;;  %s612_s2 = inlined_call_operand.vmem [shape: f32[1,128], index: 2, kind: input, shape index: {}]   ;;  %s613_s3 = inlined_call_operand.vmem [shape: f32[2,16,16,128], index: 3, kind: output, shape index: {}]  }
   0x1 LB: > { %s400_s13 = sadd.s32 4294967295, %s429_s12   ;;  %p404_p0 = scmp.ge.s32.totalorder %s429_s12, 1  ;;  %s429_s12 = sphi %s451_s12, %s13_s12  }
   0x2   : > { %p137_p1 = scmp.lt.s32.totalorder %s429_s12, 3 }
   0x4   : > { %p138_p2 = pnand %p404_p0, %p137_p1 }
   0x5   : > { %p161_p3 = scmp.lt.s32.totalorder (!%p138_p2), %s400_s13, 1 }
   0x6   : > { %141 = sbr.rel (%p138_p2) target bundleno = 44 (0x2c), region = 32 }
   0xb   : > { %s615_s13 = smov (!%p161_p3, %s400_s13), 1  ;;  %v462_v0 = vld [vmem:[%s611_s1] ss:$0 sm:$0xff] }
   0xc   : > { %s413_s14 = sshll.u32 %s615_s13, 8  ;;  %v472_v1 = vld [vmem:[%s612_s2] ss:$0 sm:$0xff] }
   0xd   : > { %s467_s19 = scalar_lea.vmem %s610_s0, %s413_s14  ;;  %s495_s24 = scalar_lea.vmem %s613_s3, %s413_s14 }
   0xe   : > { %v171_v2 = vld [vmem:[%s467_s19] sm:$0xff]  ;;  %v172_v3 = vld [vmem:[%s467_s19 + $0x8] sm:$0xff]  ;;  %v173_v4 = vld [vmem:[%s467_s19 + $0x10] sm:$0xff] }
   0xf   : > { %v210_v5 = vmul.f32 %v462_v0, %v171_v2  ;;  %v211_v6 = vmul.f32 %v462_v0, %v172_v3  ;;  %v212_v7 = vmul.f32 %v462_v0, %v173_v4  ;;  %v174_v8 = vld [vmem:[%s467_s19 + $0x18] sm:$0xff]  ;;  %v175_v9 = vld [vmem:[%s467_s19 + $0x20] sm:$0xff]  ;;  %v176_v10 = vld [vmem:[%s467_s19 + $0x28] sm:$0xff] }
  0x10   : > { %v213_v11 = vmul.f32 %v462_v0, %v174_v8  ;;  %v214_v12 = vmul.f32 %v462_v0, %v175_v9  ;;  %v215_v13 = vmul.f32 %v462_v0, %v176_v10  ;;  %v177_v14 = vld [vmem:[%s467_s19 + $0x30] sm:$0xff]  ;;  %v178_v15 = vld [vmem:[%s467_s19 + $0x38] sm:$0xff]  ;;  %v179_v24 = vld [vmem:[%s467_s19 + $0x40] sm:$0xff] }
  0x11   : > { %v249_v16 = vadd.f32 %v472_v1, %v210_v5  ;;  %v250_v17 = vadd.f32 %v472_v1, %v211_v6  ;;  %v251_v18 = vadd.f32 %v472_v1, %v212_v7  ;;  %v216_v19 = vmul.f32 %v462_v0, %v177_v14  ;;  %v180_v25 = vld [vmem:[%s467_s19 + $0x48] sm:$0xff]  ;;  %v181_v26 = vld [vmem:[%s467_s19 + $0x50] sm:$0xff]  ;;  %v182_v31 = vld [vmem:[%s467_s19 + $0x58] sm:$0xff] }
  0x12   : > { %v252_v20 = vadd.f32 %v472_v1, %v213_v11  ;;  %v253_v21 = vadd.f32 %v472_v1, %v214_v12  ;;  %v254_v22 = vadd.f32 %v472_v1, %v215_v13  ;;  %v217_v23 = vmul.f32 %v462_v0, %v178_v15  ;;  %v183_v32 = vld [vmem:[%s467_s19 + $0x60] sm:$0xff]  ;;  %v184_v33 = vld [vmem:[%s467_s19 + $0x68] sm:$0xff]  ;;  %v185_v38 = vld [vmem:[%s467_s19 + $0x70] sm:$0xff] }
  0x13   : > { %v281_v27 = vmax.f32 %v249_v16, 0.0  ;;  %v282_v28 = vmax.f32 %v250_v17, 0.0  ;;  %v283_v29 = vmax.f32 %v251_v18, 0.0  ;;  %v255_v30 = vadd.f32 %v472_v1, %v216_v19  ;;  %v186_v43 = vld [vmem:[%s467_s19 + $0x78] sm:$0xff]  ;;  %v187_v56 = vld [vmem:[%s467_s19 + $0x80] sm:$0xff]  ;;  %v188_v57 = vld [vmem:[%s467_s19 + $0x88] sm:$0xff] }
  0x14   : > { %v284_v34 = vmax.f32 %v252_v20, 0.0  ;;  %v285_v35 = vmax.f32 %v253_v21, 0.0  ;;  %v286_v36 = vmax.f32 %v254_v22, 0.0  ;;  %v256_v37 = vadd.f32 %v472_v1, %v217_v23  ;;  %v189_v58 = vld [vmem:[%s467_s19 + $0x90] sm:$0xff]  ;;  %v190_v63 = vld [vmem:[%s467_s19 + $0x98] sm:$0xff]  ;;  %v191_v2 = vld [vmem:[%s467_s19 + $0xa0] sm:$0xff] }
  0x15   : > { %313 = vst [vmem:[%s495_s24] sm:$0xff] %v281_v27  ;;  %314 = vst [vmem:[%s495_s24 + $0x8] sm:$0xff] %v282_v28  ;;  %v287_v39 = vmax.f32 %v255_v30, 0.0  ;;  %v218_v40 = vmul.f32 %v462_v0, %v179_v24  ;;  %v219_v41 = vmul.f32 %v462_v0, %v180_v25  ;;  %v220_v42 = vmul.f32 %v462_v0, %v181_v26  ;;  %v192_v3 = vld [vmem:[%s467_s19 + $0xa8] sm:$0xff]  ;;  %v193_v8 = vld [vmem:[%s467_s19 + $0xb0] sm:$0xff] }
  0x16   : > { %315 = vst [vmem:[%s495_s24 + $0x10] sm:$0xff] %v283_v29  ;;  %316 = vst [vmem:[%s495_s24 + $0x18] sm:$0xff] %v284_v34  ;;  %v288_v44 = vmax.f32 %v256_v37, 0.0  ;;  %v221_v45 = vmul.f32 %v462_v0, %v182_v31  ;;  %v222_v46 = vmul.f32 %v462_v0, %v183_v32  ;;  %v223_v47 = vmul.f32 %v462_v0, %v184_v33  ;;  %v194_v13 = vld [vmem:[%s467_s19 + $0xb8] sm:$0xff]  ;;  %v195_v26 = vld [vmem:[%s467_s19 + $0xc0] sm:$0xff] }
  0x17   : > { %317 = vst [vmem:[%s495_s24 + $0x20] sm:$0xff] %v285_v35  ;;  %318 = vst [vmem:[%s495_s24 + $0x28] sm:$0xff] %v286_v36  ;;  %v257_v48 = vadd.f32 %v472_v1, %v218_v40  ;;  %v258_v49 = vadd.f32 %v472_v1, %v219_v41  ;;  %v259_v50 = vadd.f32 %v472_v1, %v220_v42  ;;  %v196_v27 = vld [vmem:[%s467_s19 + $0xc8] sm:$0xff]  ;;  %v197_v28 = vld [vmem:[%s467_s19 + $0xd0] sm:$0xff] }
  0x18   : > { %319 = vst [vmem:[%s495_s24 + $0x30] sm:$0xff] %v287_v39  ;;  %v224_v51 = vmul.f32 %v462_v0, %v185_v38  ;;  %320 = vst [vmem:[%s495_s24 + $0x38] sm:$0xff] %v288_v44  ;;  %v260_v52 = vadd.f32 %v472_v1, %v221_v45  ;;  %v261_v53 = vadd.f32 %v472_v1, %v222_v46  ;;  %v198_v33 = vld [vmem:[%s467_s19 + $0xd8] sm:$0xff]  ;;  %v199_v34 = vld [vmem:[%s467_s19 + $0xe0] sm:$0xff] }
  0x19   : > { %v262_v54 = vadd.f32 %v472_v1, %v223_v47  ;;  %v225_v55 = vmul.f32 %v462_v0, %v186_v43  ;;  %v289_v59 = vmax.f32 %v257_v48, 0.0  ;;  %v290_v60 = vmax.f32 %v258_v49, 0.0  ;;  %v200_v35 = vld [vmem:[%s467_s19 + $0xe8] sm:$0xff]  ;;  %v201_v40 = vld [vmem:[%s467_s19 + $0xf0] sm:$0xff]  ;;  %v202_v45 = vld [vmem:[%s467_s19 + $0xf8] sm:$0xff] }
  0x1a   : > { %v291_v61 = vmax.f32 %v259_v50, 0.0  ;;  %v263_v62 = vadd.f32 %v472_v1, %v224_v51  ;;  %v292_v4 = vmax.f32 %v260_v52, 0.0  ;;  %v293_v5 = vmax.f32 %v261_v53, 0.0 }
  0x1b   : > { %v294_v6 = vmax.f32 %v262_v54, 0.0  ;;  %v264_v7 = vadd.f32 %v472_v1, %v225_v55  ;;  %321 = vst [vmem:[%s495_s24 + $0x40] sm:$0xff] %v289_v59  ;;  %322 = vst [vmem:[%s495_s24 + $0x48] sm:$0xff] %v290_v60  ;;  %v226_v10 = vmul.f32 %v462_v0, %v187_v56  ;;  %v227_v11 = vmul.f32 %v462_v0, %v188_v57 }
  0x1c   : > { %323 = vst [vmem:[%s495_s24 + $0x50] sm:$0xff] %v291_v61  ;;  %v295_v9 = vmax.f32 %v263_v62, 0.0  ;;  %v228_v12 = vmul.f32 %v462_v0, %v189_v58  ;;  %324 = vst [vmem:[%s495_s24 + $0x58] sm:$0xff] %v292_v4  ;;  %v229_v15 = vmul.f32 %v462_v0, %v190_v63  ;;  %v230_v16 = vmul.f32 %v462_v0, %v191_v2 }
  0x1d   : > { %325 = vst [vmem:[%s495_s24 + $0x60] sm:$0xff] %v293_v5  ;;  %326 = vst [vmem:[%s495_s24 + $0x68] sm:$0xff] %v294_v6  ;;  %v296_v14 = vmax.f32 %v264_v7, 0.0  ;;  %v231_v17 = vmul.f32 %v462_v0, %v192_v3  ;;  %v265_v18 = vadd.f32 %v472_v1, %v226_v10  ;;  %v266_v19 = vadd.f32 %v472_v1, %v227_v11 }
  0x1e   : > { %327 = vst [vmem:[%s495_s24 + $0x70] sm:$0xff] %v295_v9  ;;  %v267_v20 = vadd.f32 %v472_v1, %v228_v12  ;;  %v232_v21 = vmul.f32 %v462_v0, %v193_v8  ;;  %v268_v22 = vadd.f32 %v472_v1, %v229_v15  ;;  %v269_v23 = vadd.f32 %v472_v1, %v230_v16 }
  0x1f   : > { %328 = vst [vmem:[%s495_s24 + $0x78] sm:$0xff] %v296_v14  ;;  %v270_v24 = vadd.f32 %v472_v1, %v231_v17  ;;  %v233_v25 = vmul.f32 %v462_v0, %v194_v13  ;;  %v297_v29 = vmax.f32 %v265_v18, 0.0  ;;  %v298_v30 = vmax.f32 %v266_v19, 0.0 }
  0x20   : > { %v299_v31 = vmax.f32 %v267_v20, 0.0  ;;  %v271_v32 = vadd.f32 %v472_v1, %v232_v21  ;;  %v300_v36 = vmax.f32 %v268_v22, 0.0  ;;  %v301_v37 = vmax.f32 %v269_v23, 0.0 }
  0x21   : > { %v302_v38 = vmax.f32 %v270_v24, 0.0  ;;  %v272_v39 = vadd.f32 %v472_v1, %v233_v25  ;;  %329 = vst [vmem:[%s495_s24 + $0x80] sm:$0xff] %v297_v29  ;;  %330 = vst [vmem:[%s495_s24 + $0x88] sm:$0xff] %v298_v30  ;;  %v234_v42 = vmul.f32 %v462_v0, %v195_v26  ;;  %v235_v43 = vmul.f32 %v462_v0, %v196_v27 }
  0x22   : > { %331 = vst [vmem:[%s495_s24 + $0x90] sm:$0xff] %v299_v31  ;;  %v303_v41 = vmax.f32 %v271_v32, 0.0  ;;  %v236_v44 = vmul.f32 %v462_v0, %v197_v28  ;;  %332 = vst [vmem:[%s495_s24 + $0x98] sm:$0xff] %v300_v36  ;;  %v237_v47 = vmul.f32 %v462_v0, %v198_v33  ;;  %v238_v48 = vmul.f32 %v462_v0, %v199_v34 }
  0x23   : > { %333 = vst [vmem:[%s495_s24 + $0xa0] sm:$0xff] %v301_v37  ;;  %334 = vst [vmem:[%s495_s24 + $0xa8] sm:$0xff] %v302_v38  ;;  %v304_v46 = vmax.f32 %v272_v39, 0.0  ;;  %v239_v49 = vmul.f32 %v462_v0, %v200_v35  ;;  %v273_v50 = vadd.f32 %v472_v1, %v234_v42  ;;  %v274_v51 = vadd.f32 %v472_v1, %v235_v43 }
  0x24   : > { %335 = vst [vmem:[%s495_s24 + $0xb0] sm:$0xff] %v303_v41  ;;  %v275_v52 = vadd.f32 %v472_v1, %v236_v44  ;;  %v240_v53 = vmul.f32 %v462_v0, %v201_v40  ;;  %v276_v54 = vadd.f32 %v472_v1, %v237_v47  ;;  %v277_v55 = vadd.f32 %v472_v1, %v238_v48 }
  0x25   : > { %336 = vst [vmem:[%s495_s24 + $0xb8] sm:$0xff] %v304_v46  ;;  %v278_v56 = vadd.f32 %v472_v1, %v239_v49  ;;  %v241_v57 = vmul.f32 %v462_v0, %v202_v45  ;;  %v305_v58 = vmax.f32 %v273_v50, 0.0  ;;  %v306_v59 = vmax.f32 %v274_v51, 0.0 }
  0x26   : > { %v307_v60 = vmax.f32 %v275_v52, 0.0  ;;  %v279_v61 = vadd.f32 %v472_v1, %v240_v53  ;;  %v308_v62 = vmax.f32 %v276_v54, 0.0  ;;  %v309_v63 = vmax.f32 %v277_v55, 0.0 }
  0x27   : > { %v310_v2 = vmax.f32 %v278_v56, 0.0  ;;  %v280_v3 = vadd.f32 %v472_v1, %v241_v57  ;;  %337 = vst [vmem:[%s495_s24 + $0xc0] sm:$0xff] %v305_v58  ;;  %338 = vst [vmem:[%s495_s24 + $0xc8] sm:$0xff] %v306_v59 }
  0x28   : > { %339 = vst [vmem:[%s495_s24 + $0xd0] sm:$0xff] %v307_v60  ;;  %v311_v4 = vmax.f32 %v279_v61, 0.0  ;;  %340 = vst [vmem:[%s495_s24 + $0xd8] sm:$0xff] %v308_v62 }
  0x29   : > { %341 = vst [vmem:[%s495_s24 + $0xe0] sm:$0xff] %v309_v63  ;;  %342 = vst [vmem:[%s495_s24 + $0xe8] sm:$0xff] %v310_v2  ;;  %v312_v0 = vmax.f32 %v280_v3, 0.0 }
  0x2a   : > { %343 = vst [vmem:[%s495_s24 + $0xf0] sm:$0xff] %v311_v4 }
  0x2b   : > { %344 = vst [vmem:[%s495_s24 + $0xf8] sm:$0xff] %v312_v0 }
  0x2c PF: > { %s13_s12 = sadd.s32 1, %s429_s12  }
  0x2d   : > { %p10_p4 = scmp.ge.s32.totalorder %s13_s12, 4  }
  0x2f   :  { %12 = sbr.rel (!%p10_p4) target bundleno = 1 (0x1), region = 62 }

// kernel: double_conv.4
= control target key start
LH: loop header
LB: loop body
LE: loop exit
PB: predicated region body
PF: predicated region fallthrough
CT: control target
= control target key end

     0   :  { %s2478_s18 = smov 0   ;;  %s4333_s0 = inlined_call_operand.vmem [shape: f32[2,16,16,128], index: 0, kind: input, shape index: {}]   ;;  %s4334_s1 = inlined_call_operand.vmem [shape: f32[1,128], index: 1, kind: input, shape index: {}]   ;;  %s4335_s2 = inlined_call_operand.vmem [shape: f32[1,128], index: 2, kind: input, shape index: {}]   ;;  %s4336_s3 = inlined_call_operand.vmem [shape: f32[1152,128], index: 3, kind: input, shape index: {}]   ;;  %s4337_s4 = inlined_call_operand.vmem [shape: f32[2,16,16,128], index: 4, kind: output, shape index: {0}]   ;;  %s4338_s5 = inlined_call_operand.vmem [shape: f32[2,2,128], index: 5, kind: output, shape index: {1}]  }
   0x1 LB: > { %s2110_s19 = sadd.s32 4294967295, %s2445_s18   ;;  %p2114_p0 = scmp.ge.s32.totalorder %s2445_s18, 1  ;;  %s2445_s18 = sphi %s2478_s18, %s16_s18  }
   0x2   : > { %p190_p1 = scmp.lt.s32.totalorder %s2445_s18, 3 }
   0x4   : > { %p191_p2 = pnand %p2114_p0, %p190_p1 }
   0x6   : > { %194 = sbr.rel (%p191_p2) target bundleno = 610 (0x262), region = 36 }
   0xb   : > { %v630_v0 = vld [vmem:[%s4336_s3 + $0x78] sm:$0xff]  ;;  %v2447_v2 = vmov 0.0   ;;  %v629_v3 = vld [vmem:[%s4336_s3 + $0x70] sm:$0xff]  ;;  %v628_v5 = vld [vmem:[%s4336_s3 + $0x68] sm:$0xff]  ;;  %p222_p3 = scmp.lt.s32.totalorder %s2110_s19, 1  ;;  %vm409_vm0 = vcmask 1040384  }
   0xc   : > { %v662_v1 = vld [vmem:[%s4336_s3 + $0x178] sm:$0xff]  ;;  %759 = vmatprep.subr.mxu0 %v2447_v2  ;;  %984 = vmatprep.subr.mxu1 %v2447_v2  ;;  %v661_v4 = vld [vmem:[%s4336_s3 + $0x170] sm:$0xff]  ;;  %v660_v6 = vld [vmem:[%s4336_s3 + $0x168] sm:$0xff]  ;;  %vm505_vm2 = vcmask 1046528  }
   0xd   : > { %760 = vmatpush1.msra.mxu0 %v630_v0  ;;  %985 = vmatpush1.msra.mxu1 %v662_v1  ;;  %v627_v7 = vld [vmem:[%s4336_s3 + $0x60] sm:$0xff]  ;;  %v626_v9 = vld [vmem:[%s4336_s3 + $0x58] sm:$0xff]  ;;  %v625_v11 = vld [vmem:[%s4336_s3 + $0x50] sm:$0xff]  ;;  %s4498_s19 = smov (!%p222_p3, %s2110_s19), 1 }
   0xe   : > { %761 = vmatprep.subr.mxu0 %v2447_v2  ;;  %986 = vmatprep.subr.mxu1 %v2447_v2  ;;  %v659_v8 = vld [vmem:[%s4336_s3 + $0x160] sm:$0xff]  ;;  %v658_v10 = vld [vmem:[%s4336_s3 + $0x158] sm:$0xff]  ;;  %v657_v12 = vld [vmem:[%s4336_s3 + $0x150] sm:$0xff]  ;;  %s2268_s10 = sshll.u32 %s4498_s19, 8 }
   0xf   : > { %762 = vmatpush1.msra.mxu0 %v629_v3  ;;  %987 = vmatpush1.msra.mxu1 %v661_v4  ;;  %v624_v13 = vld [vmem:[%s4336_s3 + $0x48] sm:$0xff]  ;;  %v623_v15 = vld [vmem:[%s4336_s3 + $0x40] sm:$0xff]  ;;  %v622_v17 = vld [vmem:[%s4336_s3 + $0x38] sm:$0xff]  ;;  %s2675_s21 = scalar_lea.vmem %s4333_s0, %s2268_s10  ;;  %s4147_s6 = scalar_lea.vmem %s4337_s4, %s2268_s10 }
  0x10   : > { %763 = vmatprep.subr.mxu0 %v2447_v2  ;;  %988 = vmatprep.subr.mxu1 %v2447_v2  ;;  %v656_v14 = vld [vmem:[%s4336_s3 + $0x148] sm:$0xff]  ;;  %v655_v16 = vld [vmem:[%s4336_s3 + $0x140] sm:$0xff]  ;;  %v654_v18 = vld [vmem:[%s4336_s3 + $0x138] sm:$0xff]  ;;  %s2119_s10 = sshll.u32 %s4498_s19, 1 }
  0x11   : > { %764 = vmatpush1.msra.mxu0 %v628_v5  ;;  %989 = vmatpush1.msra.mxu1 %v660_v6  ;;  %v621_v19 = vld [vmem:[%s4336_s3 + $0x30] sm:$0xff]  ;;  %v620_v21 = vld [vmem:[%s4336_s3 + $0x28] sm:$0xff]  ;;  %v619_v23 = vld [vmem:[%s4336_s3 + $0x20] sm:$0xff]  ;;  %s235_s9 = scalar_lea.vmem %s4338_s5, %s2119_s10 }
  0x12   : > { %765 = vmatprep.subr.mxu0 %v2447_v2  ;;  %990 = vmatprep.subr.mxu1 %v2447_v2  ;;  %v653_v20 = vld [vmem:[%s4336_s3 + $0x130] sm:$0xff]  ;;  %v652_v22 = vld [vmem:[%s4336_s3 + $0x128] sm:$0xff]  ;;  %v651_v24 = vld [vmem:[%s4336_s3 + $0x120] sm:$0xff] }
  0x13   : > { %766 = vmatpush1.msra.mxu0 %v627_v7  ;;  %991 = vmatpush1.msra.mxu1 %v659_v8  ;;  %v618_v25 = vld [vmem:[%s4336_s3 + $0x18] sm:$0xff]  ;;  %v617_v27 = vld [vmem:[%s4336_s3 + $0x10] sm:$0xff]  ;;  %v616_v29 = vld [vmem:[%s4336_s3 + $0x8] sm:$0xff] }
  0x14   : > { %767 = vmatprep.subr.mxu0 %v2447_v2  ;;  %992 = vmatprep.subr.mxu1 %v2447_v2  ;;  %v650_v26 = vld [vmem:[%s4336_s3 + $0x118] sm:$0xff]  ;;  %v649_v28 = vld [vmem:[%s4336_s3 + $0x110] sm:$0xff]  ;;  %v648_v30 = vld [vmem:[%s4336_s3 + $0x108] sm:$0xff] }
  0x15   : > { %768 = vmatpush1.msra.mxu0 %v626_v9  ;;  %993 = vmatpush1.msra.mxu1 %v658_v10  ;;  %v615_v31 = vld [vmem:[%s4336_s3] sm:$0xff]  ;;  %v646_v33 = vld [vmem:[%s4336_s3 + $0xf8] sm:$0xff]  ;;  %v645_v35 = vld [vmem:[%s4336_s3 + $0xf0] sm:$0xff] }
  0x16   : > { %769 = vmatprep.subr.mxu0 %v2447_v2  ;;  %994 = vmatprep.subr.mxu1 %v2447_v2  ;;  %v647_v32 = vld [vmem:[%s4336_s3 + $0x100] sm:$0xff]  ;;  %v678_v34 = vld [vmem:[%s4336_s3 + $0x1f8] sm:$0xff]  ;;  %v677_v36 = vld [vmem:[%s4336_s3 + $0x1f0] sm:$0xff] }
  0x17   : > { %770 = vmatpush1.msra.mxu0 %v625_v11  ;;  %995 = vmatpush1.msra.mxu1 %v657_v12  ;;  %v644_v37 = vld [vmem:[%s4336_s3 + $0xe8] sm:$0xff]  ;;  %v643_v39 = vld [vmem:[%s4336_s3 + $0xe0] sm:$0xff]  ;;  %v642_v41 = vld [vmem:[%s4336_s3 + $0xd8] sm:$0xff] }
  0x18   : > { %771 = vmatprep.subr.mxu0 %v2447_v2  ;;  %996 = vmatprep.subr.mxu1 %v2447_v2  ;;  %v676_v38 = vld [vmem:[%s4336_s3 + $0x1e8] sm:$0xff]  ;;  %v675_v40 = vld [vmem:[%s4336_s3 + $0x1e0] sm:$0xff]  ;;  %v674_v42 = vld [vmem:[%s4336_s3 + $0x1d8] sm:$0xff] }
  0x19   : > { %772 = vmatpush1.msra.mxu0 %v624_v13  ;;  %997 = vmatpush1.msra.mxu1 %v656_v14  ;;  %v641_v43 = vld [vmem:[%s4336_s3 + $0xd0] sm:$0xff]  ;;  %v640_v45 = vld [vmem:[%s4336_s3 + $0xc8] sm:$0xff]  ;;  %v639_v49 = vld [vmem:[%s4336_s3 + $0xc0] sm:$0xff] }
  0x1a   : > { %773 = vmatprep.subr.mxu0 %v2447_v2  ;;  %998 = vmatprep.subr.mxu1 %v2447_v2  ;;  %v673_v44 = vld [vmem:[%s4336_s3 + $0x1d0] sm:$0xff]  ;;  %v672_v46 = vld [vmem:[%s4336_s3 + $0x1c8] sm:$0xff]  ;;  %v671_v51 = vld [vmem:[%s4336_s3 + $0x1c0] sm:$0xff] }
  0x1b   : > { %774 = vmatpush1.msra.mxu0 %v623_v15  ;;  %999 = vmatpush1.msra.mxu1 %v655_v16  ;;  %v253_v47 = vld [vmem:[%s2675_s21 + $0x88] sm:$0xff]  ;;  %v254_v48 = vld [vmem:[%s2675_s21 + $0x90] sm:$0xff]  ;;  %v2696_v52 = vld [vmem:[%s4334_s1] ss:$0 sm:$0xff] }
  0x1c   : > { %775 = vmatprep.subr.mxu0 %v2447_v2  ;;  %1000 = vmatprep.subr.mxu1 %v2447_v2  ;;  %v237_v50 = vld [vmem:[%s2675_s21 + $0x8] sm:$0xff]  ;;  %v255_v53 = vld [vmem:[%s2675_s21 + $0x98] sm:$0xff]  ;;  %v236_v54 = vld [vmem:[%s2675_s21] sm:$0xff]  ;;  %v292_v55 = vmul.f32 %v2696_v52, %v253_v47  ;;  %v293_v56 = vmul.f32 %v2696_v52, %v254_v48 }
  0x1d   : > { %776 = vmatpush1.msra.mxu0 %v622_v17  ;;  %1001 = vmatpush1.msra.mxu1 %v654_v18  ;;  %v638_v57 = vld [vmem:[%s4336_s3 + $0xb8] sm:$0xff]  ;;  %v2713_v59 = vld [vmem:[%s4335_s2] ss:$0 sm:$0xff]  ;;  %v276_v60 = vmul.f32 %v2696_v52, %v237_v50  ;;  %v294_v63 = vmul.f32 %v2696_v52, %v255_v53  ;;  %v637_v0 = vld [vmem:[%s4336_s3 + $0xb0] sm:$0xff]  ;;  %v275_v3 = vmul.f32 %v2696_v52, %v236_v54  ;;  %v2840_v54 = vrot.slane %v2447_v2, 7 }
  0x1e   : > { %777 = vmatprep.subr.mxu0 %v2447_v2  ;;  %1002 = vmatprep.subr.mxu1 %v2447_v2  ;;  %v670_v58 = vld [vmem:[%s4336_s3 + $0x1b8] sm:$0xff]  ;;  %v2717_v61 = vadd.f32 %v2713_v59, %v292_v55  ;;  %v2720_v62 = vadd.f32 %v2713_v59, %v293_v56  ;;  %v669_v1 = vld [vmem:[%s4336_s3 + $0x1b0] sm:$0xff]  ;;  %v636_v4 = vld [vmem:[%s4336_s3 + $0xa8] sm:$0xff]  ;;  %v2843_v55 = vrot.slane %v2447_v2, 1 }
  0x1f   : > { %778 = vmatpush1.msra.mxu0 %v621_v19  ;;  %1003 = vmatpush1.msra.mxu1 %v653_v20  ;;  %v256_v5 = vld [vmem:[%s2675_s21 + $0xa0] sm:$0xff]  ;;  %v668_v6 = vld [vmem:[%s4336_s3 + $0x1a8] sm:$0xff]  ;;  %v238_v7 = vld [vmem:[%s2675_s21 + $0x10] sm:$0xff]  ;;  %v315_v10 = vadd.f32 %v2713_v59, %v276_v60  ;;  %v2748_v11 = vadd.f32 %v2713_v59, %v294_v63  ;;  %v314_v15 = vadd.f32 %v2713_v59, %v275_v3 }
  0x20   : > { %779 = vmatprep.subr.mxu0 %v2447_v2  ;;  %1004 = vmatprep.subr.mxu1 %v2447_v2  ;;  %v257_v8 = vld [vmem:[%s2675_s21 + $0xa8] sm:$0xff]  ;;  %v635_v9 = vld [vmem:[%s4336_s3 + $0xa0] sm:$0xff]  ;;  %v258_v12 = vld [vmem:[%s2675_s21 + $0xb0] sm:$0xff]  ;;  %v295_v17 = vmul.f32 %v2696_v52, %v256_v5  ;;  %v277_v19 = vmul.f32 %v2696_v52, %v238_v7  ;;  %4409 = vst [vmem:[#allocation2_spill] sm:$0xff] %v2840_v54 }
  0x21   : > { %780 = vmatpush1.msra.mxu0 %v620_v21  ;;  %1005 = vmatpush1.msra.mxu1 %v652_v22  ;;  %v259_v13 = vld [vmem:[%s2675_s21 + $0xb8] sm:$0xff]  ;;  %v667_v14 = vld [vmem:[%s4336_s3 + $0x1a0] sm:$0xff]  ;;  %v296_v20 = vmul.f32 %v2696_v52, %v257_v8  ;;  %v261_v21 = vld [vmem:[%s2675_s21 + $0xc8] sm:$0xff]  ;;  %4410 = vst [vmem:[#allocation3_spill] sm:$0xff] %v2843_v55 }
  0x22   : > { %781 = vmatprep.subr.mxu0 %v2447_v2  ;;  %1006 = vmatprep.subr.mxu1 %v2447_v2  ;;  %v239_v16 = vld [vmem:[%s2675_s21 + $0x18] sm:$0xff]  ;;  %v260_v18 = vld [vmem:[%s2675_s21 + $0xc0] sm:$0xff]  ;;  %v262_v47 = vld [vmem:[%s2675_s21 + $0xd0] sm:$0xff] }
  0x23   : > { %782 = vmatpush1.msra.mxu0 %v619_v23  ;;  %1007 = vmatpush1.msra.mxu1 %v651_v24  ;;  %v634_v22 = vld [vmem:[%s4336_s3 + $0x98] sm:$0xff]  ;;  %v2773_v24 = vadd.f32 %v2713_v59, %v295_v17  ;;  %v663_v48 = vld [vmem:[%s4336_s3 + $0x180] sm:$0xff]  ;;  %vm2835_vm1 = vmneg %vm409_vm0 }
  0x24   : > { %783 = vmatprep.subr.mxu0 %v2447_v2  ;;  %1008 = vmatprep.subr.mxu1 %v2447_v2  ;;  %v666_v23 = vld [vmem:[%s4336_s3 + $0x198] sm:$0xff] }
  0x25   : > { %784 = vmatpush1.msra.mxu0 %v618_v25  ;;  %1009 = vmatpush1.msra.mxu1 %v650_v26  ;;  %v297_v25 = vmul.f32 %v2696_v52, %v258_v12  ;;  %v298_v26 = vmul.f32 %v2696_v52, %v259_v13  ;;  %v263_v50 = vld [vmem:[%s2675_s21 + $0xd8] sm:$0xff] }
  0x26   : > { %785 = vmatprep.subr.mxu0 %v2447_v2  ;;  %1010 = vmatprep.subr.mxu1 %v2447_v2 }
  0x27   : > { %786 = vmatpush1.msra.mxu0 %v617_v27  ;;  %1011 = vmatpush1.msra.mxu1 %v649_v28  ;;  %v2777_v27 = vmax.f32 %v315_v10, 0.0  ;;  %v278_v28 = vmul.f32 %v2696_v52, %v239_v16  ;;  %v267_v10 = vld [vmem:[%s2675_s21 + $0xf8] sm:$0xff] }
  0x28   : > { %787 = vmatprep.subr.mxu0 %v2447_v2  ;;  %1012 = vmatprep.subr.mxu1 %v2447_v2 }
  0x29   : > { %788 = vmatpush1.msra.mxu0 %v616_v29  ;;  %1013 = vmatpush1.msra.mxu1 %v648_v30  ;;  %v2781_v29 = vadd.f32 %v2713_v59, %v296_v20  ;;  %v299_v30 = vmul.f32 %v2696_v52, %v260_v18 }
  0x2a   : > { %789 = vmatprep.subr.mxu0 %v2447_v2  ;;  %1014 = vmatprep.subr.mxu1 %v2447_v2 }
  0x2b   : > { %790 = vmatpush1.msra.mxu0 %v615_v31  ;;  %1015 = vmatpush1.msra.mxu1 %v647_v32  ;;  %v633_v31 = vld [vmem:[%s4336_s3 + $0x90] sm:$0xff] }
  0x2c   : > { %791 = vmatprep.subr.mxu0 %v2447_v2  ;;  %1016 = vmatprep.subr.mxu1 %v2447_v2  ;;  %v665_v32 = vld [vmem:[%s4336_s3 + $0x190] sm:$0xff] }
  0x2d   : > { %792 = vmatpush2.msra.mxu0 %v646_v33  ;;  %1017 = vmatpush2.msra.mxu1 %v678_v34  ;;  %v2792_v33 = vmax.f32 %v314_v15, 0.0  ;;  %v2795_v34 = vadd.f32 %v2713_v59, %v297_v25  ;;  %v2887_v15 = vrot.slane %v2777_v27, 1  ;;  %v306_v25 = vmul.f32 %v2696_v52, %v267_v10 }
  0x2e   : > { %793 = vmatprep.subr.mxu0 %v2447_v2  ;;  %1018 = vmatprep.subr.mxu1 %v2447_v2 }
  0x2f   : > { %794 = vmatpush2.msra.mxu0 %v645_v35  ;;  %1019 = vmatpush2.msra.mxu1 %v677_v36  ;;  %v2798_v35 = vadd.f32 %v2713_v59, %v298_v26  ;;  %v300_v36 = vmul.f32 %v2696_v52, %v261_v21  ;;  %v508_v12 = vrot.slane %v2792_v33, 1  ;;  %v243_v26 = vld [vmem:[%s2675_s21 + $0x38] sm:$0xff] }
  0x30   : > { %795 = vmatprep.subr.mxu0 %v2447_v2  ;;  %1020 = vmatprep.subr.mxu1 %v2447_v2 }
  0x31   : > { %796 = vmatpush2.msra.mxu0 %v644_v37  ;;  %1021 = vmatpush2.msra.mxu1 %v676_v38  ;;  %v2802_v37 = vadd.f32 %v2713_v59, %v299_v30  ;;  %v632_v38 = vld [vmem:[%s4336_s3 + $0x88] sm:$0xff]  ;;  %v726_v30 = vld [vmem:[%s4336_s3 + $0x378] sm:$0xff] }
  0x32   : > { %797 = vmatprep.subr.mxu0 %v2447_v2  ;;  %1022 = vmatprep.subr.mxu1 %v2447_v2 }
  0x33   : > { %798 = vmatpush2.msra.mxu0 %v643_v39  ;;  %1023 = vmatpush2.msra.mxu1 %v675_v40  ;;  %v664_v39 = vld [vmem:[%s4336_s3 + $0x188] sm:$0xff]  ;;  %v316_v40 = vadd.f32 %v2713_v59, %v277_v19  ;;  %v693_v19 = vld [vmem:[%s4336_s3 + $0x270] sm:$0xff] }
  0x34   : > { %799 = vmatprep.subr.mxu0 %v2447_v2  ;;  %1024 = vmatprep.subr.mxu1 %v2447_v2 }
  0x35   : > { %800 = vmatpush2.msra.mxu0 %v642_v41  ;;  %1025 = vmatpush2.msra.mxu1 %v674_v42  ;;  %v240_v41 = vld [vmem:[%s2675_s21 + $0x20] sm:$0xff]  ;;  %v2850_v60 = vmax.f32 %v316_v40, 0.0 }
  0x36   : > { %801 = vmatprep.subr.mxu0 %v2447_v2  ;;  %1026 = vmatprep.subr.mxu1 %v2447_v2  ;;  %v631_v42 = vld [vmem:[%s4336_s3 + $0x80] sm:$0xff]  ;;  %v279_v56 = vmul.f32 %v2696_v52, %v240_v41  ;;  %v282_v41 = vmul.f32 %v2696_v52, %v243_v26  ;;  %v688_v26 = vld [vmem:[%s4336_s3 + $0x248] sm:$0xff] }
  0x37   : > { %802 = vmatpush2.msra.mxu0 %v641_v43  ;;  %1027 = vmatpush2.msra.mxu1 %v673_v44  ;;  %v413_v43 = vrot.slane %v2777_v27, 7  ;;  %v317_v44 = vadd.f32 %v2713_v59, %v278_v28  ;;  %v2903_v20 = vrot.slane %v2850_v60, 7  ;;  %v692_v28 = vld [vmem:[%s4336_s3 + $0x268] sm:$0xff] }
  0x38   : > { %803 = vmatprep.subr.mxu0 %v2447_v2  ;;  %1028 = vmatprep.subr.mxu1 %v2447_v2  ;;  %v318_v13 = vadd.f32 %v2713_v59, %v279_v56  ;;  %v245_v56 = vld [vmem:[%s2675_s21 + $0x48] sm:$0xff] }
  0x39   : > { %804 = vmatpush2.msra.mxu0 %v640_v45  ;;  %1029 = vmatpush2.msra.mxu1 %v672_v46  ;;  %v241_v45 = vld [vmem:[%s2675_s21 + $0x28] sm:$0xff]  ;;  %v2821_v46 = vadd.f32 %v2713_v59, %v300_v36  ;;  %v2859_v3 = vmax.f32 %v317_v44, 0.0 }
  0x3a   : > { %805 = vmatprep.subr.mxu0 %v2447_v2  ;;  %1030 = vmatprep.subr.mxu1 %v2447_v2  ;;  %v280_v63 = vmul.f32 %v2696_v52, %v241_v45  ;;  %v2929_v36 = vmax.f32 %v318_v13, 0.0  ;;  %v511_v45 = vrot.slane %v2850_v60, 1 }
  0x3b   : > { %806 = vmatpush2.msra.mxu0 %v639_v49  ;;  %1031 = vmatpush2.msra.mxu1 %v671_v51  ;;  %v2830_v49 = vrot.slane %v2792_v33, 7  ;;  %v264_v51 = vld [vmem:[%s2675_s21 + $0xe0] sm:$0xff]  ;;  %v416_v21 = vrot.slane %v2859_v3, 7 }
  0x3c   : > { %807 = vmatprep.subr.mxu0 %v2447_v2  ;;  %1032 = vmatprep.subr.mxu1 %v2447_v2  ;;  %v303_v5 = vmul.f32 %v2696_v52, %v264_v51  ;;  %v2956_v44 = vrot.slane %v2929_v36, 7  ;;  %v244_v51 = vld [vmem:[%s2675_s21 + $0x40] sm:$0xff] }
  0x3d   : > { %808 = vmatpush2.msra.mxu0 %v638_v57  ;;  %1033 = vmatpush2.msra.mxu1 %v670_v58  ;;  %v265_v57 = vld [vmem:[%s2675_s21 + $0xe8] sm:$0xff]  ;;  %v266_v58 = vld [vmem:[%s2675_s21 + $0xf0] sm:$0xff] }
  0x3e   : > { %809 = vmatprep.subr.mxu0 %v2447_v2  ;;  %1034 = vmatprep.subr.mxu1 %v2447_v2  ;;  %v304_v8 = vmul.f32 %v2696_v52, %v265_v57  ;;  %v2890_v16 = vadd.f32 %v2713_v59, %v303_v5  ;;  %v690_v57 = vld [vmem:[%s4336_s3 + $0x258] sm:$0xff] }
  0x3f   : > { %810 = vmatpush2.msra.mxu0 %v637_v0  ;;  %1035 = vmatpush2.msra.mxu1 %v669_v1  ;;  %v301_v0 = vmul.f32 %v2696_v52, %v262_v47  ;;  %v2857_v1 = vsel %vm409_vm0, %v2830_v49, %v413_v43  ;;  %v725_v43 = vld [vmem:[%s4336_s3 + $0x370] sm:$0xff]  ;;  %v2960_v47 = vrot.slane %v2859_v3, 1 }
  0x40   : > { %811 = vmatprep.subr.mxu0 %v2447_v2  ;;  %1036 = vmatprep.subr.mxu1 %v2447_v2  ;;  %v2893_v17 = vadd.f32 %v2713_v59, %v304_v8  ;;  %v689_v8 = vld [vmem:[%s4336_s3 + $0x250] sm:$0xff] }
  0x41   : > { %812 = vmatpush2.msra.mxu0 %v636_v4  ;;  %1037 = vmatpush2.msra.mxu1 %v668_v6  ;;  %v302_v4 = vmul.f32 %v2696_v52, %v263_v50  ;;  %v694_v6 = vld [vmem:[%s4336_s3 + $0x278] sm:$0xff]  ;;  %v2870_v7 = vadd.f32 %v2713_v59, %v301_v0  ;;  %v321_v50 = vadd.f32 %v2713_v59, %v282_v41 }
  0x42   : > { %813 = vmatprep.subr.mxu0 %v2447_v2  ;;  %1038 = vmatprep.subr.mxu1 %v2447_v2 }
  0x43   : > { %814 = vmatpush2.msra.mxu0 %v635_v9  ;;  %1039 = vmatpush2.msra.mxu1 %v667_v14  ;;  %v305_v9 = vmul.f32 %v2696_v52, %v266_v58  ;;  %v2882_v14 = vadd.f32 %v2713_v59, %v302_v4  ;;  %v724_v58 = vld [vmem:[%s4336_s3 + $0x368] sm:$0xff]  ;;  %v2994_v5 = vmax.f32 %v321_v50, 0.0 }
  0x44   : > { %815 = vmatprep.subr.mxu0 %v2447_v2  ;;  %1040 = vmatprep.subr.mxu1 %v2447_v2 }
  0x45   : > { %816 = vmatpush2.msra.mxu0 %v634_v22  ;;  %1041 = vmatpush2.msra.mxu1 %v666_v23  ;;  %v2896_v18 = vadd.f32 %v2713_v59, %v305_v9  ;;  %v319_v22 = vadd.f32 %v2713_v59, %v280_v63  ;;  %v242_v23 = vld [vmem:[%s2675_s21 + $0x30] sm:$0xff]  ;;  %v2984_v63 = vsel %vm505_vm2, %v511_v45, %v2960_v47  ;;  %v723_v9 = vld [vmem:[%s4336_s3 + $0x360] sm:$0xff] }
  0x46   : > { %817 = vmatprep.subr.mxu0 %v2447_v2  ;;  %1042 = vmatprep.subr.mxu1 %v2447_v2 }
  0x47   : > { %818 = vmatpush2.msra.mxu0 %v633_v31  ;;  %1043 = vmatpush2.msra.mxu1 %v665_v32  ;;  %v2922_v31 = vadd.f32 %v2713_v59, %v306_v25  ;;  %v2927_v32 = vsel %vm505_vm2, %v508_v12, %v2887_v15  ;;  %v2940_v40 = vmax.f32 %v319_v22, 0.0  ;;  %v514_v12 = vrot.slane %v2929_v36, 1  ;;  %v247_v25 = vld [vmem:[%s2675_s21 + $0x58] sm:$0xff] }
  0x48   : > { %819 = vmatprep.subr.mxu0 %v2447_v2  ;;  %1044 = vmatprep.subr.mxu1 %v2447_v2  ;;  %v286_v45 = vmul.f32 %v2696_v52, %v247_v25 }
  0x49   : > { %820 = vmatpush2.msra.mxu0 %v632_v38  ;;  %1045 = vmatpush2.msra.mxu1 %v664_v39  ;;  %v281_v38 = vmul.f32 %v2696_v52, %v242_v23  ;;  %v2938_v39 = vsel %vm409_vm0, %v2903_v20, %v416_v21  ;;  %v3015_v13 = vrot.slane %v2940_v40, 1  ;;  %v422_v21 = vrot.slane %v2994_v5, 7  ;;  %v246_v23 = vld [vmem:[%s2675_s21 + $0x50] sm:$0xff] }
  0x4a   : > { %821 = vmatprep.subr.mxu0 %v2447_v2  ;;  %1046 = vmatprep.subr.mxu1 %v2447_v2  ;;  %v285_v41 = vmul.f32 %v2696_v52, %v246_v23 }
  0x4b   : > { %822 = vmatpush2.msra.mxu0 %v631_v42  ;;  %823 = vmatprep.mubr.f32.mxu0 %v2447_v2  ;;  %v691_v42 = vld [vmem:[%s4336_s3 + $0x260] sm:$0xff] }
  0x4c   : > { %1047 = vmatpush2.msra.mxu1 %v663_v48  ;;  %2155 = vmatprep.mubr.msk.f32.mxu1 %vm2835_vm1, %v2830_v49  ;;  %v320_v48 = vadd.f32 %v2713_v59, %v281_v38 }
  0x4d   : > { %2123 = vmatmul.mubr.msk.f32.vlgmr.msra.gmra.mxu0 %vm2835_vm1, %v2840_v54  ;;  %1049 = vmatmul.mubr.f32.vlgmr.msra.gmra.mxu1 %v2843_v55 }
  0x4e   : > { %1209 = vmatprep.subr.mxu0 %v2447_v2  ;;  %828 = vmatprep.mubr.f32.mxu0 %v2447_v2  ;;  %v2986_v0 = vmax.f32 %v320_v48, 0.0  ;;  %v687_v48 = vld [vmem:[%s4336_s3 + $0x240] sm:$0xff] }
  0x4f   : > { %1210 = vmatpush1.msra.mxu0 %v694_v6  ;;  %1053 = vmatprep.mubr.f32.mxu1 %v2857_v1  ;;  %v284_v6 = vmul.f32 %v2696_v52, %v245_v56  ;;  %v3070_v56 = vrot.slane %v2994_v5, 1 }
  0x50   : > { %1211 = vmatprep.subr.mxu0 %v2447_v2  ;;  %1434 = vmatprep.subr.mxu1 %v2447_v2  ;;  %v3011_v10 = vrot.slane %v2986_v0, 7 }
  0x51   : > { %829 = vmatmul.mubr.f32.gmra.mxu0 %v2840_v54  ;;  %2156 = vmatmul.mubr.msk.f32.gmra.mxu1 %vm505_vm2, %v2843_v55  ;;  %v323_v22 = vadd.f32 %v2713_v59, %v284_v6  ;;  %v248_v6 = vld [vmem:[%s2675_s21 + $0x60] sm:$0xff] }
  0x52   : > { %1212 = vmatpush1.msra.mxu0 %v693_v19  ;;  %833 = vmatprep.mubr.f32.mxu0 %v2792_v33  ;;  %v252_v54 = vld [vmem:[%s2675_s21 + $0x80] sm:$0xff] }
  0x53   : > { %2158 = vmatprep.mubr.msk.f32.mxu1 %vm2835_vm1, %v2903_v20  ;;  %1213 = vmatprep.subr.mxu0 %v2447_v2 }
  0x54   : > { %1214 = vmatpush1.msra.mxu0 %v692_v28  ;;  %1435 = vmatpush1.msra.mxu1 %v726_v30  ;;  %v722_v28 = vld [vmem:[%s4336_s3 + $0x358] sm:$0xff]  ;;  %v3039_v30 = vsel %vm505_vm2, %v514_v12, %v3015_v13  ;;  %v720_v12 = vld [vmem:[%s4336_s3 + $0x348] sm:$0xff] }
  0x55   : > { %2125 = vmatmul.mubr.msk.f32.gmra.mxu0 %vm2835_vm1, %v2830_v49  ;;  %1059 = vmatmul.mubr.f32.gmra.mxu1 %v2927_v32  ;;  %v419_v49 = vrot.slane %v2940_v40, 7 }
  0x56   : > { %838 = vmatprep.mubr.f32.mxu0 %v2777_v27  ;;  %1063 = vmatprep.mubr.f32.mxu1 %v2938_v39 }
  0x57   : > { %1215 = vmatprep.subr.mxu0 %v2447_v2  ;;  %1436 = vmatprep.subr.mxu1 %v2447_v2  ;;  %v2992_v4 = vsel %vm409_vm0, %v2956_v44, %v419_v49  ;;  %v721_v49 = vld [vmem:[%s4336_s3 + $0x350] sm:$0xff] }
  0x58   : > { %1216 = vmatpush1.msra.mxu0 %v691_v42  ;;  %1437 = vmatpush1.msra.mxu1 %v725_v43  ;;  %v3047_v42 = vsel %vm409_vm0, %v3011_v10, %v422_v21  ;;  %v3049_v43 = vmax.f32 %v323_v22, 0.0  ;;  %v287_v22 = vmul.f32 %v2696_v52, %v248_v6  ;;  %v251_v6 = vld [vmem:[%s2675_s21 + $0x78] sm:$0xff] }
  0x59   : > { %839 = vmatmul.mubr.f32.gmra.mxu0 %v2857_v1  ;;  %2159 = vmatmul.mubr.msk.f32.gmra.mxu1 %vm505_vm2, %v2887_v15  ;;  %v283_v1 = vmul.f32 %v2696_v52, %v244_v51  ;;  %v517_v51 = vrot.slane %v2986_v0, 1  ;;  %v290_v55 = vmul.f32 %v2696_v52, %v251_v6 }
  0x5a   : > { %843 = vmatprep.mubr.f32.mxu0 %v2850_v60  ;;  %2161 = vmatprep.mubr.msk.f32.mxu1 %vm2835_vm1, %v2956_v44 }
  0x5b   : > { %1217 = vmatprep.subr.mxu0 %v2447_v2  ;;  %1438 = vmatprep.subr.mxu1 %v2447_v2  ;;  %v322_v19 = vadd.f32 %v2713_v59, %v283_v1  ;;  %v325_v1 = vadd.f32 %v2713_v59, %v286_v45 }
  0x5c   : > { %1218 = vmatpush1.msra.mxu0 %v690_v57  ;;  %1439 = vmatpush1.msra.mxu1 %v724_v58  ;;  %v324_v57 = vadd.f32 %v2713_v59, %v285_v41  ;;  %v425_v58 = vrot.slane %v3049_v43, 7  ;;  %v719_v41 = vld [vmem:[%s4336_s3 + $0x340] sm:$0xff] }
  0x5d   : > { %2127 = vmatmul.mubr.msk.f32.gmra.mxu0 %vm2835_vm1, %v2903_v20  ;;  %1069 = vmatmul.mubr.f32.gmra.mxu1 %v2984_v63  ;;  %v3041_v38 = vmax.f32 %v322_v19, 0.0  ;;  %v3094_v19 = vsel %vm505_vm2, %v517_v51, %v3070_v56  ;;  %v3104_v25 = vmax.f32 %v325_v1, 0.0  ;;  %v326_v51 = vadd.f32 %v2713_v59, %v287_v22  ;;  %v250_v1 = vld [vmem:[%s2675_s21 + $0x70] sm:$0xff] }
  0x5e   : > { %848 = vmatprep.mubr.f32.mxu0 %v2859_v3  ;;  %1073 = vmatprep.mubr.f32.mxu1 %v2992_v4  ;;  %v3096_v21 = vmax.f32 %v324_v57, 0.0 }
  0x5f   : > { %1219 = vmatprep.subr.mxu0 %v2447_v2  ;;  %1440 = vmatprep.subr.mxu1 %v2447_v2  ;;  %v3066_v50 = vrot.slane %v3041_v38, 7  ;;  %v428_v57 = vrot.slane %v3104_v25, 7  ;;  %v3151_v22 = vmax.f32 %v326_v51, 0.0  ;;  %v717_v51 = vld [vmem:[%s4336_s3 + $0x330] sm:$0xff] }
  0x60   : > { %1220 = vmatpush1.msra.mxu0 %v689_v8  ;;  %1441 = vmatpush1.msra.mxu1 %v723_v9  ;;  %v249_v8 = vld [vmem:[%s2675_s21 + $0x68] sm:$0xff]  ;;  %v686_v9 = vld [vmem:[%s4336_s3 + $0x238] sm:$0xff]  ;;  %v3121_v45 = vrot.slane %v3096_v21, 7 }
  0x61   : > { %849 = vmatmul.mubr.f32.gmra.mxu0 %v2938_v39  ;;  %2162 = vmatmul.mubr.msk.f32.gmra.mxu1 %vm505_vm2, %v2960_v47  ;;  %v3102_v23 = vsel %vm409_vm0, %v3066_v50, %v425_v58 }
  0x62   : > { %853 = vmatprep.mubr.f32.mxu0 %v2929_v36  ;;  %2164 = vmatprep.mubr.msk.f32.mxu1 %vm2835_vm1, %v3011_v10  ;;  %4411 = vst [vmem:[#allocation4_spill] sm:$0xff] %v3102_v23 }
  0x63   : > { %1221 = vmatprep.subr.mxu0 %v2447_v2  ;;  %1442 = vmatprep.subr.mxu1 %v2447_v2 }
  0x64   : > { %1222 = vmatpush1.msra.mxu0 %v688_v26  ;;  %1443 = vmatpush1.msra.mxu1 %v722_v28  ;;  %v288_v26 = vmul.f32 %v2696_v52, %v249_v8  ;;  %v685_v28 = vld [vmem:[%s4336_s3 + $0x230] sm:$0xff]  ;;  %v684_v8 = vld [vmem:[%s4336_s3 + $0x228] sm:$0xff] }
  0x65   : > { %2129 = vmatmul.mubr.msk.f32.gmra.mxu0 %vm2835_vm1, %v2956_v44  ;;  %1079 = vmatmul.mubr.f32.gmra.mxu1 %v3039_v30 }
  0x66   : > { %858 = vmatprep.mubr.f32.mxu0 %v2940_v40  ;;  %1083 = vmatprep.mubr.f32.mxu1 %v3047_v42  ;;  %v327_v58 = vadd.f32 %v2713_v59, %v288_v26  ;;  %v289_v26 = vmul.f32 %v2696_v52, %v250_v1  ;;  %v3180_v1 = vrot.slane %v3104_v25, 1 }
  0x67   : > { %1223 = vmatprep.subr.mxu0 %v2447_v2  ;;  %1444 = vmatprep.subr.mxu1 %v2447_v2 }
  0x68   : > { %1224 = vmatpush1.msra.mxu0 %v687_v48  ;;  %1445 = vmatpush1.msra.mxu1 %v721_v49  ;;  %v520_v48 = vrot.slane %v3041_v38, 1  ;;  %v3125_v49 = vrot.slane %v3049_v43, 1  ;;  %4415 = vst [vmem:[#allocation8_spill] sm:$0xff] %v3180_v1  ;;  %v328_v6 = vadd.f32 %v2713_v59, %v289_v26  ;;  %v682_v26 = vld [vmem:[%s4336_s3 + $0x218] sm:$0xff] }
  0x69   : > { %859 = vmatmul.mubr.f32.gmra.mxu0 %v2992_v4  ;;  %2165 = vmatmul.mubr.msk.f32.gmra.mxu1 %vm505_vm2, %v3015_v13 }
  0x6a   : > { %863 = vmatprep.mubr.f32.mxu0 %v2986_v0  ;;  %2167 = vmatprep.mubr.msk.f32.mxu1 %vm2835_vm1, %v3066_v50  ;;  %4412 = vst [vmem:[#allocation5_spill] sm:$0xff] %v3125_v49 }
  0x6b   : > { %1225 = vmatprep.subr.mxu0 %v2447_v2  ;;  %1446 = vmatprep.subr.mxu1 %v2447_v2 }
  0x6c   : > { %1226 = vmatpush1.msra.mxu0 %v686_v9  ;;  %1447 = vmatpush1.msra.mxu1 %v720_v12  ;;  %v718_v9 = vld [vmem:[%s4336_s3 + $0x338] sm:$0xff]  ;;  %v3149_v12 = vsel %vm505_vm2, %v520_v48, %v3125_v49  ;;  %v683_v48 = vld [vmem:[%s4336_s3 + $0x220] sm:$0xff] }
  0x6d   : > { %2131 = vmatmul.mubr.msk.f32.gmra.mxu0 %vm2835_vm1, %v3011_v10  ;;  %1089 = vmatmul.mubr.f32.gmra.mxu1 %v3094_v19  ;;  %4413 = vst [vmem:[#allocation6_spill] sm:$0xff] %v3149_v12 }
  0x6e   : > { %868 = vmatprep.mubr.f32.mxu0 %v2994_v5  ;;  %1093 = vmatprep.mubr.f32.mxu1 %v3102_v23 }
  0x6f   : > { %1227 = vmatprep.subr.mxu0 %v2447_v2  ;;  %1448 = vmatprep.subr.mxu1 %v2447_v2 }
  0x70   : > { %1228 = vmatpush1.msra.mxu0 %v685_v28  ;;  %1449 = vmatpush1.msra.mxu1 %v719_v41  ;;  %v3157_v28 = vsel %vm409_vm0, %v3121_v45, %v428_v57  ;;  %v3159_v41 = vmax.f32 %v327_v58, 0.0  ;;  %v3176_v57 = vrot.slane %v3151_v22, 7  ;;  %v523_v58 = vrot.slane %v3096_v21, 1 }
  0x71   : > { %869 = vmatmul.mubr.f32.gmra.mxu0 %v3047_v42  ;;  %2168 = vmatmul.mubr.msk.f32.gmra.mxu1 %vm505_vm2, %v3070_v56 }
  0x72   : > { %873 = vmatprep.mubr.f32.mxu0 %v3041_v38  ;;  %2170 = vmatprep.mubr.msk.f32.mxu1 %vm2835_vm1, %v3121_v45  ;;  %4414 = vst [vmem:[#allocation7_spill] sm:$0xff] %v3159_v41 }
  0x73   : > { %1229 = vmatprep.subr.mxu0 %v2447_v2  ;;  %1450 = vmatprep.subr.mxu1 %v2447_v2 }
  0x74   : > { %1230 = vmatpush1.msra.mxu0 %v684_v8  ;;  %1451 = vmatpush1.msra.mxu1 %v718_v9  ;;  %v431_v8 = vrot.slane %v3159_v41, 7  ;;  %v329_v9 = vadd.f32 %v2713_v59, %v290_v55  ;;  %v3203_v55 = vsel %vm505_vm2, %v523_v58, %v3180_v1  ;;  %v526_v58 = vrot.slane %v3151_v22, 1 }
  0x75   : > { %2133 = vmatmul.mubr.msk.f32.gmra.mxu0 %vm2835_vm1, %v3066_v50  ;;  %1099 = vmatmul.mubr.f32.gmra.mxu1 %v3149_v12  ;;  %v716_v12 = vld [vmem:[%s4336_s3 + $0x328] sm:$0xff] }
  0x76   : > { %878 = vmatprep.mubr.f32.mxu0 %v3049_v43  ;;  %1103 = vmatprep.mubr.f32.mxu1 %v3157_v28 }
  0x77   : > { %1231 = vmatprep.subr.mxu0 %v2447_v2  ;;  %1452 = vmatprep.subr.mxu1 %v2447_v2 }
  0x78   : > { %1232 = vmatpush1.msra.mxu0 %v683_v48  ;;  %1453 = vmatpush1.msra.mxu1 %v717_v51  ;;  %v3205_v48 = vmax.f32 %v328_v6, 0.0  ;;  %v291_v51 = vmul.f32 %v2696_v52, %v252_v54  ;;  %v681_v52 = vld [vmem:[%s4336_s3 + $0x210] sm:$0xff]  ;;  %v715_v54 = vld [vmem:[%s4336_s3 + $0x320] sm:$0xff]  ;;  %v3233_v6 = vrot.slane %v3159_v41, 1 }
  0x79   : > { %879 = vmatmul.mubr.f32.gmra.mxu0 %v3102_v23  ;;  %2171 = vmatmul.mubr.msk.f32.gmra.mxu1 %vm505_vm2, %v3125_v49  ;;  %v3211_v49 = vsel %vm409_vm0, %v3176_v57, %v431_v8  ;;  %v3213_v23 = vmax.f32 %v329_v9, 0.0 }
  0x7a   : > { %883 = vmatprep.mubr.f32.mxu0 %v3096_v21  ;;  %2173 = vmatprep.mubr.msk.f32.mxu1 %vm2835_vm1, %v3176_v57  ;;  %4416 = vst [vmem:[#allocation9_spill] sm:$0xff] %v3211_v49  ;;  %4418 = vst [vmem:[#allocation11_spill] sm:$0xff] %v3233_v6  ;;  %v330_v8 = vadd.f32 %v2713_v59, %v291_v51  ;;  %v714_v59 = vld [vmem:[%s4336_s3 + $0x318] sm:$0xff]  ;;  %v3254_v51 = vsel %vm505_vm2, %v526_v58, %v3233_v6  ;;  %v679_v58 = vld [vmem:[%s4336_s3 + $0x200] sm:$0xff] }
  0x7b   : > { %1233 = vmatprep.subr.mxu0 %v2447_v2  ;;  %4417 = vst [vmem:[#allocation10_spill] sm:$0xff] %v3213_v23  ;;  %1454 = vmatprep.subr.mxu1 %v2447_v2  ;;  %v434_v9 = vrot.slane %v3213_v23, 7  ;;  %4419 = vst [vmem:[#allocation12_spill] sm:$0xff] %v3254_v51 }
  0x7c   : > { %1234 = vmatpush1.msra.mxu0 %v682_v26  ;;  %1455 = vmatpush1.msra.mxu1 %v716_v12  ;;  %v3229_v12 = vrot.slane %v3205_v48, 7  ;;  %v680_v26 = vld [vmem:[%s4336_s3 + $0x208] sm:$0xff] }
  0x7d   : > { %2135 = vmatmul.mubr.msk.f32.gmra.mxu0 %vm2835_vm1, %v3121_v45  ;;  %1109 = vmatmul.mubr.f32.gmra.mxu1 %v3203_v55 }
  0x7e   : > { %888 = vmatprep.mubr.f32.mxu0 %v3104_v25  ;;  %1113 = vmatprep.mubr.f32.mxu1 %v3211_v49 }
  0x7f   : > { %1235 = vmatprep.subr.mxu0 %v2447_v2  ;;  %1456 = vmatprep.subr.mxu1 %v2447_v2 }
  0x80   : > { %1236 = vmatpush1.msra.mxu0 %v681_v52  ;;  %1457 = vmatpush1.msra.mxu1 %v715_v54  ;;  %v3256_v52 = vmax.f32 %v330_v8, 0.0  ;;  %v3261_v54 = vsel %vm409_vm0, %v3229_v12, %v434_v9  ;;  %v713_v8 = vld [vmem:[%s4336_s3 + $0x310] sm:$0xff]  ;;  %v529_v9 = vrot.slane %v3205_v48, 1 }
  0x81   : > { %889 = vmatmul.mubr.f32.gmra.mxu0 %v3157_v28  ;;  %2174 = vmatmul.mubr.msk.f32.gmra.mxu1 %vm505_vm2, %v3180_v1  ;;  %4420 = vst [vmem:[#allocation13_spill] sm:$0xff] %v3261_v54  ;;  %v3264_v1 = vmax.f32 %v2717_v61, 0.0 }
  0x82   : > { %893 = vmatprep.mubr.f32.mxu0 %v3151_v22  ;;  %2176 = vmatprep.mubr.msk.f32.mxu1 %vm2835_vm1, %v3229_v12  ;;  %v3280_v61 = vrot.slane %v3256_v52, 7 }
  0x83   : > { %1237 = vmatprep.subr.mxu0 %v2447_v2  ;;  %4421 = vst [vmem:[#allocation14_spill] sm:$0xff] %v3264_v1  ;;  %1458 = vmatprep.subr.mxu1 %v2447_v2 }
  0x84   : > { %1238 = vmatpush1.msra.mxu0 %v680_v26  ;;  %1459 = vmatpush1.msra.mxu1 %v714_v59  ;;  %v3284_v26 = vrot.slane %v3213_v23, 1  ;;  %v437_v59 = vrot.slane %v3264_v1, 7 }
  0x85   : > { %2137 = vmatmul.mubr.msk.f32.gmra.mxu0 %vm2835_vm1, %v3176_v57  ;;  %1119 = vmatmul.mubr.f32.gmra.mxu1 %v3254_v51  ;;  %v710_v51 = vld [vmem:[%s4336_s3 + $0x2f8] sm:$0xff] }
  0x86   : > { %898 = vmatprep.mubr.f32.mxu0 %v3159_v41  ;;  %1123 = vmatprep.mubr.f32.mxu1 %v3261_v54  ;;  %4422 = vst [vmem:[#allocation15_spill] sm:$0xff] %v3284_v26  ;;  %v712_v41 = vld [vmem:[%s4336_s3 + $0x308] sm:$0xff] }
  0x87   : > { %1239 = vmatprep.subr.mxu0 %v2447_v2  ;;  %1460 = vmatprep.subr.mxu1 %v2447_v2 }
  0x88   : > { %1240 = vmatpush1.msra.mxu0 %v679_v58  ;;  %1461 = vmatpush1.msra.mxu1 %v713_v8  ;;  %v3304_v58 = vsel %vm505_vm2, %v529_v9, %v3284_v26  ;;  %v3307_v8 = vmax.f32 %v2720_v62, 0.0  ;;  %v709_v62 = vld [vmem:[%s4336_s3 + $0x2f0] sm:$0xff]  ;;  %v711_v9 = vld [vmem:[%s4336_s3 + $0x300] sm:$0xff] }
  0x89   : > { %899 = vmatmul.mubr.f32.gmra.mxu0 %v3211_v49  ;;  %2177 = vmatmul.mubr.msk.f32.gmra.mxu1 %vm505_vm2, %v3233_v6  ;;  %4423 = vst [vmem:[#allocation16_spill] sm:$0xff] %v3304_v58  ;;  %v3312_v6 = vsel %vm409_vm0, %v3280_v61, %v437_v59  ;;  %v3315_v49 = vmax.f32 %v2748_v11, 0.0 }
  0x8a   : > { %903 = vmatprep.mubr.f32.mxu0 %v3205_v48  ;;  %2179 = vmatprep.mubr.msk.f32.mxu1 %vm2835_vm1, %v3280_v61  ;;  %4424 = vst [vmem:[#allocation17_spill] sm:$0xff] %v3312_v6  ;;  %v3331_v11 = vrot.slane %v3307_v8, 7 }
  0x8b   : > { %1241 = vmatprep.subr.mxu0 %v2447_v2  ;;  %4425 = vst [vmem:[#allocation18_spill] sm:$0xff] %v3315_v49  ;;  %1462 = vmatprep.subr.mxu1 %v2447_v2  ;;  %v440_v59 = vrot.slane %v3315_v49, 7 }
  0x8c   : > { %1242 = vmatpush2.msra.mxu0 %v710_v51  ;;  %1463 = vmatpush1.msra.mxu1 %v712_v41  ;;  %v532_v41 = vrot.slane %v3256_v52, 1  ;;  %v3335_v51 = vrot.slane %v3264_v1, 1 }
  0x8d   : > { %2139 = vmatmul.mubr.msk.f32.gmra.mxu0 %vm2835_vm1, %v3229_v12  ;;  %1129 = vmatmul.mubr.f32.gmra.mxu1 %v3304_v58  ;;  %v708_v58 = vld [vmem:[%s4336_s3 + $0x2e8] sm:$0xff] }
  0x8e   : > { %908 = vmatprep.mubr.f32.mxu0 %v3213_v23  ;;  %1133 = vmatprep.mubr.f32.mxu1 %v3312_v6  ;;  %4426 = vst [vmem:[#allocation19_spill] sm:$0xff] %v3335_v51  ;;  %v742_v23 = vld [vmem:[%s4336_s3 + $0x3f8] sm:$0xff] }
  0x8f   : > { %1243 = vmatprep.subr.mxu0 %v2447_v2  ;;  %1464 = vmatprep.subr.mxu1 %v2447_v2 }
  0x90   : > { %1244 = vmatpush2.msra.mxu0 %v709_v62  ;;  %1465 = vmatpush1.msra.mxu1 %v711_v9  ;;  %v3355_v62 = vsel %vm505_vm2, %v532_v41, %v3335_v51  ;;  %v3358_v9 = vmax.f32 %v2773_v24, 0.0  ;;  %v707_v24 = vld [vmem:[%s4336_s3 + $0x2e0] sm:$0xff]  ;;  %v741_v41 = vld [vmem:[%s4336_s3 + $0x3f0] sm:$0xff] }
  0x91   : > { %909 = vmatmul.mubr.f32.gmra.mxu0 %v3261_v54  ;;  %2180 = vmatmul.mubr.msk.f32.gmra.mxu1 %vm505_vm2, %v3284_v26  ;;  %4427 = vst [vmem:[#allocation20_spill] sm:$0xff] %v3355_v62  ;;  %v3363_v26 = vsel %vm409_vm0, %v3331_v11, %v440_v59  ;;  %v3366_v54 = vmax.f32 %v2781_v29, 0.0 }
  0x92   : > { %913 = vmatprep.mubr.f32.mxu0 %v3256_v52  ;;  %2182 = vmatprep.mubr.msk.f32.mxu1 %vm2835_vm1, %v3331_v11  ;;  %4428 = vst [vmem:[#allocation21_spill] sm:$0xff] %v3363_v26  ;;  %v3382_v29 = vrot.slane %v3358_v9, 7 }
  0x93   : > { %1245 = vmatprep.subr.mxu0 %v2447_v2  ;;  %4429 = vst [vmem:[#allocation22_spill] sm:$0xff] %v3366_v54  ;;  %1466 = vmatprep.subr.mxu1 %v2447_v2  ;;  %v443_v59 = vrot.slane %v3366_v54, 7 }
  0x94   : > { %1246 = vmatpush2.msra.mxu0 %v708_v58  ;;  %1467 = vmatpush2.msra.mxu1 %v742_v23  ;;  %v535_v23 = vrot.slane %v3307_v8, 1  ;;  %v3386_v58 = vrot.slane %v3315_v49, 1 }
  0x95   : > { %2141 = vmatmul.mubr.msk.f32.gmra.mxu0 %vm2835_vm1, %v3280_v61  ;;  %1139 = vmatmul.mubr.f32.gmra.mxu1 %v3355_v62  ;;  %v706_v62 = vld [vmem:[%s4336_s3 + $0x2d8] sm:$0xff] }
  0x96   : > { %918 = vmatprep.mubr.f32.mxu0 %v3264_v1  ;;  %1143 = vmatprep.mubr.f32.mxu1 %v3363_v26  ;;  %4430 = vst [vmem:[#allocation23_spill] sm:$0xff] %v3386_v58  ;;  %v740_v1 = vld [vmem:[%s4336_s3 + $0x3e8] sm:$0xff] }
  0x97   : > { %1247 = vmatprep.subr.mxu0 %v2447_v2  ;;  %1468 = vmatprep.subr.mxu1 %v2447_v2 }
  0x98   : > { %1248 = vmatpush2.msra.mxu0 %v707_v24  ;;  %1469 = vmatpush2.msra.mxu1 %v741_v41  ;;  %v3406_v24 = vsel %vm505_vm2, %v535_v23, %v3386_v58  ;;  %v3409_v41 = vmax.f32 %v2795_v34, 0.0  ;;  %v705_v34 = vld [vmem:[%s4336_s3 + $0x2d0] sm:$0xff]  ;;  %v739_v23 = vld [vmem:[%s4336_s3 + $0x3e0] sm:$0xff] }
  0x99   : > { %919 = vmatmul.mubr.f32.gmra.mxu0 %v3312_v6  ;;  %2183 = vmatmul.mubr.msk.f32.gmra.mxu1 %vm505_vm2, %v3335_v51  ;;  %4431 = vst [vmem:[#allocation24_spill] sm:$0xff] %v3406_v24  ;;  %v3414_v51 = vsel %vm409_vm0, %v3382_v29, %v443_v59  ;;  %v3417_v6 = vmax.f32 %v2798_v35, 0.0 }
  0x9a   : > { %923 = vmatprep.mubr.f32.mxu0 %v3307_v8  ;;  %2185 = vmatprep.mubr.msk.f32.mxu1 %vm2835_vm1, %v3382_v29  ;;  %4432 = vst [vmem:[#allocation25_spill] sm:$0xff] %v3414_v51  ;;  %v3433_v35 = vrot.slane %v3409_v41, 7 }
  0x9b   : > { %1249 = vmatprep.subr.mxu0 %v2447_v2  ;;  %4433 = vst [vmem:[#allocation26_spill] sm:$0xff] %v3417_v6  ;;  %1470 = vmatprep.subr.mxu1 %v2447_v2  ;;  %v446_v59 = vrot.slane %v3417_v6, 7 }
  0x9c   : > { %1250 = vmatpush2.msra.mxu0 %v706_v62  ;;  %1471 = vmatpush2.msra.mxu1 %v740_v1  ;;  %v538_v1 = vrot.slane %v3358_v9, 1  ;;  %v3437_v62 = vrot.slane %v3366_v54, 1 }
  0x9d   : > { %2143 = vmatmul.mubr.msk.f32.gmra.mxu0 %vm2835_vm1, %v3331_v11  ;;  %1149 = vmatmul.mubr.f32.gmra.mxu1 %v3406_v24  ;;  %v704_v24 = vld [vmem:[%s4336_s3 + $0x2c8] sm:$0xff] }
  0x9e   : > { %928 = vmatprep.mubr.f32.mxu0 %v3315_v49  ;;  %1153 = vmatprep.mubr.f32.mxu1 %v3414_v51  ;;  %4434 = vst [vmem:[#allocation27_spill] sm:$0xff] %v3437_v62  ;;  %v738_v49 = vld [vmem:[%s4336_s3 + $0x3d8] sm:$0xff] }
  0x9f   : > { %1251 = vmatprep.subr.mxu0 %v2447_v2  ;;  %1472 = vmatprep.subr.mxu1 %v2447_v2 }
  0xa0   : > { %1252 = vmatpush2.msra.mxu0 %v705_v34  ;;  %1473 = vmatpush2.msra.mxu1 %v739_v23  ;;  %v3457_v34 = vsel %vm505_vm2, %v538_v1, %v3437_v62  ;;  %v3460_v23 = vmax.f32 %v2802_v37, 0.0  ;;  %v703_v37 = vld [vmem:[%s4336_s3 + $0x2c0] sm:$0xff]  ;;  %v737_v1 = vld [vmem:[%s4336_s3 + $0x3d0] sm:$0xff] }
  0xa1   : > { %929 = vmatmul.mubr.f32.gmra.mxu0 %v3363_v26  ;;  %2186 = vmatmul.mubr.msk.f32.gmra.mxu1 %vm505_vm2, %v3386_v58  ;;  %4435 = vst [vmem:[#allocation28_spill] sm:$0xff] %v3457_v34  ;;  %v3465_v58 = vsel %vm409_vm0, %v3433_v35, %v446_v59  ;;  %v3468_v26 = vmax.f32 %v2821_v46, 0.0 }
  0xa2   : > { %933 = vmatprep.mubr.f32.mxu0 %v3358_v9  ;;  %2188 = vmatprep.mubr.msk.f32.mxu1 %vm2835_vm1, %v3433_v35  ;;  %4436 = vst [vmem:[#allocation29_spill] sm:$0xff] %v3460_v23  ;;  %v3484_v46 = vrot.slane %v3460_v23, 7 }
  0xa3   : > { %1253 = vmatprep.subr.mxu0 %v2447_v2  ;;  %4437 = vst [vmem:[#allocation30_spill] sm:$0xff] %v3468_v26  ;;  %1474 = vmatprep.subr.mxu1 %v2447_v2  ;;  %v449_v59 = vrot.slane %v3468_v26, 7 }
  0xa4   : > { %1254 = vmatpush2.msra.mxu0 %v704_v24  ;;  %1475 = vmatpush2.msra.mxu1 %v738_v49  ;;  %v541_v49 = vrot.slane %v3409_v41, 1  ;;  %v3488_v24 = vrot.slane %v3417_v6, 1 }
  0xa5   : > { %2145 = vmatmul.mubr.msk.f32.gmra.mxu0 %vm2835_vm1, %v3382_v29  ;;  %1159 = vmatmul.mubr.f32.gmra.mxu1 %v3457_v34  ;;  %v702_v34 = vld [vmem:[%s4336_s3 + $0x2b8] sm:$0xff] }
  0xa6   : > { %938 = vmatprep.mubr.f32.mxu0 %v3366_v54  ;;  %1163 = vmatprep.mubr.f32.mxu1 %v3465_v58  ;;  %4438 = vst [vmem:[#allocation31_spill] sm:$0xff] %v3488_v24  ;;  %v736_v54 = vld [vmem:[%s4336_s3 + $0x3c8] sm:$0xff] }
  0xa7   : > { %1255 = vmatprep.subr.mxu0 %v2447_v2  ;;  %1476 = vmatprep.subr.mxu1 %v2447_v2 }
  0xa8   : > { %1256 = vmatpush2.msra.mxu0 %v703_v37  ;;  %1477 = vmatpush2.msra.mxu1 %v737_v1  ;;  %v3508_v37 = vsel %vm505_vm2, %v541_v49, %v3488_v24  ;;  %v3511_v1 = vmax.f32 %v2870_v7, 0.0  ;;  %v701_v7 = vld [vmem:[%s4336_s3 + $0x2b0] sm:$0xff]  ;;  %v735_v49 = vld [vmem:[%s4336_s3 + $0x3c0] sm:$0xff] }
  0xa9   : > { %939 = vmatmul.mubr.f32.gmra.mxu0 %v3414_v51  ;;  %2189 = vmatmul.mubr.msk.f32.gmra.mxu1 %vm505_vm2, %v3437_v62  ;;  %4439 = vst [vmem:[#allocation32_spill] sm:$0xff] %v3508_v37  ;;  %v3516_v62 = vsel %vm409_vm0, %v3484_v46, %v449_v59  ;;  %v3519_v51 = vmax.f32 %v2882_v14, 0.0 }
  0xaa   : > { %943 = vmatprep.mubr.f32.mxu0 %v3409_v41  ;;  %2191 = vmatprep.mubr.msk.f32.mxu1 %vm2835_vm1, %v3484_v46  ;;  %4440 = vst [vmem:[#allocation33_spill] sm:$0xff] %v3511_v1  ;;  %v3535_v14 = vrot.slane %v3511_v1, 7 }
  0xab   : > { %1257 = vmatprep.subr.mxu0 %v2447_v2  ;;  %1478 = vmatprep.subr.mxu1 %v2447_v2  ;;  %v452_v59 = vrot.slane %v3519_v51, 7 }
  0xac   : > { %1258 = vmatpush2.msra.mxu0 %v702_v34  ;;  %1479 = vmatpush2.msra.mxu1 %v736_v54  ;;  %v544_v54 = vrot.slane %v3460_v23, 1  ;;  %v3539_v34 = vrot.slane %v3468_v26, 1 }
  0xad   : > { %2147 = vmatmul.mubr.msk.f32.gmra.mxu0 %vm2835_vm1, %v3433_v35  ;;  %1169 = vmatmul.mubr.f32.gmra.mxu1 %v3508_v37  ;;  %v700_v37 = vld [vmem:[%s4336_s3 + $0x2a8] sm:$0xff] }
  0xae   : > { %948 = vmatprep.mubr.f32.mxu0 %v3417_v6  ;;  %1173 = vmatprep.mubr.f32.mxu1 %v3516_v62  ;;  %4441 = vst [vmem:[#allocation34_spill] sm:$0xff] %v3539_v34  ;;  %v734_v6 = vld [vmem:[%s4336_s3 + $0x3b8] sm:$0xff] }
  0xaf   : > { %1259 = vmatprep.subr.mxu0 %v2447_v2  ;;  %1480 = vmatprep.subr.mxu1 %v2447_v2 }
  0xb0   : > { %1260 = vmatpush2.msra.mxu0 %v701_v7  ;;  %1481 = vmatpush2.msra.mxu1 %v735_v49  ;;  %v3559_v7 = vsel %vm505_vm2, %v544_v54, %v3539_v34  ;;  %v3562_v49 = vmax.f32 %v2890_v16, 0.0  ;;  %v699_v16 = vld [vmem:[%s4336_s3 + $0x2a0] sm:$0xff]  ;;  %v733_v54 = vld [vmem:[%s4336_s3 + $0x3b0] sm:$0xff] }
  0xb1   : > { %949 = vmatmul.mubr.f32.gmra.mxu0 %v3465_v58  ;;  %2192 = vmatmul.mubr.msk.f32.gmra.mxu1 %vm505_vm2, %v3488_v24  ;;  %4442 = vst [vmem:[#allocation35_spill] sm:$0xff] %v3559_v7  ;;  %v3567_v24 = vsel %vm409_vm0, %v3535_v14, %v452_v59 }
  0xb2   : > { %953 = vmatprep.mubr.f32.mxu0 %v3460_v23  ;;  %2194 = vmatprep.mubr.msk.f32.mxu1 %vm2835_vm1, %v3535_v14  ;;  %v3571_v23 = vmax.f32 %v2893_v17, 0.0  ;;  %v3586_v17 = vrot.slane %v3562_v49, 7 }
  0xb3   : > { %1261 = vmatprep.subr.mxu0 %v2447_v2  ;;  %1482 = vmatprep.subr.mxu1 %v2447_v2 }
  0xb4   : > { %1262 = vmatpush2.msra.mxu0 %v700_v37  ;;  %1483 = vmatpush2.msra.mxu1 %v734_v6  ;;  %v547_v6 = vrot.slane %v3511_v1, 1  ;;  %v3590_v37 = vrot.slane %v3519_v51, 1  ;;  %v455_v59 = vrot.slane %v3571_v23, 7 }
  0xb5   : > { %2149 = vmatmul.mubr.msk.f32.gmra.mxu0 %vm2835_vm1, %v3484_v46  ;;  %1179 = vmatmul.mubr.f32.gmra.mxu1 %v3559_v7  ;;  %v698_v7 = vld [vmem:[%s4336_s3 + $0x298] sm:$0xff] }
  0xb6   : > { %958 = vmatprep.mubr.f32.mxu0 %v3468_v26  ;;  %1183 = vmatprep.mubr.f32.mxu1 %v3567_v24  ;;  %v732_v26 = vld [vmem:[%s4336_s3 + $0x3a8] sm:$0xff] }
  0xb7   : > { %1263 = vmatprep.subr.mxu0 %v2447_v2  ;;  %1484 = vmatprep.subr.mxu1 %v2447_v2 }
  0xb8   : > { %1264 = vmatpush2.msra.mxu0 %v699_v16  ;;  %1485 = vmatpush2.msra.mxu1 %v733_v54  ;;  %v3610_v16 = vsel %vm505_vm2, %v547_v6, %v3590_v37  ;;  %v3613_v54 = vmax.f32 %v2896_v18, 0.0  ;;  %v697_v18 = vld [vmem:[%s4336_s3 + $0x290] sm:$0xff]  ;;  %v731_v6 = vld [vmem:[%s4336_s3 + $0x3a0] sm:$0xff] }
  0xb9   : > { %959 = vmatmul.mubr.f32.gmra.mxu0 %v3516_v62  ;;  %2195 = vmatmul.mubr.msk.f32.gmra.mxu1 %vm505_vm2, %v3539_v34  ;;  %4443 = vst [vmem:[#allocation36_spill] sm:$0xff] %v3610_v16  ;;  %v3618_v34 = vsel %vm409_vm0, %v3586_v17, %v455_v59 }
  0xba   : > { %963 = vmatprep.mubr.f32.mxu0 %v3511_v1  ;;  %2197 = vmatprep.mubr.msk.f32.mxu1 %vm2835_vm1, %v3586_v17  ;;  %4444 = vst [vmem:[#allocation37_spill] sm:$0xff] %v3613_v54  ;;  %v3622_v1 = vmax.f32 %v2922_v31, 0.0  ;;  %v3637_v31 = vrot.slane %v3613_v54, 7  ;;  %v696_v54 = vld [vmem:[%s4336_s3 + $0x288] sm:$0xff] }
  0xbb   : > { %1265 = vmatprep.subr.mxu0 %v2447_v2  ;;  %1486 = vmatprep.subr.mxu1 %v2447_v2 }
  0xbc   : > { %1266 = vmatpush2.msra.mxu0 %v698_v7  ;;  %1487 = vmatpush2.msra.mxu1 %v732_v26  ;;  %4445 = vst [vmem:[#allocation38_spill] sm:$0xff] %v3622_v1  ;;  %v550_v26 = vrot.slane %v3562_v49, 1  ;;  %v3641_v7 = vrot.slane %v3571_v23, 1  ;;  %v604_v59 = vrot.slane %v3622_v1, 7  ;;  %v729_v1 = vld [vmem:[%s4336_s3 + $0x390] sm:$0xff] }
  0xbd   : > { %2151 = vmatmul.mubr.msk.f32.gmra.mxu0 %vm2835_vm1, %v3535_v14  ;;  %1189 = vmatmul.mubr.f32.gmra.mxu1 %v3610_v16  ;;  %v730_v16 = vld [vmem:[%s4336_s3 + $0x398] sm:$0xff] }
  0xbe   : > { %968 = vmatprep.mubr.f32.mxu0 %v3519_v51  ;;  %1193 = vmatprep.mubr.f32.mxu1 %v3618_v34 }
  0xbf   : > { %1267 = vmatprep.subr.mxu0 %v2447_v2  ;;  %1488 = vmatprep.subr.mxu1 %v2447_v2 }
  0xc0   : > { %1268 = vmatpush2.msra.mxu0 %v697_v18  ;;  %1489 = vmatpush2.msra.mxu1 %v731_v6  ;;  %v3661_v18 = vsel %vm505_vm2, %v550_v26, %v3641_v7  ;;  %v3667_v6 = vsel %vm409_vm0, %v3637_v31, %v604_v59  ;;  %v758_v26 = vld [vmem:[%s4336_s3 + $0x478] sm:$0xff]  ;;  %v757_v59 = vld [vmem:[%s4336_s3 + $0x470] sm:$0xff] }
  0xc1   : > { %969 = vmatmul.mubr.f32.gmra.mxu0 %v3567_v24  ;;  %2198 = vmatmul.mubr.msk.f32.gmra.mxu1 %vm505_vm2, %v3590_v37 }
  0xc2   : > { %973 = vmatprep.mubr.f32.mxu0 %v3562_v49  ;;  %2200 = vmatprep.mubr.msk.f32.mxu1 %vm2835_vm1, %v3637_v31 }
  0xc3   : > { %1269 = vmatprep.subr.mxu0 %v2447_v2  ;;  %1490 = vmatprep.subr.mxu1 %v2447_v2 }
  0xc4   : > { %1270 = vmatpush2.msra.mxu0 %v696_v54  ;;  %1491 = vmatpush2.msra.mxu1 %v730_v16  ;;  %v695_v16 = vld [vmem:[%s4336_s3 + $0x280] sm:$0xff]  ;;  %v728_v54 = vld [vmem:[%s4336_s3 + $0x388] sm:$0xff] }
  0xc5   : > { %2153 = vmatmul.mubr.msk.f32.gmra.mxu0 %vm2835_vm1, %v3586_v17  ;;  %1199 = vmatmul.mubr.f32.gmra.mxu1 %v3661_v18 }
  0xc6   : > { %1492 = vmatprep.subr.mxu1 %v2447_v2  ;;  %978 = vmatprep.mubr.f32.mxu0 %v3571_v23 }
  0xc7   : > { %1203 = vmatprep.mubr.f32.mxu1 %v3667_v6  ;;  %1493 = vmatpush2.msra.mxu1 %v729_v1  ;;  %v727_v1 = vld [vmem:[%s4336_s3 + $0x380] sm:$0xff] }
  0xc8   : > { %1271 = vmatprep.subr.mxu0 %v2447_v2  ;;  %1494 = vmatprep.subr.mxu1 %v2447_v2 }
  0xc9   : > { %979 = vmatmul.mubr.f32.gmra.mxu0 %v3618_v34  ;;  %2201 = vmatmul.mubr.msk.f32.gmra.mxu1 %vm505_vm2, %v3641_v7 }
  0xca   : > { %1272 = vmatpush2.msra.mxu0 %v695_v16  ;;  %1495 = vmatpush2.msra.mxu1 %v728_v54  ;;  %v4458_v16 = vld [vmem:[#allocation14_spill] sm:$0xff]  ;;  %v4460_v54 = vld [vmem:[#allocation20_spill] sm:$0xff] }
  0xcb   : > { %1496 = vmatprep.subr.mxu1 %v2447_v2  ;;  %1273 = vmatprep.mubr.f32.mxu0 %v2927_v32  ;;  %v4446_v32 = vld [vmem:[#allocation4_spill] sm:$0xff] }
  0xcc   : > { %1497 = vmatpush2.msra.mxu1 %v727_v1  ;;  %1498 = vmatprep.mubr.f32.mxu1 %v2850_v60 }
  0xcd   : > { %1274 = vmatmul.mubr.f32.vlgmr.msra.gmra.mxu0 %v2792_v33  ;;  %2219 = vmatmul.mubr.msk.f32.vlgmr.msra.gmra.mxu1 %vm2835_vm1, %v2903_v20  ;;  %v756_v33 = vld [vmem:[%s4336_s3 + $0x468] sm:$0xff]  ;;  %v751_v20 = vld [vmem:[%s4336_s3 + $0x440] sm:$0xff] }
  0xce   : > { %2318 = vmatprep.subr.mxu0 %v758_v26  ;;  %2202 = vmatprep.mubr.msk.f32.mxu0 %vm505_vm2, %v2887_v15  ;;  %v752_v15 = vld [vmem:[%s4336_s3 + $0x448] sm:$0xff] }
  0xcf   : > { %2319 = vmatpush3.msra.mxu0 %v758_v26  ;;  %1503 = vmatprep.mubr.f32.mxu1 %v2859_v3 }
  0xd0   : > { %2320 = vmatprep.subr.mxu0 %v757_v59  ;;  %2398 = vmatprep.subr.mxu1 %v758_v26 }
  0xd1   : > { %1279 = vmatmul.mubr.f32.gmra.mxu0 %v2777_v27  ;;  %1504 = vmatmul.mubr.f32.gmra.mxu1 %v2938_v39  ;;  %v755_v27 = vld [vmem:[%s4336_s3 + $0x460] sm:$0xff] }
  0xd2   : > { %1283 = vmatprep.mubr.f32.mxu0 %v2984_v63  ;;  %1508 = vmatprep.mubr.f32.mxu1 %v2929_v36  ;;  %v4447_v39 = vld [vmem:[#allocation6_spill] sm:$0xff] }
  0xd3   : > { %2321 = vmatpush3.msra.mxu0 %v757_v59  ;;  %2414 = vmatpush3.msra.mxu1 %v758_v26 }
  0xd4   : > { %2322 = vmatprep.subr.mxu0 %v756_v33  ;;  %2399 = vmatprep.subr.mxu1 %v757_v59 }
  0xd5   : > { %1284 = vmatmul.mubr.f32.gmra.mxu0 %v2850_v60  ;;  %2221 = vmatmul.mubr.msk.f32.gmra.mxu1 %vm2835_vm1, %v2956_v44  ;;  %v754_v60 = vld [vmem:[%s4336_s3 + $0x458] sm:$0xff] }
  0xd6   : > { %2203 = vmatprep.mubr.msk.f32.mxu0 %vm505_vm2, %v2960_v47  ;;  %1513 = vmatprep.mubr.f32.mxu1 %v2940_v40  ;;  %v4448_v44 = vld [vmem:[#allocation5_spill] sm:$0xff] }
  0xd7   : > { %2323 = vmatpush3.msra.mxu0 %v756_v33  ;;  %2415 = vmatpush3.msra.mxu1 %v757_v59  ;;  %v4461_v59 = vld [vmem:[#allocation19_spill] sm:$0xff] }
  0xd8   : > { %2324 = vmatprep.subr.mxu0 %v755_v27  ;;  %2400 = vmatprep.subr.mxu1 %v756_v33 }
  0xd9   : > { %1289 = vmatmul.mubr.f32.gmra.mxu0 %v2859_v3  ;;  %1514 = vmatmul.mubr.f32.gmra.mxu1 %v2992_v4  ;;  %v753_v3 = vld [vmem:[%s4336_s3 + $0x450] sm:$0xff]  ;;  %v747_v4 = vld [vmem:[%s4336_s3 + $0x420] sm:$0xff] }
  0xda   : > { %1293 = vmatprep.mubr.f32.mxu0 %v3039_v30  ;;  %1518 = vmatprep.mubr.f32.mxu1 %v2986_v0 }
  0xdb   : > { %2325 = vmatpush3.msra.mxu0 %v755_v27  ;;  %2416 = vmatpush3.msra.mxu1 %v756_v33  ;;  %v4462_v33 = vld [vmem:[#allocation18_spill] sm:$0xff] }
  0xdc   : > { %2326 = vmatprep.subr.mxu0 %v754_v60  ;;  %2401 = vmatprep.subr.mxu1 %v755_v27 }
  0xdd   : > { %1294 = vmatmul.mubr.f32.gmra.mxu0 %v2929_v36  ;;  %2223 = vmatmul.mubr.msk.f32.gmra.mxu1 %vm2835_vm1, %v3011_v10  ;;  %v750_v36 = vld [vmem:[%s4336_s3 + $0x438] sm:$0xff]  ;;  %v4450_v10 = vld [vmem:[#allocation7_spill] sm:$0xff] }
  0xde   : > { %2204 = vmatprep.mubr.msk.f32.mxu0 %vm505_vm2, %v3015_v13  ;;  %1523 = vmatprep.mubr.f32.mxu1 %v2994_v5 }
  0xdf   : > { %2327 = vmatpush3.msra.mxu0 %v754_v60  ;;  %2417 = vmatpush3.msra.mxu1 %v755_v27 }
  0xe0   : > { %2328 = vmatprep.subr.mxu0 %v753_v3  ;;  %2402 = vmatprep.subr.mxu1 %v754_v60 }
  0xe1   : > { %1299 = vmatmul.mubr.f32.gmra.mxu0 %v2940_v40  ;;  %1524 = vmatmul.mubr.f32.gmra.mxu1 %v3047_v42  ;;  %v749_v40 = vld [vmem:[%s4336_s3 + $0x430] sm:$0xff]  ;;  %v746_v42 = vld [vmem:[%s4336_s3 + $0x418] sm:$0xff] }
  0xe2   : > { %1303 = vmatprep.mubr.f32.mxu0 %v3094_v19  ;;  %1528 = vmatprep.mubr.f32.mxu1 %v3041_v38 }
  0xe3   : > { %2329 = vmatpush3.msra.mxu0 %v753_v3  ;;  %2418 = vmatpush3.msra.mxu1 %v754_v60 }
  0xe4   : > { %2330 = vmatprep.subr.mxu0 %v752_v15  ;;  %2403 = vmatprep.subr.mxu1 %v753_v3 }
  0xe5   : > { %1304 = vmatmul.mubr.f32.gmra.mxu0 %v2986_v0  ;;  %2225 = vmatmul.mubr.msk.f32.gmra.mxu1 %vm2835_vm1, %v3066_v50  ;;  %v748_v0 = vld [vmem:[%s4336_s3 + $0x428] sm:$0xff]  ;;  %v745_v50 = vld [vmem:[%s4336_s3 + $0x410] sm:$0xff] }
  0xe6   : > { %2205 = vmatprep.mubr.msk.f32.mxu0 %vm505_vm2, %v3070_v56  ;;  %1533 = vmatprep.mubr.f32.mxu1 %v3049_v43 }
  0xe7   : > { %2331 = vmatpush3.msra.mxu0 %v752_v15  ;;  %2419 = vmatpush3.msra.mxu1 %v753_v3 }
  0xe8   : > { %2332 = vmatprep.subr.mxu0 %v751_v20  ;;  %2404 = vmatprep.subr.mxu1 %v752_v15 }
  0xe9   : > { %1309 = vmatmul.mubr.f32.gmra.mxu0 %v2994_v5  ;;  %1534 = vmatmul.mubr.f32.gmra.mxu1 %v4446_v32  ;;  %v4449_v5 = vld [vmem:[#allocation8_spill] sm:$0xff] }
  0xea   : > { %1313 = vmatprep.mubr.f32.mxu0 %v4447_v39  ;;  %1538 = vmatprep.mubr.f32.mxu1 %v3096_v21  ;;  %v4464_v32 = vld [vmem:[#allocation24_spill] sm:$0xff] }
  0xeb   : > { %2333 = vmatpush3.msra.mxu0 %v751_v20  ;;  %2420 = vmatpush3.msra.mxu1 %v752_v15 }
  0xec   : > { %2334 = vmatprep.subr.mxu0 %v750_v36  ;;  %2405 = vmatprep.subr.mxu1 %v751_v20 }
  0xed   : > { %1314 = vmatmul.mubr.f32.gmra.mxu0 %v3041_v38  ;;  %2227 = vmatmul.mubr.msk.f32.gmra.mxu1 %vm2835_vm1, %v3121_v45  ;;  %v4451_v38 = vld [vmem:[#allocation9_spill] sm:$0xff] }
  0xee   : > { %2206 = vmatprep.mubr.msk.f32.mxu0 %vm505_vm2, %v4448_v44  ;;  %1543 = vmatprep.mubr.f32.mxu1 %v3104_v25  ;;  %v4455_v45 = vld [vmem:[#allocation13_spill] sm:$0xff] }
  0xef   : > { %2335 = vmatpush3.msra.mxu0 %v750_v36  ;;  %2421 = vmatpush3.msra.mxu1 %v751_v20  ;;  %v4463_v20 = vld [vmem:[#allocation21_spill] sm:$0xff] }
  0xf0   : > { %2336 = vmatprep.subr.mxu0 %v749_v40  ;;  %2406 = vmatprep.subr.mxu1 %v750_v36 }
  0xf1   : > { %1319 = vmatmul.mubr.f32.gmra.mxu0 %v3049_v43  ;;  %1544 = vmatmul.mubr.f32.gmra.mxu1 %v3157_v28  ;;  %v4452_v43 = vld [vmem:[#allocation12_spill] sm:$0xff] }
  0xf2   : > { %1323 = vmatprep.mubr.f32.mxu0 %v3203_v55  ;;  %1548 = vmatprep.mubr.f32.mxu1 %v3151_v22  ;;  %v4456_v28 = vld [vmem:[#allocation16_spill] sm:$0xff] }
  0xf3   : > { %2337 = vmatpush3.msra.mxu0 %v749_v40  ;;  %2422 = vmatpush3.msra.mxu1 %v750_v36 }
  0xf4   : > { %2338 = vmatprep.subr.mxu0 %v748_v0  ;;  %2407 = vmatprep.subr.mxu1 %v749_v40 }
  0xf5   : > { %1324 = vmatmul.mubr.f32.gmra.mxu0 %v3096_v21  ;;  %2229 = vmatmul.mubr.msk.f32.gmra.mxu1 %vm2835_vm1, %v3176_v57  ;;  %v4453_v21 = vld [vmem:[#allocation11_spill] sm:$0xff]  ;;  %v743_v57 = vld [vmem:[%s4336_s3 + $0x400] sm:$0xff] }
  0xf6   : > { %2207 = vmatprep.mubr.msk.f32.mxu0 %vm505_vm2, %v4449_v5  ;;  %1553 = vmatprep.mubr.f32.mxu1 %v4450_v10 }
  0xf7   : > { %2339 = vmatpush3.msra.mxu0 %v748_v0  ;;  %2423 = vmatpush3.msra.mxu1 %v749_v40 }
  0xf8   : > { %2340 = vmatprep.subr.mxu0 %v747_v4  ;;  %2408 = vmatprep.subr.mxu1 %v748_v0 }
  0xf9   : > { %1329 = vmatmul.mubr.f32.gmra.mxu0 %v3104_v25  ;;  %1554 = vmatmul.mubr.f32.gmra.mxu1 %v4451_v38  ;;  %v4454_v25 = vld [vmem:[#allocation10_spill] sm:$0xff] }
  0xfa   : > { %1333 = vmatprep.mubr.f32.mxu0 %v4452_v43  ;;  %1558 = vmatprep.mubr.f32.mxu1 %v3205_v48  ;;  %v4466_v38 = vld [vmem:[#allocation22_spill] sm:$0xff] }
  0xfb   : > { %2341 = vmatpush3.msra.mxu0 %v747_v4  ;;  %2424 = vmatpush3.msra.mxu1 %v748_v0 }
  0xfc   : > { %2342 = vmatprep.subr.mxu0 %v746_v42  ;;  %2409 = vmatprep.subr.mxu1 %v747_v4 }
  0xfd   : > { %1334 = vmatmul.mubr.f32.gmra.mxu0 %v3151_v22  ;;  %2231 = vmatmul.mubr.msk.f32.gmra.mxu1 %vm2835_vm1, %v3229_v12  ;;  %v744_v22 = vld [vmem:[%s4336_s3 + $0x408] sm:$0xff] }
  0xfe   : > { %2208 = vmatprep.mubr.msk.f32.mxu0 %vm505_vm2, %v4453_v21  ;;  %1563 = vmatprep.mubr.f32.mxu1 %v4454_v25  ;;  %v4457_v12 = vld [vmem:[#allocation15_spill] sm:$0xff] }
  0xff   : > { %2343 = vmatpush3.msra.mxu0 %v746_v42  ;;  %2425 = vmatpush3.msra.mxu1 %v747_v4 }
 0x100   : > { %2344 = vmatprep.subr.mxu0 %v745_v50  ;;  %2410 = vmatprep.subr.mxu1 %v746_v42 }
 0x101   : > { %1339 = vmatmul.mubr.f32.gmra.mxu0 %v4450_v10  ;;  %1564 = vmatmul.mubr.f32.gmra.mxu1 %v4455_v45  ;;  %v4465_v10 = vld [vmem:[#allocation23_spill] sm:$0xff] }
 0x102   : > { %1343 = vmatprep.mubr.f32.mxu0 %v4456_v28  ;;  %1568 = vmatprep.mubr.f32.mxu1 %v3256_v52 }
 0x103   : > { %2345 = vmatpush3.msra.mxu0 %v745_v50  ;;  %2426 = vmatpush3.msra.mxu1 %v746_v42 }
 0x104   : > { %2346 = vmatprep.subr.mxu0 %v744_v22  ;;  %2411 = vmatprep.subr.mxu1 %v745_v50 }
 0x105   : > { %1344 = vmatmul.mubr.f32.gmra.mxu0 %v3205_v48  ;;  %2233 = vmatmul.mubr.msk.f32.gmra.mxu1 %vm2835_vm1, %v3280_v61  ;;  %v4459_v48 = vld [vmem:[#allocation17_spill] sm:$0xff] }
 0x106   : > { %2209 = vmatprep.mubr.msk.f32.mxu0 %vm505_vm2, %v4457_v12  ;;  %1573 = vmatprep.mubr.f32.mxu1 %v4458_v16 }
 0x107   : > { %2347 = vmatpush3.msra.mxu0 %v744_v22  ;;  %2427 = vmatpush3.msra.mxu1 %v745_v50 }
 0x108   : > { %2348 = vmatprep.subr.mxu0 %v743_v57  ;;  %2412 = vmatprep.subr.mxu1 %v744_v22 }
 0x109   : > { %1349 = vmatmul.mubr.f32.gmra.mxu0 %v4454_v25  ;;  %1574 = vmatmul.mubr.f32.gmra.mxu1 %v4459_v48 }
 0x10a   : > { %1353 = vmatprep.mubr.f32.mxu0 %v4460_v54  ;;  %1578 = vmatprep.mubr.f32.mxu1 %v3307_v8 }
 0x10b   : > { %2349 = vmatpush3.msra.mxu0 %v743_v57  ;;  %2428 = vmatpush3.msra.mxu1 %v744_v22  ;;  %v4467_v22 = vld [vmem:[#allocation25_spill] sm:$0xff] }
 0x10c   : > { %2413 = vmatprep.subr.mxu1 %v743_v57 }
 0x10d   : > { %v825_v61 = vpop.f32.mrf.mxu0  ;;  %v1050_v1 = vpop.f32.mrf.mxu1  ;;  %1354 = vmatmul.mubr.f32.gmra.mxu0 %v3256_v52  ;;  %2235 = vmatmul.mubr.msk.f32.gmra.mxu1 %vm2835_vm1, %v3331_v11 }
 0x10e   : > { %v3836_v26 = vadd.f32 %v1050_v1, %v825_v61  ;;  %2210 = vmatprep.mubr.msk.f32.mxu0 %vm505_vm2, %v4461_v59  ;;  %1583 = vmatprep.mubr.f32.mxu1 %v4462_v33 }
 0x10f   : > { %v827_v27 = vpop.f32.mrf.mxu0  ;;  %v1052_v60 = vpop.f32.mrf.mxu1  ;;  %2429 = vmatpush3.msra.mxu1 %v743_v57  ;;  %v4468_v57 = vld [vmem:[#allocation28_spill] sm:$0xff] }
 0x110   : > { %v4470_v27 = vld [vmem:[#allocation26_spill] sm:$0xff] }
 0x111   : > { %v830_v3 = vpop.f32.mrf.mxu0  ;;  %v1055_v15 = vpop.f32.mrf.mxu1  ;;  %1359 = vmatmul.mubr.f32.gmra.mxu0 %v4458_v16  ;;  %1584 = vmatmul.mubr.f32.gmra.mxu1 %v4463_v20 }
 0x112   : > { %v3843_v52 = vadd.f32 %v1055_v15, %v830_v3  ;;  %1363 = vmatprep.mubr.f32.mxu0 %v4464_v32  ;;  %1588 = vmatprep.mubr.f32.mxu1 %v3358_v9 }
 0x113   : > { %v832_v11 = vpop.f32.mrf.mxu0  ;;  %v1057_v36 = vpop.f32.mrf.mxu1 }
 0x114   : > { %v4471_v11 = vld [vmem:[#allocation32_spill] sm:$0xff] }
 0x115   : > { %v835_v40 = vpop.f32.mrf.mxu0  ;;  %v1060_v0 = vpop.f32.mrf.mxu1  ;;  %1364 = vmatmul.mubr.f32.gmra.mxu0 %v3307_v8  ;;  %2237 = vmatmul.mubr.msk.f32.gmra.mxu1 %vm2835_vm1, %v3382_v29 }
 0x116   : > { %v3851_v4 = vadd.f32 %v1060_v0, %v835_v40  ;;  %2211 = vmatprep.mubr.msk.f32.mxu0 %vm505_vm2, %v4465_v10  ;;  %1593 = vmatprep.mubr.f32.mxu1 %v4466_v38 }
 0x117   : > { %v837_v42 = vpop.f32.mrf.mxu0  ;;  %v1062_v50 = vpop.f32.mrf.mxu1 }
 0x119   : > { %v840_v25 = vpop.f32.mrf.mxu0  ;;  %v1065_v45 = vpop.f32.mrf.mxu1  ;;  %1369 = vmatmul.mubr.f32.gmra.mxu0 %v4462_v33  ;;  %1594 = vmatmul.mubr.f32.gmra.mxu1 %v4467_v22  ;;  %v4469_v33 = vld [vmem:[#allocation27_spill] sm:$0xff] }
 0x11a   : > { %v3858_v8 = vadd.f32 %v1065_v45, %v840_v25  ;;  %1373 = vmatprep.mubr.f32.mxu0 %v4468_v57  ;;  %1598 = vmatprep.mubr.f32.mxu1 %v3409_v41 }
 0x11b   : > { %v842_v29 = vpop.f32.mrf.mxu0  ;;  %v1067_v16 = vpop.f32.mrf.mxu1 }
 0x11c   : > { %v4475_v16 = vld [vmem:[#allocation35_spill] sm:$0xff] }
 0x11d   : > { %v845_v48 = vpop.f32.mrf.mxu0  ;;  %v1070_v61 = vpop.f32.mrf.mxu1  ;;  %1374 = vmatmul.mubr.f32.gmra.mxu0 %v3358_v9  ;;  %2239 = vmatmul.mubr.msk.f32.gmra.mxu1 %vm2835_vm1, %v3433_v35  ;;  %v4472_v35 = vld [vmem:[#allocation29_spill] sm:$0xff] }
 0x11e   : > { %v3866_v1 = vadd.f32 %v1070_v61, %v845_v48  ;;  %2212 = vmatprep.mubr.msk.f32.mxu0 %vm505_vm2, %v4469_v33  ;;  %1603 = vmatprep.mubr.f32.mxu1 %v4470_v27 }
 0x11f   : > { %v847_v60 = vpop.f32.mrf.mxu0  ;;  %v1072_v3 = vpop.f32.mrf.mxu1 }
 0x121   : > { %v850_v15 = vpop.f32.mrf.mxu0  ;;  %v1075_v20 = vpop.f32.mrf.mxu1  ;;  %1379 = vmatmul.mubr.f32.gmra.mxu0 %v4466_v38  ;;  %1604 = vmatmul.mubr.f32.gmra.mxu1 %v3465_v58  ;;  %v4473_v38 = vld [vmem:[#allocation31_spill] sm:$0xff]  ;;  %v4474_v58 = vld [vmem:[#allocation30_spill] sm:$0xff] }
 0x122   : > { %v3873_v9 = vadd.f32 %v1075_v20, %v850_v15  ;;  %1383 = vmatprep.mubr.f32.mxu0 %v4471_v11  ;;  %1608 = vmatprep.mubr.f32.mxu1 %v4472_v35 }
 0x123   : > { %v852_v36 = vpop.f32.mrf.mxu0  ;;  %v1077_v40 = vpop.f32.mrf.mxu1 }
 0x125   : > { %v855_v0 = vpop.f32.mrf.mxu0  ;;  %v1080_v42 = vpop.f32.mrf.mxu1  ;;  %1384 = vmatmul.mubr.f32.gmra.mxu0 %v3409_v41  ;;  %2241 = vmatmul.mubr.msk.f32.gmra.mxu1 %vm2835_vm1, %v3484_v46  ;;  %v4476_v46 = vld [vmem:[#allocation33_spill] sm:$0xff] }
 0x126   : > { %v3881_v50 = vadd.f32 %v1080_v42, %v855_v0  ;;  %2213 = vmatprep.mubr.msk.f32.mxu0 %vm505_vm2, %v4473_v38  ;;  %1613 = vmatprep.mubr.f32.mxu1 %v4474_v58  ;;  %v4478_v0 = vld [vmem:[#allocation36_spill] sm:$0xff] }
 0x127   : > { %v857_v25 = vpop.f32.mrf.mxu0  ;;  %v1082_v45 = vpop.f32.mrf.mxu1 }
 0x129   : > { %v860_v22 = vpop.f32.mrf.mxu0  ;;  %v1085_v29 = vpop.f32.mrf.mxu1  ;;  %1389 = vmatmul.mubr.f32.gmra.mxu0 %v4470_v27  ;;  %1614 = vmatmul.mubr.f32.gmra.mxu1 %v3516_v62  ;;  %v4477_v27 = vld [vmem:[#allocation34_spill] sm:$0xff] }
 0x12a   : > { %v3888_v41 = vadd.f32 %v1085_v29, %v860_v22  ;;  %1393 = vmatprep.mubr.f32.mxu0 %v4475_v16  ;;  %1618 = vmatprep.mubr.f32.mxu1 %v4476_v46 }
 0x12b   : > { %v862_v48 = vpop.f32.mrf.mxu0  ;;  %v1087_v61 = vpop.f32.mrf.mxu1 }
 0x12d   : > { %v865_v60 = vpop.f32.mrf.mxu0  ;;  %v1090_v3 = vpop.f32.mrf.mxu1  ;;  %1394 = vmatmul.mubr.f32.gmra.mxu0 %v4472_v35  ;;  %2243 = vmatmul.mubr.msk.f32.gmra.mxu1 %vm2835_vm1, %v3535_v14 }
 0x12e   : > { %v3896_v15 = vadd.f32 %v1090_v3, %v865_v60  ;;  %2214 = vmatprep.mubr.msk.f32.mxu0 %vm505_vm2, %v4477_v27  ;;  %1623 = vmatprep.mubr.f32.mxu1 %v3519_v51 }
 0x12f   : > { %v867_v62 = vpop.f32.mrf.mxu0  ;;  %v1092_v20 = vpop.f32.mrf.mxu1 }
 0x130   : > { %v4480_v62 = vld [vmem:[#allocation38_spill] sm:$0xff] }
 0x131   : > { %v870_v36 = vpop.f32.mrf.mxu0  ;;  %v1095_v40 = vpop.f32.mrf.mxu1  ;;  %1399 = vmatmul.mubr.f32.gmra.mxu0 %v4474_v58  ;;  %1624 = vmatmul.mubr.f32.gmra.mxu1 %v3567_v24  ;;  %v3924_v20 = vrot.slane %v4480_v62, 1 }
 0x132   : > { %v3903_v35 = vadd.f32 %v1095_v40, %v870_v36  ;;  %1403 = vmatprep.mubr.f32.mxu0 %v4478_v0  ;;  %1628 = vmatprep.mubr.f32.mxu1 %v3562_v49 }
 0x133   : > { %v872_v14 = vpop.f32.mrf.mxu0  ;;  %v1097_v42 = vpop.f32.mrf.mxu1 }
 0x135   : > { %v875_v25 = vpop.f32.mrf.mxu0  ;;  %v1100_v45 = vpop.f32.mrf.mxu1  ;;  %1404 = vmatmul.mubr.f32.gmra.mxu0 %v4476_v46  ;;  %2245 = vmatmul.mubr.msk.f32.gmra.mxu1 %vm2835_vm1, %v3586_v17  ;;  %v4479_v17 = vld [vmem:[#allocation37_spill] sm:$0xff] }
 0x136   : > { %v3911_v22 = vadd.f32 %v1100_v45, %v875_v25  ;;  %2215 = vmatprep.mubr.msk.f32.mxu0 %vm505_vm2, %v3590_v37  ;;  %1633 = vmatprep.mubr.f32.mxu1 %v3571_v23  ;;  %v609_v3 = vrot.slane %v4479_v17, 1 }
 0x137   : > { %v877_v24 = vpop.f32.mrf.mxu0  ;;  %v1102_v58 = vpop.f32.mrf.mxu1 }
 0x138   : > { %v3937_v42 = vsel %vm505_vm2, %v609_v3, %v3924_v20 }
 0x139   : > { %v880_v29 = vpop.f32.mrf.mxu0  ;;  %v1105_v48 = vpop.f32.mrf.mxu1  ;;  %1409 = vmatmul.mubr.f32.gmra.mxu0 %v3519_v51  ;;  %1634 = vmatmul.mubr.f32.gmra.mxu1 %v3618_v34 }
 0x13a   : > { %v3918_v46 = vadd.f32 %v1105_v48, %v880_v29  ;;  %1413 = vmatprep.mubr.f32.mxu0 %v3661_v18  ;;  %1638 = vmatprep.mubr.f32.mxu1 %v4479_v17  ;;  %v4481_v48 = vld [vmem:[#allocation2_spill] sm:$0xff] }
 0x13b   : > { %v882_v61 = vpop.f32.mrf.mxu0  ;;  %v1107_v60 = vpop.f32.mrf.mxu1 }
 0x13d   : > { %v885_v36 = vpop.f32.mrf.mxu0  ;;  %v1110_v40 = vpop.f32.mrf.mxu1  ;;  %1414 = vmatmul.mubr.f32.gmra.mxu0 %v3562_v49  ;;  %2247 = vmatmul.mubr.msk.f32.gmra.mxu1 %vm2835_vm1, %v3637_v31 }
 0x13e   : > { %v3930_v51 = vadd.f32 %v1110_v40, %v885_v36  ;;  %2216 = vmatprep.mubr.msk.f32.mxu0 %vm505_vm2, %v3641_v7  ;;  %1643 = vmatprep.mubr.f32.mxu1 %v4480_v62 }
 0x13f   : > { %v887_v34 = vpop.f32.mrf.mxu0  ;;  %v1112_v14 = vpop.f32.mrf.mxu1 }
 0x141   : > { %v890_v25 = vpop.f32.mrf.mxu0  ;;  %v1115_v45 = vpop.f32.mrf.mxu1  ;;  %1419 = vmatmul.mubr.f32.gmra.mxu0 %v3571_v23  ;;  %1644 = vmatmul.mubr.f32.gmra.mxu1 %v3667_v6 }
 0x142   : > { %v3941_v49 = vadd.f32 %v1115_v45, %v890_v25  ;;  %1423 = vmatprep.mubr.f32.mxu0 %v3937_v42  ;;  %1648 = vmatprep.mubr.f32.mxu1 %v2447_v2 }
 0x143   : > { %v892_v31 = vpop.f32.mrf.mxu0  ;;  %v1117_v24 = vpop.f32.mrf.mxu1 }
 0x145   : > { %v895_v58 = vpop.f32.mrf.mxu0  ;;  %v1120_v29 = vpop.f32.mrf.mxu1  ;;  %1424 = vmatmul.mubr.f32.gmra.mxu0 %v4479_v17  ;;  %2249 = vmatmul.mubr.msk.f32.gmra.mxu1 %vm2835_vm1, %v4481_v48 }
 0x146   : > { %v3949_v61 = vadd.f32 %v1120_v29, %v895_v58  ;;  %2217 = vmatprep.mubr.msk.f32.mxu0 %vm505_vm2, %v3924_v20  ;;  %1653 = vmatprep.mubr.f32.mxu1 %v2447_v2 }
 0x147   : > { %v897_v23 = vpop.f32.mrf.mxu0  ;;  %v1122_v6 = vpop.f32.mrf.mxu1 }
 0x149   : > { %v900_v60 = vpop.f32.mrf.mxu0  ;;  %v1125_v3 = vpop.f32.mrf.mxu1  ;;  %1429 = vmatmul.mubr.f32.gmra.mxu0 %v4480_v62  ;;  %1654 = vmatmul.mubr.f32.gmra.mxu1 %v4481_v48 }
 0x14a   : > { %v3956_v17 = vadd.f32 %v1125_v3, %v900_v60  ;;  %2350 = vmatprep.mubr.f32.mxu0 %v2984_v63  ;;  %2374 = vmatprep.mubr.f32.mxu1 %v4464_v32 }
 0x14b   : > { %v902_v53 = vpop.f32.mrf.mxu0  ;;  %v1127_v36 = vpop.f32.mrf.mxu1 }
 0x14d   : > { %v905_v40 = vpop.f32.mrf.mxu0  ;;  %v1130_v34 = vpop.f32.mrf.mxu1  ;;  %2351 = vmatmul.mubr.msk.f32.vlgmr.msra.gmra.mxu0 %vm505_vm2, %v2960_v47  ;;  %2375 = vmatmul.mubr.msk.f32.vlgmr.msra.gmra.mxu1 %vm505_vm2, %v4465_v10 }
 0x14e   : > { %v3964_v2 = vadd.f32 %v1130_v34, %v905_v40  ;;  %2353 = vmatprep.mubr.f32.mxu0 %v3039_v30  ;;  %2377 = vmatprep.mubr.f32.mxu1 %v4468_v57 }
 0x14f   : > { %v907_v62 = vpop.f32.mrf.mxu0  ;;  %v1132_v63 = vpop.f32.mrf.mxu1 }
 0x151   : > { %v910_v14 = vpop.f32.mrf.mxu0  ;;  %v1135_v32 = vpop.f32.mrf.mxu1  ;;  %2354 = vmatmul.mubr.msk.f32.gmra.mxu0 %vm505_vm2, %v3015_v13  ;;  %2378 = vmatmul.mubr.msk.f32.gmra.mxu1 %vm505_vm2, %v4469_v33 }
 0x152   : > { %v3972_v47 = vadd.f32 %v1135_v32, %v910_v14  ;;  %2356 = vmatprep.mubr.f32.mxu0 %v3094_v19  ;;  %2380 = vmatprep.mubr.f32.mxu1 %v4471_v11 }
 0x153   : > { %v912_v10 = vpop.f32.mrf.mxu0  ;;  %v1137_v30 = vpop.f32.mrf.mxu1 }
 0x155   : > { %v915_v25 = vpop.f32.mrf.mxu0  ;;  %v1140_v57 = vpop.f32.mrf.mxu1  ;;  %2357 = vmatmul.mubr.msk.f32.gmra.mxu0 %vm505_vm2, %v3070_v56  ;;  %2381 = vmatmul.mubr.msk.f32.gmra.mxu1 %vm505_vm2, %v4473_v38 }
 0x156   : > { %v3980_v13 = vadd.f32 %v1140_v57, %v915_v25  ;;  %2359 = vmatprep.mubr.f32.mxu0 %v4447_v39  ;;  %2383 = vmatprep.mubr.f32.mxu1 %v4475_v16 }
 0x157   : > { %v917_v33 = vpop.f32.mrf.mxu0  ;;  %v1142_v19 = vpop.f32.mrf.mxu1 }
 0x159   : > { %v920_v45 = vpop.f32.mrf.mxu0  ;;  %v1145_v11 = vpop.f32.mrf.mxu1  ;;  %2360 = vmatmul.mubr.msk.f32.gmra.mxu0 %vm505_vm2, %v4448_v44  ;;  %2384 = vmatmul.mubr.msk.f32.gmra.mxu1 %vm505_vm2, %v4477_v27 }
 0x15a   : > { %v3988_v56 = vadd.f32 %v1145_v11, %v920_v45  ;;  %2362 = vmatprep.mubr.f32.mxu0 %v3203_v55  ;;  %2386 = vmatprep.mubr.f32.mxu1 %v4478_v0 }
 0x15b   : > { %v922_v38 = vpop.f32.mrf.mxu0  ;;  %v1147_v39 = vpop.f32.mrf.mxu1 }
 0x15d   : > { %v925_v31 = vpop.f32.mrf.mxu0  ;;  %v1150_v16 = vpop.f32.mrf.mxu1  ;;  %2363 = vmatmul.mubr.msk.f32.gmra.mxu0 %vm505_vm2, %v4449_v5  ;;  %2387 = vmatmul.mubr.msk.f32.gmra.mxu1 %vm505_vm2, %v3590_v37 }
 0x15e   : > { %v3996_v44 = vadd.f32 %v1150_v16, %v925_v31  ;;  %2365 = vmatprep.mubr.f32.mxu0 %v4452_v43  ;;  %2389 = vmatprep.mubr.f32.mxu1 %v3661_v18 }
 0x15f   : > { %v927_v27 = vpop.f32.mrf.mxu0  ;;  %v1152_v55 = vpop.f32.mrf.mxu1 }
 0x161   : > { %v930_v24 = vpop.f32.mrf.mxu0  ;;  %v1155_v0 = vpop.f32.mrf.mxu1  ;;  %2366 = vmatmul.mubr.msk.f32.gmra.mxu0 %vm505_vm2, %v4453_v21  ;;  %2390 = vmatmul.mubr.msk.f32.gmra.mxu1 %vm505_vm2, %v3641_v7  ;;  %v4482_v7 = vld [vmem:[#allocation3_spill] sm:$0xff] }
 0x162   : > { %v4004_v5 = vadd.f32 %v1155_v0, %v930_v24  ;;  %2368 = vmatprep.mubr.f32.mxu0 %v4456_v28  ;;  %2392 = vmatprep.mubr.f32.mxu1 %v3937_v42 }
 0x163   : > { %v932_v37 = vpop.f32.mrf.mxu0  ;;  %v1157_v43 = vpop.f32.mrf.mxu1 }
 0x165   : > { %v935_v58 = vpop.f32.mrf.mxu0  ;;  %v1160_v18 = vpop.f32.mrf.mxu1  ;;  %2369 = vmatmul.mubr.msk.f32.gmra.mxu0 %vm505_vm2, %v4457_v12  ;;  %2393 = vmatmul.mubr.msk.f32.gmra.mxu1 %vm505_vm2, %v3924_v20 }
 0x166   : > { %v4012_v21 = vadd.f32 %v1160_v18, %v935_v58  ;;  %2371 = vmatprep.mubr.f32.mxu0 %v4460_v54  ;;  %2395 = vmatprep.mubr.f32.mxu1 %v4482_v7 }
 0x167   : > { %v937_v29 = vpop.f32.mrf.mxu0  ;;  %v1162_v28 = vpop.f32.mrf.mxu1 }
 0x169   : > { %v940_v48 = vpop.f32.mrf.mxu0  ;;  %v1165_v42 = vpop.f32.mrf.mxu1  ;;  %2372 = vmatmul.mubr.msk.f32.gmra.mxu0 %vm505_vm2, %v4461_v59  ;;  %2396 = vmatmul.mubr.msk.f32.gmra.mxu1 %vm505_vm2, %v4482_v7 }
 0x16a   : > { %v4020_v12 = vadd.f32 %v1165_v42, %v940_v48 }
 0x16b   : > { %v942_v23 = vpop.f32.mrf.mxu0  ;;  %v1167_v20 = vpop.f32.mrf.mxu1 }
 0x16d   : > { %v945_v6 = vpop.f32.mrf.mxu0  ;;  %v1170_v60 = vpop.f32.mrf.mxu1 }
 0x16e   : > { %v4022_v3 = vadd.f32 %v1170_v60, %v945_v6 }
 0x16f   : > { %v947_v54 = vpop.f32.mrf.mxu0  ;;  %v1172_v53 = vpop.f32.mrf.mxu1 }
 0x171   : > { %v950_v36 = vpop.f32.mrf.mxu0  ;;  %v1175_v40 = vpop.f32.mrf.mxu1 }
 0x172   : > { %v4024_v34 = vadd.f32 %v1175_v40, %v950_v36 }
 0x173   : > { %v952_v62 = vpop.f32.mrf.mxu0  ;;  %v1177_v63 = vpop.f32.mrf.mxu1 }
 0x175   : > { %v955_v59 = vpop.f32.mrf.mxu0  ;;  %v1180_v14 = vpop.f32.mrf.mxu1 }
 0x176   : > { %v4026_v32 = vadd.f32 %v1180_v14, %v955_v59 }
 0x177   : > { %v957_v10 = vpop.f32.mrf.mxu0  ;;  %v1182_v30 = vpop.f32.mrf.mxu1 }
 0x179   : > { %v960_v25 = vpop.f32.mrf.mxu0  ;;  %v1185_v57 = vpop.f32.mrf.mxu1 }
 0x17a   : > { %v4028_v33 = vadd.f32 %v1185_v57, %v960_v25 }
 0x17b   : > { %v962_v19 = vpop.f32.mrf.mxu0  ;;  %v1187_v45 = vpop.f32.mrf.mxu1 }
 0x17d   : > { %v965_v11 = vpop.f32.mrf.mxu0  ;;  %v1190_v38 = vpop.f32.mrf.mxu1 }
 0x17e   : > { %v4030_v39 = vadd.f32 %v1190_v38, %v965_v11 }
 0x17f   : > { %v967_v31 = vpop.f32.mrf.mxu0  ;;  %v1192_v16 = vpop.f32.mrf.mxu1 }
 0x181   : > { %v970_v27 = vpop.f32.mrf.mxu0  ;;  %v1195_v55 = vpop.f32.mrf.mxu1 }
 0x182   : > { %v4032_v24 = vadd.f32 %v1195_v55, %v970_v27 }
 0x183   : > { %v972_v0 = vpop.f32.mrf.mxu0  ;;  %v1197_v37 = vpop.f32.mrf.mxu1 }
 0x185   : > { %v975_v43 = vpop.f32.mrf.mxu0  ;;  %v1200_v58 = vpop.f32.mrf.mxu1 }
 0x186   : > { %v4034_v18 = vadd.f32 %v1200_v58, %v975_v43 }
 0x187   : > { %v977_v7 = vpop.f32.mrf.mxu0  ;;  %v1202_v29 = vpop.f32.mrf.mxu1 }
 0x188   : > { %4483 = vst [vmem:[#allocation4_spill] sm:$0xff] %v4034_v18 }
 0x189   : > { %v980_v28 = vpop.f32.mrf.mxu0  ;;  %v1205_v48 = vpop.f32.mrf.mxu1 }
 0x18a   : > { %v4036_v42 = vadd.f32 %v1205_v48, %v980_v28 }
 0x18b   : > { %v982_v23 = vpop.f32.mrf.mxu0  ;;  %v1207_v20 = vpop.f32.mrf.mxu1 }
 0x18c   : > { %4484 = vst [vmem:[#allocation6_spill] sm:$0xff] %v4036_v42 }
 0x18d   : > { %v1275_v6 = vpop.f32.mrf.mxu0  ;;  %v1500_v60 = vpop.f32.mrf.mxu1 }
 0x18e   : > { %v1276_v54 = vadd.f32 %v1275_v6, %v3836_v26 }
 0x18f   : > { %v1277_v53 = vpop.f32.mrf.mxu0  ;;  %v1502_v36 = vpop.f32.mrf.mxu1 }
 0x190   : > { %v4039_v40 = vadd.f32 %v1500_v60, %v1276_v54 }
 0x191   : > { %v1280_v62 = vpop.f32.mrf.mxu0  ;;  %v1505_v63 = vpop.f32.mrf.mxu1 }
 0x192   : > { %v1281_v59 = vadd.f32 %v1280_v62, %v3843_v52 }
 0x193   : > { %v1282_v14 = vpop.f32.mrf.mxu0  ;;  %v1507_v10 = vpop.f32.mrf.mxu1 }
 0x194   : > { %v4042_v30 = vadd.f32 %v1505_v63, %v1281_v59 }
 0x195   : > { %v1285_v25 = vpop.f32.mrf.mxu0  ;;  %v1510_v57 = vpop.f32.mrf.mxu1 }
 0x196   : > { %v1286_v19 = vadd.f32 %v1285_v25, %v3851_v4 }
 0x197   : > { %v1287_v45 = vpop.f32.mrf.mxu0  ;;  %v1512_v11 = vpop.f32.mrf.mxu1 }
 0x198   : > { %v4045_v38 = vadd.f32 %v1510_v57, %v1286_v19 }
 0x199   : > { %v1290_v26 = vpop.f32.mrf.mxu0  ;;  %v1515_v31 = vpop.f32.mrf.mxu1 }
 0x19a   : > { %v1291_v16 = vadd.f32 %v1290_v26, %v3858_v8 }
 0x19b   : > { %v1292_v27 = vpop.f32.mrf.mxu0  ;;  %v1517_v55 = vpop.f32.mrf.mxu1 }
 0x19c   : > { %v4048_v0 = vadd.f32 %v1515_v31, %v1291_v16 }
 0x19d   : > { %v1295_v52 = vpop.f32.mrf.mxu0  ;;  %v1520_v37 = vpop.f32.mrf.mxu1 }
 0x19e   : > { %v1296_v43 = vadd.f32 %v1295_v52, %v3866_v1 }
 0x19f   : > { %v1297_v58 = vpop.f32.mrf.mxu0  ;;  %v1522_v7 = vpop.f32.mrf.mxu1 }
 0x1a0   : > { %v4051_v29 = vadd.f32 %v1520_v37, %v1296_v43 }
 0x1a1   : > { %v1300_v4 = vpop.f32.mrf.mxu0  ;;  %v1525_v28 = vpop.f32.mrf.mxu1 }
 0x1a2   : > { %v1301_v48 = vadd.f32 %v1300_v4, %v3873_v9 }
 0x1a3   : > { %v1302_v23 = vpop.f32.mrf.mxu0  ;;  %v1527_v20 = vpop.f32.mrf.mxu1 }
 0x1a4   : > { %v4054_v6 = vadd.f32 %v1525_v28, %v1301_v48 }
 0x1a5   : > { %v1305_v8 = vpop.f32.mrf.mxu0  ;;  %v1530_v60 = vpop.f32.mrf.mxu1 }
 0x1a6   : > { %v1306_v54 = vadd.f32 %v1305_v8, %v3881_v50 }
 0x1a7   : > { %v1307_v53 = vpop.f32.mrf.mxu0  ;;  %v1532_v36 = vpop.f32.mrf.mxu1 }
 0x1a8   : > { %v4057_v62 = vadd.f32 %v1530_v60, %v1306_v54 }
 0x1a9   : > { %v1310_v1 = vpop.f32.mrf.mxu0  ;;  %v1535_v63 = vpop.f32.mrf.mxu1 }
 0x1aa   : > { %v1311_v59 = vadd.f32 %v1310_v1, %v3888_v41 }
 0x1ab   : > { %v1312_v14 = vpop.f32.mrf.mxu0  ;;  %v1537_v10 = vpop.f32.mrf.mxu1 }
 0x1ac   : > { %v4060_v25 = vadd.f32 %v1535_v63, %v1311_v59 }
 0x1ad   : > { %v1315_v9 = vpop.f32.mrf.mxu0  ;;  %v1540_v57 = vpop.f32.mrf.mxu1 }
 0x1ae   : > { %v1316_v19 = vadd.f32 %v1315_v9, %v3896_v15 }
 0x1af   : > { %v1317_v45 = vpop.f32.mrf.mxu0  ;;  %v1542_v11 = vpop.f32.mrf.mxu1 }
 0x1b0   : > { %v4063_v26 = vadd.f32 %v1540_v57, %v1316_v19 }
 0x1b1   : > { %v1320_v50 = vpop.f32.mrf.mxu0  ;;  %v1545_v31 = vpop.f32.mrf.mxu1 }
 0x1b2   : > { %v1321_v16 = vadd.f32 %v1320_v50, %v3903_v35 }
 0x1b3   : > { %v1322_v27 = vpop.f32.mrf.mxu0  ;;  %v1547_v55 = vpop.f32.mrf.mxu1 }
 0x1b4   : > { %v4066_v52 = vadd.f32 %v1545_v31, %v1321_v16 }
 0x1b5   : > { %v1325_v41 = vpop.f32.mrf.mxu0  ;;  %v1550_v37 = vpop.f32.mrf.mxu1 }
 0x1b6   : > { %v1326_v43 = vadd.f32 %v1325_v41, %v3911_v22 }
 0x1b7   : > { %v1327_v58 = vpop.f32.mrf.mxu0  ;;  %v1552_v7 = vpop.f32.mrf.mxu1 }
 0x1b8   : > { %v4069_v4 = vadd.f32 %v1550_v37, %v1326_v43 }
 0x1b9   : > { %v1330_v15 = vpop.f32.mrf.mxu0  ;;  %v1555_v28 = vpop.f32.mrf.mxu1 }
 0x1ba   : > { %v1331_v48 = vadd.f32 %v1330_v15, %v3918_v46 }
 0x1bb   : > { %v1332_v23 = vpop.f32.mrf.mxu0  ;;  %v1557_v20 = vpop.f32.mrf.mxu1 }
 0x1bc   : > { %v4072_v8 = vadd.f32 %v1555_v28, %v1331_v48 }
 0x1bd   : > { %v1335_v35 = vpop.f32.mrf.mxu0  ;;  %v1560_v60 = vpop.f32.mrf.mxu1 }
 0x1be   : > { %v1336_v54 = vadd.f32 %v1335_v35, %v3930_v51 }
 0x1bf   : > { %v1337_v53 = vpop.f32.mrf.mxu0  ;;  %v1562_v36 = vpop.f32.mrf.mxu1 }
 0x1c0   : > { %v4075_v1 = vadd.f32 %v1560_v60, %v1336_v54 }
 0x1c1   : > { %v1340_v22 = vpop.f32.mrf.mxu0  ;;  %v1565_v63 = vpop.f32.mrf.mxu1 }
 0x1c2   : > { %4485 = vst [vmem:[#allocation5_spill] sm:$0xff] %v4075_v1  ;;  %v1341_v59 = vadd.f32 %v1340_v22, %v3941_v49 }
 0x1c3   : > { %v1342_v14 = vpop.f32.mrf.mxu0  ;;  %v1567_v10 = vpop.f32.mrf.mxu1 }
 0x1c4   : > { %v4078_v9 = vadd.f32 %v1565_v63, %v1341_v59 }
 0x1c5   : > { %v1345_v46 = vpop.f32.mrf.mxu0  ;;  %v1570_v57 = vpop.f32.mrf.mxu1 }
 0x1c6   : > { %4486 = vst [vmem:[#allocation8_spill] sm:$0xff] %v4078_v9  ;;  %v1346_v19 = vadd.f32 %v1345_v46, %v3949_v61 }
 0x1c7   : > { %v1347_v45 = vpop.f32.mrf.mxu0  ;;  %v1572_v11 = vpop.f32.mrf.mxu1 }
 0x1c8   : > { %v4081_v50 = vadd.f32 %v1570_v57, %v1346_v19 }
 0x1c9   : > { %v1350_v51 = vpop.f32.mrf.mxu0  ;;  %v1575_v31 = vpop.f32.mrf.mxu1 }
 0x1ca   : > { %4487 = vst [vmem:[#allocation7_spill] sm:$0xff] %v4081_v50  ;;  %v1351_v16 = vadd.f32 %v1350_v51, %v3956_v17 }
 0x1cb   : > { %v1352_v27 = vpop.f32.mrf.mxu0  ;;  %v1577_v55 = vpop.f32.mrf.mxu1 }
 0x1cc   : > { %v4084_v41 = vadd.f32 %v1575_v31, %v1351_v16 }
 0x1cd   : > { %v1355_v49 = vpop.f32.mrf.mxu0  ;;  %v1580_v37 = vpop.f32.mrf.mxu1 }
 0x1ce   : > { %4488 = vst [vmem:[#allocation9_spill] sm:$0xff] %v4084_v41  ;;  %v1356_v43 = vadd.f32 %v1355_v49, %v3964_v2 }
 0x1cf   : > { %v1357_v58 = vpop.f32.mrf.mxu0  ;;  %v1582_v7 = vpop.f32.mrf.mxu1 }
 0x1d0   : > { %v4087_v15 = vadd.f32 %v1580_v37, %v1356_v43 }
 0x1d1   : > { %v1360_v61 = vpop.f32.mrf.mxu0  ;;  %v1585_v28 = vpop.f32.mrf.mxu1 }
 0x1d3   : > { %v1362_v48 = vpop.f32.mrf.mxu0  ;;  %v1587_v23 = vpop.f32.mrf.mxu1 }
 0x1d5   : > { %v1365_v20 = vpop.f32.mrf.mxu0  ;;  %v4089_v35 = vpop.f32.mrf.mxu1 }
 0x1d6   : > { %v1366_v42 = vadd.f32 %v1365_v20, %v3980_v13 }
 0x1d7   : > { %v1367_v17 = vpop.f32.mrf.mxu0  ;;  %v1592_v60 = vpop.f32.mrf.mxu1 }
 0x1d9   : > { %v1370_v54 = vpop.f32.mrf.mxu0  ;;  %v4091_v53 = vpop.f32.mrf.mxu1 }
 0x1db   : > { %v1372_v36 = vpop.f32.mrf.mxu0  ;;  %v1597_v22 = vpop.f32.mrf.mxu1 }
 0x1dd   : > { %v4093_v63 = vpop.f32.mrf.mxu0  ;;  %v4095_v2 = vpop.f32.mrf.mxu1 }
 0x1df   : > { %v1377_v59 = vpop.f32.mrf.mxu0  ;;  %v1602_v14 = vpop.f32.mrf.mxu1 }
 0x1e1   : > { %v1380_v10 = vpop.f32.mrf.mxu0  ;;  %v4097_v46 = vpop.f32.mrf.mxu1 }
 0x1e3   : > { %v1382_v57 = vpop.f32.mrf.mxu0  ;;  %v1607_v19 = vpop.f32.mrf.mxu1 }
 0x1e5   : > { %v4099_v45 = vpop.f32.mrf.mxu0  ;;  %v4101_v11 = vpop.f32.mrf.mxu1 }
 0x1e7   : > { %v1387_v51 = vpop.f32.mrf.mxu0  ;;  %v1612_v31 = vpop.f32.mrf.mxu1 }
 0x1e9   : > { %v4103_v16 = vpop.f32.mrf.mxu0  ;;  %v4105_v27 = vpop.f32.mrf.mxu1 }
 0x1eb   : > { %v1392_v55 = vpop.f32.mrf.mxu0  ;;  %v1617_v49 = vpop.f32.mrf.mxu1 }
 0x1ed   : > { %v4107_v37 = vpop.f32.mrf.mxu0  ;;  %v4109_v43 = vpop.f32.mrf.mxu1 }
 0x1ef   : > { %v1397_v58 = vpop.f32.mrf.mxu0  ;;  %v1622_v7 = vpop.f32.mrf.mxu1 }
 0x1f1   : > { %v4111_v48 = vpop.f32.mrf.mxu0  ;;  %v4113_v23 = vpop.f32.mrf.mxu1 }
 0x1f3   : > { %v1402_v17 = vpop.f32.mrf.mxu0  ;;  %v1627_v60 = vpop.f32.mrf.mxu1 }
 0x1f5   : > { %v4115_v36 = vpop.f32.mrf.mxu0  ;;  %v4117_v22 = vpop.f32.mrf.mxu1 }
 0x1f7   : > { %v1407_v59 = vpop.f32.mrf.mxu0  ;;  %v1632_v14 = vpop.f32.mrf.mxu1 }
 0x1f9   : > { %v4119_v57 = vpop.f32.mrf.mxu0  ;;  %v4121_v19 = vpop.f32.mrf.mxu1 }
 0x1fb   : > { %v1412_v51 = vpop.f32.mrf.mxu0  ;;  %v1637_v31 = vpop.f32.mrf.mxu1 }
 0x1fc   : > { %v1361_v31 = vadd.f32 %v1360_v61, %v3972_v47 }
 0x1fd   : > { %v4123_v55 = vpop.f32.mrf.mxu0  ;;  %v4125_v49 = vpop.f32.mrf.mxu1 }
 0x1fe   : > { %4489 = vst [vmem:[#allocation12_spill] sm:$0xff] %v4125_v49  ;;  %v1586_v9 = vadd.f32 %v1585_v28, %v1361_v31 }
 0x1ff   : > { %v1417_v58 = vpop.f32.mrf.mxu0  ;;  %v1642_v7 = vpop.f32.mrf.mxu1 }
 0x201   : > { %v4127_v17 = vpop.f32.mrf.mxu0  ;;  %v4129_v60 = vpop.f32.mrf.mxu1 }
 0x203   : > { %v1422_v50 = vpop.f32.mrf.mxu0  ;;  %v1647_v59 = vpop.f32.mrf.mxu1 }
 0x204   : > { %v1371_v50 = vadd.f32 %v1370_v54, %v3988_v56  ;;  %v1591_v54 = vadd.f32 %v4089_v35, %v1366_v42  ;;  %v1376_v42 = vadd.f32 %v4093_v63, %v3996_v44 }
 0x205   : > { %v4131_v14 = vpop.f32.mrf.mxu0  ;;  %v4133_v41 = vpop.f32.mrf.mxu1 }
 0x207   : > { %v1427_v1 = vpop.f32.mrf.mxu0  ;;  %v1652_v51 = vpop.f32.mrf.mxu1 }
 0x208   : > { %v1596_v51 = vadd.f32 %v4091_v53, %v1371_v50 }
 0x209   : > { %v4136_v18 = vpop.f32.mrf.mxu0  ;;  %v4138_v49 = vpop.f32.mrf.mxu1 }
 0x20b   : > { %v1432_v58 = vpop.f32.mrf.mxu0  ;;  %v1657_v7 = vpop.f32.mrf.mxu1 }
 0x20d   : > { %v2352_v47 = vpop.f32.mrf.mxu0  ;;  %v2376_v1 = vpop.f32.mrf.mxu1 }
 0x20e   : > { %v1731_v61 = vadd.f32 %v2352_v47, %v4042_v30  ;;  %v4150_v59 = vadd.f32 %v2376_v1, %v1586_v9  ;;  %v1381_v30 = vadd.f32 %v1380_v10, %v4004_v5 }
 0x20f   : > { %v1725_v28 = vpop.f32.mrf.mxu0  ;;  %v1805_v13 = vpop.f32.mrf.mxu1 }
 0x210   : > { %1885 = vst [vmem:[%s4147_s6 + $0x8] sm:$0xff] %v1731_v61  ;;  %1901 = vst [vmem:[%s4147_s6 + $0x88] sm:$0xff] %v4150_v59  ;;  %v1726_v56 = vadd.f32 %v1725_v28, %v4039_v40  ;;  %v4157_v20 = vadd.f32 %v1805_v13, %v4087_v15  ;;  %v1954_v58 = vmul.f32 %v1731_v61, %v1731_v61 }
 0x211   : > { %v2355_v9 = vpop.f32.mrf.mxu0  ;;  %v2379_v31 = vpop.f32.mrf.mxu1  ;;  %v1606_v1 = vadd.f32 %v4097_v46, %v1381_v30  ;;  %v1601_v13 = vadd.f32 %v4095_v2, %v1376_v42  ;;  %v1386_v46 = vadd.f32 %v4099_v45, %v4012_v21 }
 0x212   : > { %1884 = vst [vmem:[%s4147_s6] sm:$0xff] %v1726_v56  ;;  %v1916_v7 = vadd.f32 %v1731_v61, %v1726_v56  ;;  %v1953_v47 = vmul.f32 %v1726_v56, %v1726_v56  ;;  %1900 = vst [vmem:[%s4147_s6 + $0x80] sm:$0xff] %v4157_v20  ;;  %v1741_v40 = vadd.f32 %v2355_v9, %v4048_v0 }
 0x213   : > { %v4168_v15 = vadd.f32 %v2379_v31, %v1596_v51  ;;  %v1735_v35 = vpop.f32.mrf.mxu0  ;;  %v1815_v5 = vpop.f32.mrf.mxu1  ;;  %v1391_v61 = vadd.f32 %v4103_v16, %v4020_v12 }
 0x214   : > { %v1985_v53 = vadd.f32 %v1954_v58, %v1953_v47  ;;  %1887 = vst [vmem:[%s4147_s6 + $0x18] sm:$0xff] %v1741_v40  ;;  %v1736_v10 = vadd.f32 %v1735_v35, %v4045_v38  ;;  %v4172_v50 = vadd.f32 %v1815_v5, %v1591_v54  ;;  %v1956_v54 = vmul.f32 %v1741_v40, %v1741_v40 }
 0x215   : > { %1903 = vst [vmem:[%s4147_s6 + $0x98] sm:$0xff] %v4168_v15  ;;  %v2358_v44 = vpop.f32.mrf.mxu0  ;;  %v2382_v0 = vpop.f32.mrf.mxu1  ;;  %v1616_v31 = vadd.f32 %v4105_v27, %v1391_v61  ;;  %v1396_v27 = vadd.f32 %v4107_v37, %v4022_v3 }
 0x216   : > { %1886 = vst [vmem:[%s4147_s6 + $0x10] sm:$0xff] %v1736_v10  ;;  %v1917_v63 = vadd.f32 %v1916_v7, %v1736_v10  ;;  %v1955_v28 = vmul.f32 %v1736_v10, %v1736_v10  ;;  %1902 = vst [vmem:[%s4147_s6 + $0x90] sm:$0xff] %v4172_v50  ;;  %v1751_v38 = vadd.f32 %v2358_v44, %v4054_v6 }
 0x217   : > { %v4186_v12 = vadd.f32 %v2382_v0, %v1606_v1  ;;  %v1745_v16 = vpop.f32.mrf.mxu0  ;;  %v1825_v56 = vpop.f32.mrf.mxu1  ;;  %v1401_v6 = vadd.f32 %v4111_v48, %v4024_v34 }
 0x218   : > { %v1986_v51 = vadd.f32 %v1985_v53, %v1955_v28  ;;  %1889 = vst [vmem:[%s4147_s6 + $0x28] sm:$0xff] %v1751_v38  ;;  %v1746_v30 = vadd.f32 %v1745_v16, %v4051_v29  ;;  %v1918_v9 = vadd.f32 %v1917_v63, %v1741_v40  ;;  %v4195_v2 = vadd.f32 %v1825_v56, %v1601_v13 }
 0x219   : > { %1905 = vst [vmem:[%s4147_s6 + $0xa8] sm:$0xff] %v4186_v12  ;;  %v2361_v21 = vpop.f32.mrf.mxu0  ;;  %v2385_v45 = vpop.f32.mrf.mxu1  ;;  %v1611_v40 = vadd.f32 %v4101_v11, %v1386_v46  ;;  %v1958_v35 = vmul.f32 %v1751_v38, %v1751_v38  ;;  %v1411_v11 = vadd.f32 %v4119_v57, %v4028_v33  ;;  %v1621_v63 = vadd.f32 %v4109_v43, %v1396_v27 }
 0x21a   : > { %1888 = vst [vmem:[%s4147_s6 + $0x20] sm:$0xff] %v1746_v30  ;;  %v1919_v58 = vadd.f32 %v1918_v9, %v1746_v30  ;;  %v1957_v7 = vmul.f32 %v1746_v30, %v1746_v30  ;;  %v1987_v47 = vadd.f32 %v1986_v51, %v1956_v54  ;;  %v1761_v29 = vadd.f32 %v2361_v21, %v4060_v25 }
 0x21b   : > { %1904 = vst [vmem:[%s4147_s6 + $0xa0] sm:$0xff] %v4195_v2  ;;  %v4204_v34 = vadd.f32 %v2385_v45, %v1616_v31  ;;  %v1755_v48 = vpop.f32.mrf.mxu0  ;;  %v1835_v42 = vpop.f32.mrf.mxu1  ;;  %v1626_v25 = vadd.f32 %v4113_v23, %v1401_v6  ;;  %v1406_v23 = vadd.f32 %v4115_v36, %v4026_v32  ;;  %v1421_v43 = vadd.f32 %v4127_v17, %v4032_v24 }
 0x21c   : > { %v1988_v5 = vadd.f32 %v1987_v47, %v1957_v7  ;;  %1891 = vst [vmem:[%s4147_s6 + $0x38] sm:$0xff] %v1761_v29  ;;  %v1756_v53 = vadd.f32 %v1755_v48, %v4057_v62  ;;  %v1920_v10 = vadd.f32 %v1919_v58, %v1751_v38  ;;  %v4213_v3 = vadd.f32 %v1835_v42, %v1611_v40  ;;  %v4491_v48 = vld [vmem:[#allocation8_spill] sm:$0xff] }
 0x21d   : > { %1907 = vst [vmem:[%s4147_s6 + $0xb8] sm:$0xff] %v4204_v34  ;;  %v2364_v37 = vpop.f32.mrf.mxu0  ;;  %v2388_v1 = vpop.f32.mrf.mxu1  ;;  %v1960_v38 = vmul.f32 %v1761_v29, %v1761_v29  ;;  %v1631_v9 = vadd.f32 %v4117_v22, %v1406_v23  ;;  %v4490_v22 = vld [vmem:[#allocation6_spill] sm:$0xff]  ;;  %v4492_v42 = vld [vmem:[#allocation12_spill] sm:$0xff] }
 0x21e   : > { %1890 = vst [vmem:[%s4147_s6 + $0x30] sm:$0xff] %v1756_v53  ;;  %v1921_v61 = vadd.f32 %v1920_v10, %v1756_v53  ;;  %v1959_v44 = vmul.f32 %v1756_v53, %v1756_v53  ;;  %v1989_v0 = vadd.f32 %v1988_v5, %v1958_v35  ;;  %v1771_v62 = vadd.f32 %v2364_v37, %v4066_v52  ;;  %v4494_v37 = vld [vmem:[#allocation5_spill] sm:$0xff] }
 0x21f   : > { %1906 = vst [vmem:[%s4147_s6 + $0xb0] sm:$0xff] %v4213_v3  ;;  %v4222_v33 = vadd.f32 %v2388_v1, %v1626_v25  ;;  %v1765_v57 = vpop.f32.mrf.mxu0  ;;  %v1845_v28 = vpop.f32.mrf.mxu1  ;;  %v1636_v52 = vadd.f32 %v4121_v19, %v1411_v11  ;;  %v1416_v19 = vadd.f32 %v4123_v55, %v4030_v39  ;;  %v1431_v7 = vadd.f32 %v4136_v18, %v4490_v22 }
 0x220   : > { %v1990_v13 = vadd.f32 %v1989_v0, %v1959_v44  ;;  %1893 = vst [vmem:[%s4147_s6 + $0x48] sm:$0xff] %v1771_v62  ;;  %v1766_v46 = vadd.f32 %v1765_v57, %v4063_v26  ;;  %v1922_v16 = vadd.f32 %v1921_v61, %v1761_v29  ;;  %v4231_v32 = vadd.f32 %v1845_v28, %v1621_v63  ;;  %v4495_v28 = vld [vmem:[#allocation9_spill] sm:$0xff] }
 0x221   : > { %1909 = vst [vmem:[%s4147_s6 + $0xc8] sm:$0xff] %v4222_v33  ;;  %v2367_v36 = vpop.f32.mrf.mxu0  ;;  %v2391_v56 = vpop.f32.mrf.mxu1  ;;  %v1962_v6 = vmul.f32 %v1771_v62, %v1771_v62  ;;  %v1641_v35 = vadd.f32 %v4492_v42, %v1416_v19  ;;  %v1656_v44 = vadd.f32 %v4138_v49, %v1431_v7  ;;  %v1971_v22 = vmul.f32 %v4172_v50, %v4172_v50 }
 0x222   : > { %1892 = vst [vmem:[%s4147_s6 + $0x40] sm:$0xff] %v1766_v46  ;;  %v1923_v54 = vadd.f32 %v1922_v16, %v1766_v46  ;;  %v1961_v51 = vmul.f32 %v1766_v46, %v1766_v46  ;;  %v1991_v30 = vadd.f32 %v1990_v13, %v1960_v38  ;;  %v1781_v26 = vadd.f32 %v2367_v36, %v4072_v8  ;;  %v4496_v36 = vld [vmem:[#allocation7_spill] sm:$0xff] }
 0x223   : > { %1908 = vst [vmem:[%s4147_s6 + $0xc0] sm:$0xff] %v4231_v32  ;;  %v4240_v24 = vadd.f32 %v2391_v56, %v1636_v52  ;;  %v1775_v17 = vpop.f32.mrf.mxu0  ;;  %v1855_v31 = vpop.f32.mrf.mxu1  ;;  %v1646_v8 = vadd.f32 %v4129_v60, %v1421_v43  ;;  %v4493_v60 = vld [vmem:[#allocation4_spill] sm:$0xff] }
 0x224   : > { %v1992_v21 = vadd.f32 %v1991_v30, %v1961_v51  ;;  %1895 = vst [vmem:[%s4147_s6 + $0x58] sm:$0xff] %v1781_v26  ;;  %v1776_v45 = vadd.f32 %v1775_v17, %v4069_v4  ;;  %v1924_v58 = vadd.f32 %v1923_v54, %v1771_v62  ;;  %v4249_v39 = vadd.f32 %v1855_v31, %v1631_v9 }
 0x225   : > { %1911 = vst [vmem:[%s4147_s6 + $0xd8] sm:$0xff] %v4240_v24  ;;  %v2370_v55 = vpop.f32.mrf.mxu0  ;;  %v2394_v47 = vpop.f32.mrf.mxu1  ;;  %v1426_v18 = vadd.f32 %v4131_v14, %v4493_v60  ;;  %v1964_v25 = vmul.f32 %v1781_v26, %v1781_v26  ;;  %v1969_v31 = vmul.f32 %v4157_v20, %v4157_v20 }
 0x226   : > { %1894 = vst [vmem:[%s4147_s6 + $0x50] sm:$0xff] %v1776_v45  ;;  %v1925_v29 = vadd.f32 %v1924_v58, %v1776_v45  ;;  %v1963_v40 = vmul.f32 %v1776_v45, %v1776_v45  ;;  %v1993_v27 = vadd.f32 %v1992_v21, %v1962_v6  ;;  %v1791_v4 = vadd.f32 %v2370_v55, %v4491_v48 }
 0x227   : > { %1910 = vst [vmem:[%s4147_s6 + $0xd0] sm:$0xff] %v4249_v39  ;;  %v4258_v5 = vadd.f32 %v2394_v47, %v1646_v8  ;;  %v1785_v53 = vpop.f32.mrf.mxu0  ;;  %v1865_v10 = vpop.f32.mrf.mxu1  ;;  %v1651_v13 = vadd.f32 %v4133_v41, %v1426_v18  ;;  %v1970_v45 = vmul.f32 %v4150_v59, %v4150_v59  ;;  %v1972_v47 = vmul.f32 %v4168_v15, %v4168_v15 }
 0x228   : > { %v1994_v11 = vadd.f32 %v1993_v27, %v1963_v40  ;;  %1897 = vst [vmem:[%s4147_s6 + $0x68] sm:$0xff] %v1791_v4  ;;  %v1786_v1 = vadd.f32 %v1785_v53, %v4494_v37  ;;  %v1926_v61 = vadd.f32 %v1925_v29, %v1781_v26  ;;  %v4265_v0 = vadd.f32 %v1865_v10, %v1641_v35 }
 0x229   : > { %1913 = vst [vmem:[%s4147_s6 + $0xe8] sm:$0xff] %v4258_v5  ;;  %v2373_v14 = vpop.f32.mrf.mxu0  ;;  %v2397_v62 = vpop.f32.mrf.mxu1  ;;  %v1966_v52 = vmul.f32 %v1791_v4, %v1791_v4 }
 0x22a   : > { %1896 = vst [vmem:[%s4147_s6 + $0x60] sm:$0xff] %v1786_v1  ;;  %v1927_v63 = vadd.f32 %v1926_v61, %v1786_v1  ;;  %v1965_v23 = vmul.f32 %v1786_v1, %v1786_v1  ;;  %v1995_v57 = vadd.f32 %v1994_v11, %v1964_v25  ;;  %v1801_v38 = vadd.f32 %v2373_v14, %v4495_v28 }
 0x22b   : > { %1912 = vst [vmem:[%s4147_s6 + $0xe0] sm:$0xff] %v4265_v0  ;;  %v4272_v49 = vadd.f32 %v2397_v62, %v1656_v44  ;;  %v1795_v46 = vpop.f32.mrf.mxu0  ;;  %v1875_v16 = vpop.f32.mrf.mxu1 }
 0x22c   : > { %v1996_v43 = vadd.f32 %v1995_v57, %v1965_v23  ;;  %1899 = vst [vmem:[%s4147_s6 + $0x78] sm:$0xff] %v1801_v38  ;;  %v1796_v56 = vadd.f32 %v1795_v46, %v4496_v36  ;;  %v1928_v54 = vadd.f32 %v1927_v63, %v1791_v4  ;;  %v1876_v51 = vadd.f32 %v1875_v16, %v1651_v13 }
 0x22d   : > { %1915 = vst [vmem:[%s4147_s6 + $0xf8] sm:$0xff] %v4272_v49  ;;  %v1968_v9 = vmul.f32 %v1801_v38, %v1801_v38 }
 0x22e   : > { %1898 = vst [vmem:[%s4147_s6 + $0x70] sm:$0xff] %v1796_v56  ;;  %v1929_v30 = vadd.f32 %v1928_v54, %v1796_v56  ;;  %v1967_v26 = vmul.f32 %v1796_v56, %v1796_v56  ;;  %v1997_v41 = vadd.f32 %v1996_v43, %v1966_v52  ;;  %1914 = vst [vmem:[%s4147_s6 + $0xf0] sm:$0xff] %v1876_v51 }
 0x22f   : > { %v1983_v28 = vmul.f32 %v1876_v51, %v1876_v51 }
 0x230   : > { %v1930_v19 = vadd.f32 %v1929_v30, %v1801_v38  ;;  %v1998_v17 = vadd.f32 %v1997_v41, %v1967_v26 }
 0x232   : > { %v1931_v6 = vadd.f32 %v1930_v19, %v4157_v20  ;;  %v1999_v21 = vadd.f32 %v1998_v17, %v1968_v9  ;;  %v1973_v20 = vmul.f32 %v4195_v2, %v4195_v2 }
 0x234   : > { %v1932_v58 = vadd.f32 %v1931_v6, %v4150_v59  ;;  %v2000_v8 = vadd.f32 %v1999_v21, %v1969_v31  ;;  %v1974_v59 = vmul.f32 %v4186_v12, %v4186_v12 }
 0x236   : > { %v1933_v7 = vadd.f32 %v1932_v58, %v4172_v50  ;;  %v2001_v55 = vadd.f32 %v2000_v8, %v1970_v45  ;;  %v1975_v50 = vmul.f32 %v4213_v3, %v4213_v3 }
 0x238   : > { %v1934_v29 = vadd.f32 %v1933_v7, %v4168_v15  ;;  %v2002_v40 = vadd.f32 %v2001_v55, %v1971_v22  ;;  %v1976_v15 = vmul.f32 %v4204_v34, %v4204_v34 }
 0x23a   : > { %v1935_v27 = vadd.f32 %v1934_v29, %v4195_v2  ;;  %v2003_v48 = vadd.f32 %v2002_v40, %v1972_v47  ;;  %v1977_v2 = vmul.f32 %v4231_v32, %v4231_v32 }
 0x23c   : > { %v1936_v4 = vadd.f32 %v1935_v27, %v4186_v12  ;;  %v2004_v42 = vadd.f32 %v2003_v48, %v1973_v20  ;;  %v1978_v12 = vmul.f32 %v4222_v33, %v4222_v33 }
 0x23e   : > { %v2005_v35 = vadd.f32 %v2004_v42, %v1974_v59  ;;  %v1937_v60 = vadd.f32 %v1936_v4, %v4213_v3  ;;  %v1979_v3 = vmul.f32 %v4249_v39, %v4249_v39 }
 0x240   : > { %v1938_v18 = vadd.f32 %v1937_v60, %v4204_v34  ;;  %v2006_v53 = vadd.f32 %v2005_v35, %v1975_v50  ;;  %v1980_v34 = vmul.f32 %v4240_v24, %v4240_v24 }
 0x242   : > { %v1939_v10 = vadd.f32 %v1938_v18, %v4231_v32  ;;  %v2007_v25 = vadd.f32 %v2006_v53, %v1976_v15  ;;  %v1981_v32 = vmul.f32 %v4265_v0, %v4265_v0 }
 0x244   : > { %v1940_v11 = vadd.f32 %v1939_v10, %v4222_v33  ;;  %v2008_v37 = vadd.f32 %v2007_v25, %v1977_v2  ;;  %v1982_v33 = vmul.f32 %v4258_v5, %v4258_v5 }
 0x246   : > { %v1941_v1 = vadd.f32 %v1940_v11, %v4249_v39  ;;  %v2009_v61 = vadd.f32 %v2008_v37, %v1978_v12 }
 0x248   : > { %v1942_v44 = vadd.f32 %v1941_v1, %v4240_v24  ;;  %v2010_v14 = vadd.f32 %v2009_v61, %v1979_v3  ;;  %v1984_v24 = vmul.f32 %v4272_v49, %v4272_v49 }
 0x24a   : > { %v1943_v62 = vadd.f32 %v1942_v44, %v4265_v0  ;;  %v2011_v63 = vadd.f32 %v2010_v14, %v1980_v34 }
 0x24c   : > { %v1944_v23 = vadd.f32 %v1943_v62, %v4258_v5  ;;  %v2012_v57 = vadd.f32 %v2011_v63, %v1981_v32 }
 0x24e   : > { %v1945_v39 = vadd.f32 %v1944_v23, %v1876_v51  ;;  %v2013_v38 = vadd.f32 %v2012_v57, %v1982_v33 }
 0x250   : > { %v1946_v13 = vadd.f32 %v1945_v39, %v4272_v49  ;;  %v2014_v46 = vadd.f32 %v2013_v38, %v1983_v28 }
 0x252   : > { %v1947_v16 = vrot.slane %v1946_v13, 4  ;;  %v2015_v52 = vadd.f32 %v2014_v46, %v1984_v24 }
 0x254   : > { %v1948_v0 = vadd.f32 %v1947_v16, %v1946_v13  ;;  %v2016_v43 = vrot.slane %v2015_v52, 4 }
 0x256   : > { %v1949_v36 = vrot.slane %v1948_v0, 2  ;;  %v2017_v56 = vadd.f32 %v2016_v43, %v2015_v52 }
 0x258   : > { %v1950_v54 = vadd.f32 %v1949_v36, %v1948_v0  ;;  %v2018_v30 = vrot.slane %v2017_v56, 2 }
 0x25a   : > { %v1951_v5 = vrot.slane %v1950_v54, 1  ;;  %v2019_v26 = vadd.f32 %v2018_v30, %v2017_v56 }
 0x25c   : > { %v2020_v41 = vrot.slane %v2019_v26, 1  ;;  %v1952_v51 = vadd.f32 %v1951_v5, %v1950_v54 }
 0x25e   : > { %v2021_v9 = vadd.f32 %v2020_v41, %v2019_v26 }
 0x260   : > { %v2022_v49 = vsel %vm409_vm0, %v1952_v51, %v2021_v9 }
 0x261   : > { %2023 = vst [vmem:[%s235_s9] sm:$0x3] %v2022_v49 }
 0x262 PF: > { %s16_s18 = sadd.s32 1, %s2445_s18  }
 0x263   : > { %p13_p4 = scmp.ge.s32.totalorder %s16_s18, 4  }
 0x265   :  { %15 = sbr.rel (!%p13_p4) target bundleno = 1 (0x1), region = 78 }

</bundles_post_ra>
